<compile_context>
chip_gen: v7x
topology: tpu7x:2x2x1
jax: 0.10.0
libtpu: 0.0.40
codegen_flags: <defaults>
</compile_context>

<pallas_src>
import functools

import jax
import jax.numpy as jnp
from jax import lax
from jax.experimental import pallas as pl
from jax.experimental.pallas import tpu as pltpu


def _basic_block_kernel(x_ref, w1_ref, b1_ref, w2_ref, b2_ref, o_ref,
                        xpad_ref, ypad_ref, *, H, W):
    """Fused BasicBlock forward for one batch element per grid step.

    x_ref    : (1, H, W, Cin)      input block (unpadded)
    w1_ref   : (3, 3, Cin, Cmid)   conv1 HWIO weights, BN1 scale pre-folded
    b1_ref   : (1, 1, Cmid)        BN1 shift
    w2_ref   : (3, 3, Cmid, Cout)  conv2 HWIO weights, BN2 scale pre-folded
    b2_ref   : (1, 1, Cout)        BN2 shift
    o_ref    : (1, H, W, Cout)     output block
    xpad_ref : (H+2, W+2, Cin)     VMEM scratch: input + halo
    ypad_ref : (H+2, W+2, Cmid)    VMEM scratch: conv1 output + halo (never
                                   written to HBM)
    """

    def conv3x3(src_ref, w_ref, b_ref):
        # 3x3, stride=1, pad=1 conv as 9 shifted channel contractions with f32
        # accumulation (operands keep their native dtype -> bf16 MXU feed when
        # the wrapper is given bf16 inputs).  The sublane (W-axis) shift is
        # hoisted out of the kh loop: 3 shifted loads instead of 9; the kh
        # shift is an outer-dim slice of the loaded value and costs nothing.
        cout = w_ref.shape[-1]
        acc = jnp.broadcast_to(b_ref[...], (H, W, cout)).astype(jnp.float32)
        for kw in range(3):
            cols = src_ref[pl.ds(0, H + 2), pl.ds(kw, W), :]   # (H+2, W, Cin)
            for kh in range(3):
                patch = cols[kh:kh + H]                        # (H, W, Cin)
                acc = acc + lax.dot_general(
                    patch, w_ref[kh, kw],
                    dimension_numbers=(((2,), (0,)), ((), ())),
                    preferred_element_type=jnp.float32)
        return acc

    # ---- stage 1: conv1 + (folded) BN1 + ReLU -------------------------------
    # Halo built in-kernel: zero the padded scratch, write the interior.
    # (Re-zeroed every step so megacore sharding of the batch axis stays safe;
    # the buffer is tiny, so this is noise.)
    xpad_ref[...] = jnp.zeros_like(xpad_ref)
    xpad_ref[pl.ds(1, H), pl.ds(1, W), :] = x_ref[0]

    # activation_type -> ReLU ('float' scheme); leaky variant would be
    # jnp.where(y > 0, y, slope * y).
    y = jnp.maximum(conv3x3(xpad_ref, w1_ref, b1_ref), 0.0)

    # ---- stage 2: conv2 + (folded) BN2 + residual + ReLU --------------------
    # Intermediate stays in VMEM; no HBM round-trip between the two convs.
    ypad_ref[...] = jnp.zeros_like(ypad_ref)
    ypad_ref[pl.ds(1, H), pl.ds(1, W), :] = y.astype(ypad_ref.dtype)

    out = conv3x3(ypad_ref, w2_ref, b2_ref)
    # Residual: reuse the x block that is already resident in VMEM.
    out = out + x_ref[0].astype(jnp.float32)
    out = jnp.maximum(out, 0.0)

    o_ref[...] = out[None].astype(o_ref.dtype)


def fold_bn(gamma, beta, mean, var, eps=1e-5):
    scale = gamma / jnp.sqrt(var + eps)
    shift = beta - mean * scale
    return scale, shift


def basic_block_forward(x_nchw, params, *, eps=1e-5):
    """BasicBlock.forward (q_scheme='float', stride=1, downsample=None)."""
    x = jnp.transpose(x_nchw, (0, 2, 3, 1))          # NCHW -> NHWC
    N, H, W, Cin = x.shape

    s1, b1 = fold_bn(*params["bn1"], eps=eps)
    s2, b2 = fold_bn(*params["bn2"], eps=eps)

    # Fold BN scale into the conv weights (conv is linear); only the shift is
    # applied per-element inside the kernel.
    w1_eff = (params["w1"].astype(jnp.float32) * s1[None, None, None, :]).astype(x.dtype)
    w2_eff = (params["w2"].astype(jnp.float32) * s2[None, None, None, :]).astype(x.dtype)
    Cmid = w1_eff.shape[-1]
    Cout = w2_eff.shape[-1]
    assert Cin == Cout, "stride=1 / downsample=None requires inplanes == planes"

    kernel = functools.partial(_basic_block_kernel, H=H, W=W)

    out_nhwc = pl.pallas_call(
        kernel,
        out_shape=jax.ShapeDtypeStruct((N, H, W, Cout), x.dtype),
        grid=(N,),
        in_specs=[
            pl.BlockSpec((1, H, W, Cin), lambda n: (n, 0, 0, 0)),
            pl.BlockSpec((3, 3, Cin, Cmid), lambda n: (0, 0, 0, 0)),
            pl.BlockSpec((1, 1, Cmid), lambda n: (0, 0, 0)),
            pl.BlockSpec((3, 3, Cmid, Cout), lambda n: (0, 0, 0, 0)),
            pl.BlockSpec((1, 1, Cout), lambda n: (0, 0, 0)),
        ],
        out_specs=pl.BlockSpec((1, H, W, Cout), lambda n: (n, 0, 0, 0)),
        scratch_shapes=[
            pltpu.VMEM((H + 2, W + 2, Cin), x.dtype),    # padded input
            pltpu.VMEM((H + 2, W + 2, Cmid), x.dtype),   # padded conv1 output
        ],
        compiler_params=pltpu.CompilerParams(
            dimension_semantics=("parallel",),           # 2 TCs on v7x (N=2)
            vmem_limit_bytes=32 * 1024 * 1024),
    )(x, w1_eff, b1.reshape(1, 1, Cmid).astype(jnp.float32),
      w2_eff, b2.reshape(1, 1, Cout).astype(jnp.float32))

    return jnp.transpose(out_nhwc, (0, 3, 1, 2))         # NHWC -> NCHW


# ---------------- pure-JAX reference for the correctness check ----------------
def _ref_conv_bn_act(x, w, scale, shift, residual=None):
    y = lax.conv_general_dilated(
        x.astype(jnp.float32), w.astype(jnp.float32),
        window_strides=(1, 1), padding="SAME",
        dimension_numbers=("NHWC", "HWIO", "NHWC"))
    y = y * scale.reshape(1, 1, 1, -1) + shift.reshape(1, 1, 1, -1)
    if residual is not None:
        y = y + residual.astype(jnp.float32)
    return jnp.maximum(y, 0.0)


def _ref_forward(x_nchw, params):
    x = jnp.transpose(x_nchw, (0, 2, 3, 1))
    s1, b1 = fold_bn(*params["bn1"])
    s2, b2 = fold_bn(*params["bn2"])
    out = _ref_conv_bn_act(x, params["w1"], s1, b1)
    out = _ref_conv_bn_act(out, params["w2"], s2, b2, residual=x)
    return jnp.transpose(out, (0, 3, 1, 2))


if __name__ == "__main__":
    # Small shapes consistent with the module: N=2, inplanes=planes=4, 16x16.
    N, C, H, W = 2, 4, 16, 16
    inplanes = planes = C

    key = jax.random.PRNGKey(0)
    kx, kw1, kw2, kg1, kb1, kg2, kb2, km1, kv1, km2, kv2 = jax.random.split(key, 11)

    x = jax.random.normal(kx, (N, C, H, W), jnp.float32)

    params = {
        # conv weights in HWIO layout (torch OIHW transposed)
        "w1": 0.1 * jax.random.normal(kw1, (3, 3, inplanes, planes), jnp.float32),
        "w2": 0.1 * jax.random.normal(kw2, (3, 3, planes, planes), jnp.float32),
        # bn params: (gamma, beta, running_mean, running_var) — inference stats
        "bn1": (1.0 + 0.1 * jax.random.normal(kg1, (planes,)),
                0.1 * jax.random.normal(kb1, (planes,)),
                0.1 * jax.random.normal(km1, (planes,)),
                1.0 + 0.1 * jnp.abs(jax.random.normal(kv1, (planes,)))),
        "bn2": (1.0 + 0.1 * jax.random.normal(kg2, (planes,)),
                0.1 * jax.random.normal(kb2, (planes,)),
                0.1 * jax.random.normal(km2, (planes,)),
                1.0 + 0.1 * jnp.abs(jax.random.normal(kv2, (planes,)))),
    }
    # TODO(synk): 'xnor'/'bwn' q_schemes (BinarizeConv2d/BWConv2d) and the exact
    # binarized_modules.get_activation are external; 'float' scheme + ReLU used.

    out = basic_block_forward(x, params)
    jax.block_until_ready(out)

    ref = _ref_forward(x, params)
    assert out.shape == (N, planes, H, W)
    assert jnp.allclose(out, ref, atol=1e-4, rtol=1e-4), "mismatch vs reference"

    print("KERNEL_OK")
</pallas_src>

<mosaic_0001>
module attributes {stable_mosaic.version = 11 : i64} {
  func.func @_basic_block_kernel(%arg0: i32, %arg1: memref<1x16x16x4xf32, #tpu.memory_space<vmem>>, %arg2: memref<3x3x4x4xf32, #tpu.memory_space<vmem>>, %arg3: memref<1x1x4xf32, #tpu.memory_space<vmem>>, %arg4: memref<3x3x4x4xf32, #tpu.memory_space<vmem>>, %arg5: memref<1x1x4xf32, #tpu.memory_space<vmem>>, %arg6: memref<1x16x16x4xf32, #tpu.memory_space<vmem>>, %arg7: memref<18x18x4xf32, #tpu.memory_space<vmem>>, %arg8: memref<18x18x4xf32, #tpu.memory_space<vmem>>) attributes {dimension_semantics = [#tpu.dimension_semantics<parallel>], iteration_bounds = array<i64: 2>, scalar_prefetch = 0 : i64, scratch_operands = 2 : i64, tpu.core_type = #tpu.core_type<tc>, window_params = [{transform_indices = @transform_0, window_bounds = array<i64: 1, 16, 16, 4>}, {pipeline_mode = #tpu.pipeline_mode<synchronous>, transform_indices = @transform_1, window_bounds = array<i64: 3, 3, 4, 4>}, {pipeline_mode = #tpu.pipeline_mode<synchronous>, transform_indices = @transform_2, window_bounds = array<i64: 1, 1, 4>}, {pipeline_mode = #tpu.pipeline_mode<synchronous>, transform_indices = @transform_3, window_bounds = array<i64: 3, 3, 4, 4>}, {pipeline_mode = #tpu.pipeline_mode<synchronous>, transform_indices = @transform_4, window_bounds = array<i64: 1, 1, 4>}, {transform_indices = @transform_5, window_bounds = array<i64: 1, 16, 16, 4>}]} {
    %cst = arith.constant 0.000000e+00 : f32
    %0 = vector.broadcast %cst : f32 to vector<18x18x4xf32>
    %c0 = arith.constant 0 : index
    %c0_0 = arith.constant 0 : index
    %c0_1 = arith.constant 0 : index
    %1 = vector.load %arg7[%c0, %c0_0, %c0_1] : memref<18x18x4xf32, #tpu.memory_space<vmem>>, vector<18x18x4xf32>
    tpu.vector_store %arg7[%c0, %c0_0, %c0_1], %0 {strides = array<i32>} : memref<18x18x4xf32, #tpu.memory_space<vmem>>, vector<18x18x4xf32>,
    %c0_2 = arith.constant 0 : index
    %c0_3 = arith.constant 0 : index
    %c0_4 = arith.constant 0 : index
    %c0_5 = arith.constant 0 : index
    %2 = vector.load %arg1[%c0_2, %c0_3, %c0_4, %c0_5] : memref<1x16x16x4xf32, #tpu.memory_space<vmem>>, vector<1x16x16x4xf32>
    %3 = vector.shape_cast %2 : vector<1x16x16x4xf32> to vector<16x16x4xf32>
    %c1 = arith.constant 1 : index
    %c1_6 = arith.constant 1 : index
    %c0_7 = arith.constant 0 : index
    %4 = vector.load %arg7[%c1, %c1_6, %c0_7] : memref<18x18x4xf32, #tpu.memory_space<vmem>>, vector<16x16x4xf32>
    tpu.vector_store %arg7[%c1, %c1_6, %c0_7], %3 {strides = array<i32>} : memref<18x18x4xf32, #tpu.memory_space<vmem>>, vector<16x16x4xf32>,
    %c0_8 = arith.constant 0 : index
    %c0_9 = arith.constant 0 : index
    %c0_10 = arith.constant 0 : index
    %5 = vector.load %arg3[%c0_8, %c0_9, %c0_10] : memref<1x1x4xf32, #tpu.memory_space<vmem>>, vector<1x1x4xf32>
    %6 = vector.shape_cast %5 : vector<1x1x4xf32> to vector<1x1x4xf32>
    %7 = vector.broadcast %6 : vector<1x1x4xf32> to vector<16x16x4xf32>
    %c0_11 = arith.constant 0 : index
    %c0_12 = arith.constant 0 : index
    %c0_13 = arith.constant 0 : index
    %8 = vector.load %arg7[%c0_11, %c0_12, %c0_13] : memref<18x18x4xf32, #tpu.memory_space<vmem>>, vector<18x16x4xf32>
    %9 = vector.extract_strided_slice %8 {offsets = [0, 0, 0], sizes = [16, 16, 4], strides = [1, 1, 1]} : vector<18x16x4xf32> to vector<16x16x4xf32>
    %c0_14 = arith.constant 0 : index
    %c0_15 = arith.constant 0 : index
    %c0_16 = arith.constant 0 : index
    %c0_17 = arith.constant 0 : index
    %10 = vector.load %arg2[%c0_14, %c0_15, %c0_16, %c0_17] : memref<3x3x4x4xf32, #tpu.memory_space<vmem>>, vector<1x1x4x4xf32>
    %11 = vector.shape_cast %10 : vector<1x1x4x4xf32> to vector<4x4xf32>
    %cst_18 = arith.constant dense<0.000000e+00> : vector<16x16x4xf32>
    %12 = tpu.matmul %9, %11, %cst_18 {dimension_numbers = #tpu.dot_dimension_numbers<[2], [0], [0, 1], [1], [0, 0, 0, 1, 1, 1], [], []>} : vector<16x16x4xf32>, vector<4x4xf32>, vector<16x16x4xf32> -> vector<16x16x4xf32>
    %13 = arith.addf %7, %12 : vector<16x16x4xf32>
    %14 = vector.extract_strided_slice %8 {offsets = [1, 0, 0], sizes = [16, 16, 4], strides = [1, 1, 1]} : vector<18x16x4xf32> to vector<16x16x4xf32>
    %c1_19 = arith.constant 1 : index
    %c0_20 = arith.constant 0 : index
    %c0_21 = arith.constant 0 : index
    %c0_22 = arith.constant 0 : index
    %15 = vector.load %arg2[%c1_19, %c0_20, %c0_21, %c0_22] : memref<3x3x4x4xf32, #tpu.memory_space<vmem>>, vector<1x1x4x4xf32>
    %16 = vector.shape_cast %15 : vector<1x1x4x4xf32> to vector<4x4xf32>
    %cst_23 = arith.constant dense<0.000000e+00> : vector<16x16x4xf32>
    %17 = tpu.matmul %14, %16, %cst_23 {dimension_numbers = #tpu.dot_dimension_numbers<[2], [0], [0, 1], [1], [0, 0, 0, 1, 1, 1], [], []>} : vector<16x16x4xf32>, vector<4x4xf32>, vector<16x16x4xf32> -> vector<16x16x4xf32>
    %18 = arith.addf %13, %17 : vector<16x16x4xf32>
    %19 = vector.extract_strided_slice %8 {offsets = [2, 0, 0], sizes = [16, 16, 4], strides = [1, 1, 1]} : vector<18x16x4xf32> to vector<16x16x4xf32>
    %c2 = arith.constant 2 : index
    %c0_24 = arith.constant 0 : index
    %c0_25 = arith.constant 0 : index
    %c0_26 = arith.constant 0 : index
    %20 = vector.load %arg2[%c2, %c0_24, %c0_25, %c0_26] : memref<3x3x4x4xf32, #tpu.memory_space<vmem>>, vector<1x1x4x4xf32>
    %21 = vector.shape_cast %20 : vector<1x1x4x4xf32> to vector<4x4xf32>
    %cst_27 = arith.constant dense<0.000000e+00> : vector<16x16x4xf32>
    %22 = tpu.matmul %19, %21, %cst_27 {dimension_numbers = #tpu.dot_dimension_numbers<[2], [0], [0, 1], [1], [0, 0, 0, 1, 1, 1], [], []>} : vector<16x16x4xf32>, vector<4x4xf32>, vector<16x16x4xf32> -> vector<16x16x4xf32>
    %23 = arith.addf %18, %22 : vector<16x16x4xf32>
    %c0_28 = arith.constant 0 : index
    %c1_29 = arith.constant 1 : index
    %c0_30 = arith.constant 0 : index
    %24 = vector.load %arg7[%c0_28, %c1_29, %c0_30] : memref<18x18x4xf32, #tpu.memory_space<vmem>>, vector<18x16x4xf32>
    %25 = vector.extract_strided_slice %24 {offsets = [0, 0, 0], sizes = [16, 16, 4], strides = [1, 1, 1]} : vector<18x16x4xf32> to vector<16x16x4xf32>
    %c0_31 = arith.constant 0 : index
    %c1_32 = arith.constant 1 : index
    %c0_33 = arith.constant 0 : index
    %c0_34 = arith.constant 0 : index
    %26 = vector.load %arg2[%c0_31, %c1_32, %c0_33, %c0_34] : memref<3x3x4x4xf32, #tpu.memory_space<vmem>>, vector<1x1x4x4xf32>
    %27 = vector.shape_cast %26 : vector<1x1x4x4xf32> to vector<4x4xf32>
    %cst_35 = arith.constant dense<0.000000e+00> : vector<16x16x4xf32>
    %28 = tpu.matmul %25, %27, %cst_35 {dimension_numbers = #tpu.dot_dimension_numbers<[2], [0], [0, 1], [1], [0, 0, 0, 1, 1, 1], [], []>} : vector<16x16x4xf32>, vector<4x4xf32>, vector<16x16x4xf32> -> vector<16x16x4xf32>
    %29 = arith.addf %23, %28 : vector<16x16x4xf32>
    %30 = vector.extract_strided_slice %24 {offsets = [1, 0, 0], sizes = [16, 16, 4], strides = [1, 1, 1]} : vector<18x16x4xf32> to vector<16x16x4xf32>
    %c1_36 = arith.constant 1 : index
    %c1_37 = arith.constant 1 : index
    %c0_38 = arith.constant 0 : index
    %c0_39 = arith.constant 0 : index
    %31 = vector.load %arg2[%c1_36, %c1_37, %c0_38, %c0_39] : memref<3x3x4x4xf32, #tpu.memory_space<vmem>>, vector<1x1x4x4xf32>
    %32 = vector.shape_cast %31 : vector<1x1x4x4xf32> to vector<4x4xf32>
    %cst_40 = arith.constant dense<0.000000e+00> : vector<16x16x4xf32>
    %33 = tpu.matmul %30, %32, %cst_40 {dimension_numbers = #tpu.dot_dimension_numbers<[2], [0], [0, 1], [1], [0, 0, 0, 1, 1, 1], [], []>} : vector<16x16x4xf32>, vector<4x4xf32>, vector<16x16x4xf32> -> vector<16x16x4xf32>
    %34 = arith.addf %29, %33 : vector<16x16x4xf32>
    %35 = vector.extract_strided_slice %24 {offsets = [2, 0, 0], sizes = [16, 16, 4], strides = [1, 1, 1]} : vector<18x16x4xf32> to vector<16x16x4xf32>
    %c2_41 = arith.constant 2 : index
    %c1_42 = arith.constant 1 : index
    %c0_43 = arith.constant 0 : index
    %c0_44 = arith.constant 0 : index
    %36 = vector.load %arg2[%c2_41, %c1_42, %c0_43, %c0_44] : memref<3x3x4x4xf32, #tpu.memory_space<vmem>>, vector<1x1x4x4xf32>
    %37 = vector.shape_cast %36 : vector<1x1x4x4xf32> to vector<4x4xf32>
    %cst_45 = arith.constant dense<0.000000e+00> : vector<16x16x4xf32>
    %38 = tpu.matmul %35, %37, %cst_45 {dimension_numbers = #tpu.dot_dimension_numbers<[2], [0], [0, 1], [1], [0, 0, 0, 1, 1, 1], [], []>} : vector<16x16x4xf32>, vector<4x4xf32>, vector<16x16x4xf32> -> vector<16x16x4xf32>
    %39 = arith.addf %34, %38 : vector<16x16x4xf32>
    %c0_46 = arith.constant 0 : index
    %c2_47 = arith.constant 2 : index
    %c0_48 = arith.constant 0 : index
    %40 = vector.load %arg7[%c0_46, %c2_47, %c0_48] : memref<18x18x4xf32, #tpu.memory_space<vmem>>, vector<18x16x4xf32>
    %41 = vector.extract_strided_slice %40 {offsets = [0, 0, 0], sizes = [16, 16, 4], strides = [1, 1, 1]} : vector<18x16x4xf32> to vector<16x16x4xf32>
    %c0_49 = arith.constant 0 : index
    %c2_50 = arith.constant 2 : index
    %c0_51 = arith.constant 0 : index
    %c0_52 = arith.constant 0 : index
    %42 = vector.load %arg2[%c0_49, %c2_50, %c0_51, %c0_52] : memref<3x3x4x4xf32, #tpu.memory_space<vmem>>, vector<1x1x4x4xf32>
    %43 = vector.shape_cast %42 : vector<1x1x4x4xf32> to vector<4x4xf32>
    %cst_53 = arith.constant dense<0.000000e+00> : vector<16x16x4xf32>
    %44 = tpu.matmul %41, %43, %cst_53 {dimension_numbers = #tpu.dot_dimension_numbers<[2], [0], [0, 1], [1], [0, 0, 0, 1, 1, 1], [], []>} : vector<16x16x4xf32>, vector<4x4xf32>, vector<16x16x4xf32> -> vector<16x16x4xf32>
    %45 = arith.addf %39, %44 : vector<16x16x4xf32>
    %46 = vector.extract_strided_slice %40 {offsets = [1, 0, 0], sizes = [16, 16, 4], strides = [1, 1, 1]} : vector<18x16x4xf32> to vector<16x16x4xf32>
    %c1_54 = arith.constant 1 : index
    %c2_55 = arith.constant 2 : index
    %c0_56 = arith.constant 0 : index
    %c0_57 = arith.constant 0 : index
    %47 = vector.load %arg2[%c1_54, %c2_55, %c0_56, %c0_57] : memref<3x3x4x4xf32, #tpu.memory_space<vmem>>, vector<1x1x4x4xf32>
    %48 = vector.shape_cast %47 : vector<1x1x4x4xf32> to vector<4x4xf32>
    %cst_58 = arith.constant dense<0.000000e+00> : vector<16x16x4xf32>
    %49 = tpu.matmul %46, %48, %cst_58 {dimension_numbers = #tpu.dot_dimension_numbers<[2], [0], [0, 1], [1], [0, 0, 0, 1, 1, 1], [], []>} : vector<16x16x4xf32>, vector<4x4xf32>, vector<16x16x4xf32> -> vector<16x16x4xf32>
    %50 = arith.addf %45, %49 : vector<16x16x4xf32>
    %51 = vector.extract_strided_slice %40 {offsets = [2, 0, 0], sizes = [16, 16, 4], strides = [1, 1, 1]} : vector<18x16x4xf32> to vector<16x16x4xf32>
    %c2_59 = arith.constant 2 : index
    %c2_60 = arith.constant 2 : index
    %c0_61 = arith.constant 0 : index
    %c0_62 = arith.constant 0 : index
    %52 = vector.load %arg2[%c2_59, %c2_60, %c0_61, %c0_62] : memref<3x3x4x4xf32, #tpu.memory_space<vmem>>, vector<1x1x4x4xf32>
    %53 = vector.shape_cast %52 : vector<1x1x4x4xf32> to vector<4x4xf32>
    %cst_63 = arith.constant dense<0.000000e+00> : vector<16x16x4xf32>
    %54 = tpu.matmul %51, %53, %cst_63 {dimension_numbers = #tpu.dot_dimension_numbers<[2], [0], [0, 1], [1], [0, 0, 0, 1, 1, 1], [], []>} : vector<16x16x4xf32>, vector<4x4xf32>, vector<16x16x4xf32> -> vector<16x16x4xf32>
    %55 = arith.addf %50, %54 : vector<16x16x4xf32>
    %cst_64 = arith.constant 0.000000e+00 : f32
    %56 = vector.broadcast %cst_64 : f32 to vector<16x16x4xf32>
    %57 = arith.maximumf %55, %56 : vector<16x16x4xf32>
    %cst_65 = arith.constant 0.000000e+00 : f32
    %58 = vector.broadcast %cst_65 : f32 to vector<18x18x4xf32>
    %c0_66 = arith.constant 0 : index
    %c0_67 = arith.constant 0 : index
    %c0_68 = arith.constant 0 : index
    %59 = vector.load %arg8[%c0_66, %c0_67, %c0_68] : memref<18x18x4xf32, #tpu.memory_space<vmem>>, vector<18x18x4xf32>
    tpu.vector_store %arg8[%c0_66, %c0_67, %c0_68], %58 {strides = array<i32>} : memref<18x18x4xf32, #tpu.memory_space<vmem>>, vector<18x18x4xf32>,
    %c1_69 = arith.constant 1 : index
    %c1_70 = arith.constant 1 : index
    %c0_71 = arith.constant 0 : index
    %60 = vector.load %arg8[%c1_69, %c1_70, %c0_71] : memref<18x18x4xf32, #tpu.memory_space<vmem>>, vector<16x16x4xf32>
    tpu.vector_store %arg8[%c1_69, %c1_70, %c0_71], %57 {strides = array<i32>} : memref<18x18x4xf32, #tpu.memory_space<vmem>>, vector<16x16x4xf32>,
    %c0_72 = arith.constant 0 : index
    %c0_73 = arith.constant 0 : index
    %c0_74 = arith.constant 0 : index
    %61 = vector.load %arg5[%c0_72, %c0_73, %c0_74] : memref<1x1x4xf32, #tpu.memory_space<vmem>>, vector<1x1x4xf32>
    %62 = vector.shape_cast %61 : vector<1x1x4xf32> to vector<1x1x4xf32>
    %63 = vector.broadcast %62 : vector<1x1x4xf32> to vector<16x16x4xf32>
    %c0_75 = arith.constant 0 : index
    %c0_76 = arith.constant 0 : index
    %c0_77 = arith.constant 0 : index
    %64 = vector.load %arg8[%c0_75, %c0_76, %c0_77] : memref<18x18x4xf32, #tpu.memory_space<vmem>>, vector<18x16x4xf32>
    %65 = vector.extract_strided_slice %64 {offsets = [0, 0, 0], sizes = [16, 16, 4], strides = [1, 1, 1]} : vector<18x16x4xf32> to vector<16x16x4xf32>
    %c0_78 = arith.constant 0 : index
    %c0_79 = arith.constant 0 : index
    %c0_80 = arith.constant 0 : index
    %c0_81 = arith.constant 0 : index
    %66 = vector.load %arg4[%c0_78, %c0_79, %c0_80, %c0_81] : memref<3x3x4x4xf32, #tpu.memory_space<vmem>>, vector<1x1x4x4xf32>
    %67 = vector.shape_cast %66 : vector<1x1x4x4xf32> to vector<4x4xf32>
    %cst_82 = arith.constant dense<0.000000e+00> : vector<16x16x4xf32>
    %68 = tpu.matmul %65, %67, %cst_82 {dimension_numbers = #tpu.dot_dimension_numbers<[2], [0], [0, 1], [1], [0, 0, 0, 1, 1, 1], [], []>} : vector<16x16x4xf32>, vector<4x4xf32>, vector<16x16x4xf32> -> vector<16x16x4xf32>
    %69 = arith.addf %63, %68 : vector<16x16x4xf32>
    %70 = vector.extract_strided_slice %64 {offsets = [1, 0, 0], sizes = [16, 16, 4], strides = [1, 1, 1]} : vector<18x16x4xf32> to vector<16x16x4xf32>
    %c1_83 = arith.constant 1 : index
    %c0_84 = arith.constant 0 : index
    %c0_85 = arith.constant 0 : index
    %c0_86 = arith.constant 0 : index
    %71 = vector.load %arg4[%c1_83, %c0_84, %c0_85, %c0_86] : memref<3x3x4x4xf32, #tpu.memory_space<vmem>>, vector<1x1x4x4xf32>
    %72 = vector.shape_cast %71 : vector<1x1x4x4xf32> to vector<4x4xf32>
    %cst_87 = arith.constant dense<0.000000e+00> : vector<16x16x4xf32>
    %73 = tpu.matmul %70, %72, %cst_87 {dimension_numbers = #tpu.dot_dimension_numbers<[2], [0], [0, 1], [1], [0, 0, 0, 1, 1, 1], [], []>} : vector<16x16x4xf32>, vector<4x4xf32>, vector<16x16x4xf32> -> vector<16x16x4xf32>
    %74 = arith.addf %69, %73 : vector<16x16x4xf32>
    %75 = vector.extract_strided_slice %64 {offsets = [2, 0, 0], sizes = [16, 16, 4], strides = [1, 1, 1]} : vector<18x16x4xf32> to vector<16x16x4xf32>
    %c2_88 = arith.constant 2 : index
    %c0_89 = arith.constant 0 : index
    %c0_90 = arith.constant 0 : index
    %c0_91 = arith.constant 0 : index
    %76 = vector.load %arg4[%c2_88, %c0_89, %c0_90, %c0_91] : memref<3x3x4x4xf32, #tpu.memory_space<vmem>>, vector<1x1x4x4xf32>
    %77 = vector.shape_cast %76 : vector<1x1x4x4xf32> to vector<4x4xf32>
    %cst_92 = arith.constant dense<0.000000e+00> : vector<16x16x4xf32>
    %78 = tpu.matmul %75, %77, %cst_92 {dimension_numbers = #tpu.dot_dimension_numbers<[2], [0], [0, 1], [1], [0, 0, 0, 1, 1, 1], [], []>} : vector<16x16x4xf32>, vector<4x4xf32>, vector<16x16x4xf32> -> vector<16x16x4xf32>
    %79 = arith.addf %74, %78 : vector<16x16x4xf32>
    %c0_93 = arith.constant 0 : index
    %c1_94 = arith.constant 1 : index
    %c0_95 = arith.constant 0 : index
    %80 = vector.load %arg8[%c0_93, %c1_94, %c0_95] : memref<18x18x4xf32, #tpu.memory_space<vmem>>, vector<18x16x4xf32>
    %81 = vector.extract_strided_slice %80 {offsets = [0, 0, 0], sizes = [16, 16, 4], strides = [1, 1, 1]} : vector<18x16x4xf32> to vector<16x16x4xf32>
    %c0_96 = arith.constant 0 : index
    %c1_97 = arith.constant 1 : index
    %c0_98 = arith.constant 0 : index
    %c0_99 = arith.constant 0 : index
    %82 = vector.load %arg4[%c0_96, %c1_97, %c0_98, %c0_99] : memref<3x3x4x4xf32, #tpu.memory_space<vmem>>, vector<1x1x4x4xf32>
    %83 = vector.shape_cast %82 : vector<1x1x4x4xf32> to vector<4x4xf32>
    %cst_100 = arith.constant dense<0.000000e+00> : vector<16x16x4xf32>
    %84 = tpu.matmul %81, %83, %cst_100 {dimension_numbers = #tpu.dot_dimension_numbers<[2], [0], [0, 1], [1], [0, 0, 0, 1, 1, 1], [], []>} : vector<16x16x4xf32>, vector<4x4xf32>, vector<16x16x4xf32> -> vector<16x16x4xf32>
    %85 = arith.addf %79, %84 : vector<16x16x4xf32>
    %86 = vector.extract_strided_slice %80 {offsets = [1, 0, 0], sizes = [16, 16, 4], strides = [1, 1, 1]} : vector<18x16x4xf32> to vector<16x16x4xf32>
    %c1_101 = arith.constant 1 : index
    %c1_102 = arith.constant 1 : index
    %c0_103 = arith.constant 0 : index
    %c0_104 = arith.constant 0 : index
    %87 = vector.load %arg4[%c1_101, %c1_102, %c0_103, %c0_104] : memref<3x3x4x4xf32, #tpu.memory_space<vmem>>, vector<1x1x4x4xf32>
    %88 = vector.shape_cast %87 : vector<1x1x4x4xf32> to vector<4x4xf32>
    %cst_105 = arith.constant dense<0.000000e+00> : vector<16x16x4xf32>
    %89 = tpu.matmul %86, %88, %cst_105 {dimension_numbers = #tpu.dot_dimension_numbers<[2], [0], [0, 1], [1], [0, 0, 0, 1, 1, 1], [], []>} : vector<16x16x4xf32>, vector<4x4xf32>, vector<16x16x4xf32> -> vector<16x16x4xf32>
    %90 = arith.addf %85, %89 : vector<16x16x4xf32>
    %91 = vector.extract_strided_slice %80 {offsets = [2, 0, 0], sizes = [16, 16, 4], strides = [1, 1, 1]} : vector<18x16x4xf32> to vector<16x16x4xf32>
    %c2_106 = arith.constant 2 : index
    %c1_107 = arith.constant 1 : index
    %c0_108 = arith.constant 0 : index
    %c0_109 = arith.constant 0 : index
    %92 = vector.load %arg4[%c2_106, %c1_107, %c0_108, %c0_109] : memref<3x3x4x4xf32, #tpu.memory_space<vmem>>, vector<1x1x4x4xf32>
    %93 = vector.shape_cast %92 : vector<1x1x4x4xf32> to vector<4x4xf32>
    %cst_110 = arith.constant dense<0.000000e+00> : vector<16x16x4xf32>
    %94 = tpu.matmul %91, %93, %cst_110 {dimension_numbers = #tpu.dot_dimension_numbers<[2], [0], [0, 1], [1], [0, 0, 0, 1, 1, 1], [], []>} : vector<16x16x4xf32>, vector<4x4xf32>, vector<16x16x4xf32> -> vector<16x16x4xf32>
    %95 = arith.addf %90, %94 : vector<16x16x4xf32>
    %c0_111 = arith.constant 0 : index
    %c2_112 = arith.constant 2 : index
    %c0_113 = arith.constant 0 : index
    %96 = vector.load %arg8[%c0_111, %c2_112, %c0_113] : memref<18x18x4xf32, #tpu.memory_space<vmem>>, vector<18x16x4xf32>
    %97 = vector.extract_strided_slice %96 {offsets = [0, 0, 0], sizes = [16, 16, 4], strides = [1, 1, 1]} : vector<18x16x4xf32> to vector<16x16x4xf32>
    %c0_114 = arith.constant 0 : index
    %c2_115 = arith.constant 2 : index
    %c0_116 = arith.constant 0 : index
    %c0_117 = arith.constant 0 : index
    %98 = vector.load %arg4[%c0_114, %c2_115, %c0_116, %c0_117] : memref<3x3x4x4xf32, #tpu.memory_space<vmem>>, vector<1x1x4x4xf32>
    %99 = vector.shape_cast %98 : vector<1x1x4x4xf32> to vector<4x4xf32>
    %cst_118 = arith.constant dense<0.000000e+00> : vector<16x16x4xf32>
    %100 = tpu.matmul %97, %99, %cst_118 {dimension_numbers = #tpu.dot_dimension_numbers<[2], [0], [0, 1], [1], [0, 0, 0, 1, 1, 1], [], []>} : vector<16x16x4xf32>, vector<4x4xf32>, vector<16x16x4xf32> -> vector<16x16x4xf32>
    %101 = arith.addf %95, %100 : vector<16x16x4xf32>
    %102 = vector.extract_strided_slice %96 {offsets = [1, 0, 0], sizes = [16, 16, 4], strides = [1, 1, 1]} : vector<18x16x4xf32> to vector<16x16x4xf32>
    %c1_119 = arith.constant 1 : index
    %c2_120 = arith.constant 2 : index
    %c0_121 = arith.constant 0 : index
    %c0_122 = arith.constant 0 : index
    %103 = vector.load %arg4[%c1_119, %c2_120, %c0_121, %c0_122] : memref<3x3x4x4xf32, #tpu.memory_space<vmem>>, vector<1x1x4x4xf32>
    %104 = vector.shape_cast %103 : vector<1x1x4x4xf32> to vector<4x4xf32>
    %cst_123 = arith.constant dense<0.000000e+00> : vector<16x16x4xf32>
    %105 = tpu.matmul %102, %104, %cst_123 {dimension_numbers = #tpu.dot_dimension_numbers<[2], [0], [0, 1], [1], [0, 0, 0, 1, 1, 1], [], []>} : vector<16x16x4xf32>, vector<4x4xf32>, vector<16x16x4xf32> -> vector<16x16x4xf32>
    %106 = arith.addf %101, %105 : vector<16x16x4xf32>
    %107 = vector.extract_strided_slice %96 {offsets = [2, 0, 0], sizes = [16, 16, 4], strides = [1, 1, 1]} : vector<18x16x4xf32> to vector<16x16x4xf32>
    %c2_124 = arith.constant 2 : index
    %c2_125 = arith.constant 2 : index
    %c0_126 = arith.constant 0 : index
    %c0_127 = arith.constant 0 : index
    %108 = vector.load %arg4[%c2_124, %c2_125, %c0_126, %c0_127] : memref<3x3x4x4xf32, #tpu.memory_space<vmem>>, vector<1x1x4x4xf32>
    %109 = vector.shape_cast %108 : vector<1x1x4x4xf32> to vector<4x4xf32>
    %cst_128 = arith.constant dense<0.000000e+00> : vector<16x16x4xf32>
    %110 = tpu.matmul %107, %109, %cst_128 {dimension_numbers = #tpu.dot_dimension_numbers<[2], [0], [0, 1], [1], [0, 0, 0, 1, 1, 1], [], []>} : vector<16x16x4xf32>, vector<4x4xf32>, vector<16x16x4xf32> -> vector<16x16x4xf32>
    %111 = arith.addf %106, %110 : vector<16x16x4xf32>
    %c0_129 = arith.constant 0 : index
    %c0_130 = arith.constant 0 : index
    %c0_131 = arith.constant 0 : index
    %c0_132 = arith.constant 0 : index
    %112 = vector.load %arg1[%c0_129, %c0_130, %c0_131, %c0_132] : memref<1x16x16x4xf32, #tpu.memory_space<vmem>>, vector<1x16x16x4xf32>
    %113 = vector.shape_cast %112 : vector<1x16x16x4xf32> to vector<16x16x4xf32>
    %114 = arith.addf %111, %113 : vector<16x16x4xf32>
    %cst_133 = arith.constant 0.000000e+00 : f32
    %115 = vector.broadcast %cst_133 : f32 to vector<16x16x4xf32>
    %116 = arith.maximumf %114, %115 : vector<16x16x4xf32>
    %117 = vector.shape_cast %116 : vector<16x16x4xf32> to vector<1x16x16x4xf32>
    %c0_134 = arith.constant 0 : index
    %c0_135 = arith.constant 0 : index
    %c0_136 = arith.constant 0 : index
    %c0_137 = arith.constant 0 : index
    %118 = vector.load %arg6[%c0_134, %c0_135, %c0_136, %c0_137] : memref<1x16x16x4xf32, #tpu.memory_space<vmem>>, vector<1x16x16x4xf32>
    tpu.vector_store %arg6[%c0_134, %c0_135, %c0_136, %c0_137], %117 {strides = array<i32>} : memref<1x16x16x4xf32, #tpu.memory_space<vmem>>, vector<1x16x16x4xf32>,
    return
  }
  func.func @transform_0(%arg0: i32) -> (i32, i32, i32, i32) {
    %c0_i32 = arith.constant 0 : i32
    %c0_i32_0 = arith.constant 0 : i32
    %c0_i32_1 = arith.constant 0 : i32
    %c0_i32_2 = arith.constant 0 : i32
    return %arg0, %c0_i32, %c0_i32_0, %c0_i32_1 : i32, i32, i32, i32
  }
  func.func @transform_1(%arg0: i32) -> (i32, i32, i32, i32) {
    %c0_i32 = arith.constant 0 : i32
    %c0_i32_0 = arith.constant 0 : i32
    %c0_i32_1 = arith.constant 0 : i32
    %c0_i32_2 = arith.constant 0 : i32
    %c0_i32_3 = arith.constant 0 : i32
    return %c0_i32, %c0_i32_0, %c0_i32_1, %c0_i32_2 : i32, i32, i32, i32
  }
  func.func @transform_2(%arg0: i32) -> (i32, i32, i32) {
    %c0_i32 = arith.constant 0 : i32
    %c0_i32_0 = arith.constant 0 : i32
    %c0_i32_1 = arith.constant 0 : i32
    %c0_i32_2 = arith.constant 0 : i32
    return %c0_i32, %c0_i32_0, %c0_i32_1 : i32, i32, i32
  }
  func.func @transform_3(%arg0: i32) -> (i32, i32, i32, i32) {
    %c0_i32 = arith.constant 0 : i32
    %c0_i32_0 = arith.constant 0 : i32
    %c0_i32_1 = arith.constant 0 : i32
    %c0_i32_2 = arith.constant 0 : i32
    %c0_i32_3 = arith.constant 0 : i32
    return %c0_i32, %c0_i32_0, %c0_i32_1, %c0_i32_2 : i32, i32, i32, i32
  }
  func.func @transform_4(%arg0: i32) -> (i32, i32, i32) {
    %c0_i32 = arith.constant 0 : i32
    %c0_i32_0 = arith.constant 0 : i32
    %c0_i32_1 = arith.constant 0 : i32
    %c0_i32_2 = arith.constant 0 : i32
    return %c0_i32, %c0_i32_0, %c0_i32_1 : i32, i32, i32
  }
  func.func @transform_5(%arg0: i32) -> (i32, i32, i32, i32) {
    %c0_i32 = arith.constant 0 : i32
    %c0_i32_0 = arith.constant 0 : i32
    %c0_i32_1 = arith.constant 0 : i32
    %c0_i32_2 = arith.constant 0 : i32
    return %arg0, %c0_i32, %c0_i32_0, %c0_i32_1 : i32, i32, i32, i32
  }
}

</mosaic_0001>

<bundles_post_ra>
// kernel: tpu_custom_call.1
= control target key start
LH: loop header
LB: loop body
LE: loop exit
PB: predicated region body
PF: predicated region fallthrough
CT: control target
= control target key end

     0   :  { %s8984_s18 = smov 0   ;;  %s11066_s0 = inlined_call_operand.vmem [shape: f32[2,16,16,4], index: 0, kind: input, shape index: {}]   ;;  %s11067_s1 = inlined_call_operand.vmem [shape: f32[3,3,4,4], index: 1, kind: input, shape index: {}]   ;;  %s11068_s2 = inlined_call_operand.vmem [shape: f32[1,1,4], index: 2, kind: input, shape index: {}]   ;;  %s11069_s3 = inlined_call_operand.vmem [shape: f32[3,3,4,4], index: 3, kind: input, shape index: {}]   ;;  %s11070_s4 = inlined_call_operand.vmem [shape: f32[1,1,4], index: 4, kind: input, shape index: {}]   ;;  %s11071_s5 = inlined_call_operand.vmem [shape: f32[2,16,16,4], index: 5, kind: output, shape index: {}]  }
   0x1 LB: > { %s6241_s19 = sadd.s32 4294967295, %s8951_s18   ;;  %p6245_p0 = scmp.ge.s32.totalorder %s8951_s18, 1  ;;  %s8951_s18 = sphi %s8984_s18, %s15_s18  }
   0x2   : > { %p187_p1 = scmp.lt.s32.totalorder %s8951_s18, 3 }
   0x4   : > { %p188_p2 = pnand %p6245_p0, %p187_p1 }
   0x5   : > { %v8995_v0 = vld [vmem:[%s11067_s1] sm:$0xf] (!%p188_p2)  ;;  %vm486_vm0 = vcmask (!%p188_p2), 1043456   ;;  %vm225_vm1 = vcmask (!%p188_p2), 31744   ;;  %p8999_p3 = scmp.lt.s32.totalorder (!%p188_p2), %s6241_s19, 1  ;;  %v8953_v1 = vmov (!%p188_p2), 0.0  }
   0x6   : > { %191 = sbr.rel (%p188_p2) target bundleno = 1591 (0x637), region = 40  ;;  %7460 = vmatprep.subr.msk.mxu0 (!%p188_p2), %vm486_vm0, %v8995_v0  ;;  %226 = vst.msk [vmem:[#allocation2] sm:$0xff] (!%p188_p2), %vm225_vm1, %v8953_v1  ;;  %227 = vst.msk [vmem:[#allocation2 + $0x8] sm:$0xff] (!%p188_p2), %vm225_vm1, %v8953_v1  ;;  %v9152_v2 = vld [vmem:[%s11067_s1 + $0xc] sm:$0xf] (!%p188_p2)  ;;  %vm228_vm2 = vcmask (!%p188_p2), 25600  }
   0x7   : > { %230 = vst.msk [vmem:[#allocation2 + $0x18] sm:$0xff] (!%p188_p2), %vm225_vm1, %v8953_v1  ;;  %231 = vst.msk [vmem:[#allocation2 + $0x20] sm:$0xff] (!%p188_p2), %vm225_vm1, %v8953_v1  ;;  %7461 = vmatpush3.msk.msra.mxu0 (!%p188_p2), %vm486_vm0, %v8995_v0  ;;  %v9256_v9 = vld [vmem:[%s11067_s1 + $0x18] sm:$0xf] (!%p188_p2) }
   0x8   : > { %233 = vst.msk [vmem:[#allocation2 + $0x30] sm:$0xff] (!%p188_p2), %vm225_vm1, %v8953_v1  ;;  %234 = vst.msk [vmem:[#allocation2 + $0x38] sm:$0xff] (!%p188_p2), %vm225_vm1, %v8953_v1  ;;  %7510 = vmatprep.subr.msk.mxu0 (!%p188_p2), %vm486_vm0, %v9152_v2 }
   0x9   : > { %236 = vst.msk [vmem:[#allocation2 + $0x48] sm:$0xff] (!%p188_p2), %vm225_vm1, %v8953_v1  ;;  %237 = vst.msk [vmem:[#allocation2 + $0x50] sm:$0xff] (!%p188_p2), %vm225_vm1, %v8953_v1 }
   0xa   : > { %239 = vst.msk [vmem:[#allocation2 + $0x60] sm:$0xff] (!%p188_p2), %vm225_vm1, %v8953_v1  ;;  %240 = vst.msk [vmem:[#allocation2 + $0x68] sm:$0xff] (!%p188_p2), %vm225_vm1, %v8953_v1 }
   0xb   : > { %242 = vst.msk [vmem:[#allocation2 + $0x78] sm:$0xff] (!%p188_p2), %vm225_vm1, %v8953_v1  ;;  %243 = vst.msk [vmem:[#allocation2 + $0x80] sm:$0xff] (!%p188_p2), %vm225_vm1, %v8953_v1 }
   0xc   : > { %245 = vst.msk [vmem:[#allocation2 + $0x90] sm:$0xff] (!%p188_p2), %vm225_vm1, %v8953_v1  ;;  %246 = vst.msk [vmem:[#allocation2 + $0x98] sm:$0xff] (!%p188_p2), %vm225_vm1, %v8953_v1 }
   0xd   : > { %248 = vst.msk [vmem:[#allocation2 + $0xa8] sm:$0xff] %vm225_vm1, %v8953_v1  ;;  %249 = vst.msk [vmem:[#allocation2 + $0xb0] sm:$0xff] %vm225_vm1, %v8953_v1  ;;  %s11074_s19 = smov (!%p8999_p3, %s6241_s19), 1  ;;  %v353_v10 = vld [vmem:[#allocation2] sm:$0xff]  ;;  %v354_v11 = vld [vmem:[#allocation2 + $0x8] sm:$0xff] }
   0xe   : > { %251 = vst.msk [vmem:[#allocation2 + $0xc0] sm:$0xff] %vm225_vm1, %v8953_v1  ;;  %252 = vst.msk [vmem:[#allocation2 + $0xc8] sm:$0xff] %vm225_vm1, %v8953_v1  ;;  %s6864_s25 = sshll.u32 %s11074_s19, 8  ;;  %7462 = vmatprep.mubr.msk.f32.mxu0 %vm225_vm1, %v353_v10  ;;  %v1283_v10 = vld [vmem:[#allocation2 + $0x1] sm:$0xff] }
   0xf   : > { %254 = vst.msk [vmem:[#allocation2 + $0xd8] sm:$0xff] %vm225_vm1, %v8953_v1  ;;  %255 = vst.msk [vmem:[#allocation2 + $0xe0] sm:$0xff] %vm225_vm1, %v8953_v1  ;;  %s9242_s28 = scalar_lea.vmem %s11066_s0, %s6864_s25  ;;  %7463 = vmatmul.mubr.msk.f32.vlgmr.msra.gmra.mrb[0].mxu0 %vm225_vm1, %v354_v11  ;;  %s10937_s23 = scalar_lea.vmem %s11071_s5, %s6864_s25 }
  0x10   : > { %257 = vst.msk [vmem:[#allocation2 + $0xf0] sm:$0xff] %vm225_vm1, %v8953_v1  ;;  %258 = vst.msk [vmem:[#allocation2 + $0xf8] sm:$0xff] %vm225_vm1, %v8953_v1  ;;  %v281_v3 = vld [vmem:[%s9242_s28] sm:$0xff]  ;;  %v282_v4 = vld [vmem:[%s9242_s28 + $0x8] sm:$0xff]  ;;  %7511 = vmatpush3.msk.msra.mxu0 %vm486_vm0, %v9152_v2 }
  0x11   : > { %260 = vst.msk [vmem:[#allocation2 + $0x108] sm:$0xff] %vm225_vm1, %v8953_v1  ;;  %261 = vst.msk [vmem:[#allocation2 + $0x110] sm:$0xff] %vm225_vm1, %v8953_v1  ;;  %v283_v5 = vld [vmem:[%s9242_s28 + $0x10] sm:$0xff]  ;;  %v284_v6 = vld [vmem:[%s9242_s28 + $0x18] sm:$0xff]  ;;  %7560 = vmatprep.subr.msk.mxu0 %vm486_vm0, %v9256_v9 }
  0x12   : > { %263 = vst.msk [vmem:[#allocation2 + $0x120] sm:$0xff] %vm225_vm1, %v8953_v1  ;;  %264 = vst.msk [vmem:[#allocation2 + $0x128] sm:$0xff] %vm225_vm1, %v8953_v1  ;;  %v285_v7 = vld [vmem:[%s9242_s28 + $0x20] sm:$0xff]  ;;  %v286_v8 = vld [vmem:[%s9242_s28 + $0x28] sm:$0xff] }
  0x13   : > { %266 = vst.msk [vmem:[#allocation2 + $0x138] sm:$0xff] %vm225_vm1, %v8953_v1  ;;  %267 = vst.msk [vmem:[#allocation2 + $0x140] sm:$0xff] %vm225_vm1, %v8953_v1  ;;  %v287_v12 = vld [vmem:[%s9242_s28 + $0x30] sm:$0xff]  ;;  %v288_v13 = vld [vmem:[%s9242_s28 + $0x38] sm:$0xff] }
  0x14   : > { %269 = vst.msk [vmem:[#allocation2 + $0x150] sm:$0xff] %vm225_vm1, %v8953_v1  ;;  %270 = vst.msk [vmem:[#allocation2 + $0x158] sm:$0xff] %vm225_vm1, %v8953_v1  ;;  %v289_v14 = vld [vmem:[%s9242_s28 + $0x40] sm:$0xff]  ;;  %v290_v15 = vld [vmem:[%s9242_s28 + $0x48] sm:$0xff] }
  0x15   : > { %272 = vst.msk [vmem:[#allocation2 + $0x168] sm:$0xff] %vm225_vm1, %v8953_v1  ;;  %273 = vst.msk [vmem:[#allocation2 + $0x170] sm:$0xff] %vm225_vm1, %v8953_v1  ;;  %v291_v16 = vld [vmem:[%s9242_s28 + $0x50] sm:$0xff]  ;;  %v292_v17 = vld [vmem:[%s9242_s28 + $0x58] sm:$0xff] }
  0x16   : > { %275 = vst.msk [vmem:[#allocation2 + $0x180] sm:$0xff] %vm225_vm1, %v8953_v1  ;;  %276 = vst.msk [vmem:[#allocation2 + $0x188] sm:$0xff] %vm225_vm1, %v8953_v1  ;;  %v293_v18 = vld [vmem:[%s9242_s28 + $0x60] sm:$0xff]  ;;  %v294_v19 = vld [vmem:[%s9242_s28 + $0x68] sm:$0xff] }
  0x17   : > { %278 = vst.msk [vmem:[#allocation2 + $0x198] sm:$0xff] %vm225_vm1, %v8953_v1  ;;  %279 = vst.msk [vmem:[#allocation2 + $0x1a0] sm:$0xff] %vm225_vm1, %v8953_v1  ;;  %v295_v20 = vld [vmem:[%s9242_s28 + $0x70] sm:$0xff]  ;;  %v296_v21 = vld [vmem:[%s9242_s28 + $0x78] sm:$0xff] }
  0x18   : > { %3175 = vst.msk [vmem:[#allocation3] sm:$0xff] %vm225_vm1, %v8953_v1  ;;  %3176 = vst.msk [vmem:[#allocation3 + $0x8] sm:$0xff] %vm225_vm1, %v8953_v1  ;;  %v297_v22 = vld [vmem:[%s9242_s28 + $0x80] sm:$0xff]  ;;  %v298_v23 = vld [vmem:[%s9242_s28 + $0x88] sm:$0xff] }
  0x19   : > { %3178 = vst.msk [vmem:[#allocation3 + $0x18] sm:$0xff] %vm225_vm1, %v8953_v1  ;;  %3179 = vst.msk [vmem:[#allocation3 + $0x20] sm:$0xff] %vm225_vm1, %v8953_v1  ;;  %v299_v24 = vld [vmem:[%s9242_s28 + $0x90] sm:$0xff]  ;;  %v300_v25 = vld [vmem:[%s9242_s28 + $0x98] sm:$0xff] }
  0x1a   : > { %3181 = vst.msk [vmem:[#allocation3 + $0x30] sm:$0xff] %vm225_vm1, %v8953_v1  ;;  %3182 = vst.msk [vmem:[#allocation3 + $0x38] sm:$0xff] %vm225_vm1, %v8953_v1  ;;  %v301_v26 = vld [vmem:[%s9242_s28 + $0xa0] sm:$0xff]  ;;  %v302_v27 = vld [vmem:[%s9242_s28 + $0xa8] sm:$0xff] }
  0x1b   : > { %3184 = vst.msk [vmem:[#allocation3 + $0x48] sm:$0xff] %vm225_vm1, %v8953_v1  ;;  %3185 = vst.msk [vmem:[#allocation3 + $0x50] sm:$0xff] %vm225_vm1, %v8953_v1  ;;  %v303_v31 = vld [vmem:[%s9242_s28 + $0xb0] sm:$0xff]  ;;  %v304_v32 = vld [vmem:[%s9242_s28 + $0xb8] sm:$0xff] }
  0x1c   : > { %3187 = vst.msk [vmem:[#allocation3 + $0x60] sm:$0xff] %vm225_vm1, %v8953_v1  ;;  %3188 = vst.msk [vmem:[#allocation3 + $0x68] sm:$0xff] %vm225_vm1, %v8953_v1  ;;  %v305_v37 = vld [vmem:[%s9242_s28 + $0xc0] sm:$0xff]  ;;  %v306_v38 = vld [vmem:[%s9242_s28 + $0xc8] sm:$0xff] }
  0x1d   : > { %3190 = vst.msk [vmem:[#allocation3 + $0x78] sm:$0xff] %vm225_vm1, %v8953_v1  ;;  %3191 = vst.msk [vmem:[#allocation3 + $0x80] sm:$0xff] %vm225_vm1, %v8953_v1  ;;  %v307_v39 = vld [vmem:[%s9242_s28 + $0xd0] sm:$0xff]  ;;  %v308_v40 = vld [vmem:[%s9242_s28 + $0xd8] sm:$0xff] }
  0x1e   : > { %3193 = vst.msk [vmem:[#allocation3 + $0x90] sm:$0xff] %vm225_vm1, %v8953_v1  ;;  %3194 = vst.msk [vmem:[#allocation3 + $0x98] sm:$0xff] %vm225_vm1, %v8953_v1  ;;  %v309_v41 = vld [vmem:[%s9242_s28 + $0xe0] sm:$0xff]  ;;  %v310_v42 = vld [vmem:[%s9242_s28 + $0xe8] sm:$0xff] }
  0x1f   : > { %3196 = vst.msk [vmem:[#allocation3 + $0xa8] sm:$0xff] %vm225_vm1, %v8953_v1  ;;  %3197 = vst.msk [vmem:[#allocation3 + $0xb0] sm:$0xff] %vm225_vm1, %v8953_v1  ;;  %v311_v43 = vld [vmem:[%s9242_s28 + $0xf0] sm:$0xff]  ;;  %v312_v45 = vld [vmem:[%s9242_s28 + $0xf8] sm:$0xff] }
  0x20   : > { %3199 = vst.msk [vmem:[#allocation3 + $0xc0] sm:$0xff] %vm225_vm1, %v8953_v1  ;;  %3200 = vst.msk [vmem:[#allocation3 + $0xc8] sm:$0xff] %vm225_vm1, %v8953_v1 }
  0x21   : > { %3202 = vst.msk [vmem:[#allocation3 + $0xd8] sm:$0xff] %vm225_vm1, %v8953_v1  ;;  %3203 = vst.msk [vmem:[#allocation3 + $0xe0] sm:$0xff] %vm225_vm1, %v8953_v1 }
  0x22   : > { %3205 = vst.msk [vmem:[#allocation3 + $0xf0] sm:$0xff] %vm225_vm1, %v8953_v1  ;;  %3206 = vst.msk [vmem:[#allocation3 + $0xf8] sm:$0xff] %vm225_vm1, %v8953_v1 }
  0x23   : > { %3208 = vst.msk [vmem:[#allocation3 + $0x108] sm:$0xff] %vm225_vm1, %v8953_v1  ;;  %3209 = vst.msk [vmem:[#allocation3 + $0x110] sm:$0xff] %vm225_vm1, %v8953_v1 }
  0x24   : > { %3211 = vst.msk [vmem:[#allocation3 + $0x120] sm:$0xff] %vm225_vm1, %v8953_v1  ;;  %3212 = vst.msk [vmem:[#allocation3 + $0x128] sm:$0xff] %vm225_vm1, %v8953_v1 }
  0x25   : > { %3214 = vst.msk [vmem:[#allocation3 + $0x138] sm:$0xff] %vm225_vm1, %v8953_v1  ;;  %3215 = vst.msk [vmem:[#allocation3 + $0x140] sm:$0xff] %vm225_vm1, %v8953_v1 }
  0x26   : > { %3217 = vst.msk [vmem:[#allocation3 + $0x150] sm:$0xff] %vm225_vm1, %v8953_v1  ;;  %3218 = vst.msk [vmem:[#allocation3 + $0x158] sm:$0xff] %vm225_vm1, %v8953_v1 }
  0x27   : > { %3220 = vst.msk [vmem:[#allocation3 + $0x168] sm:$0xff] %vm225_vm1, %v8953_v1  ;;  %3221 = vst.msk [vmem:[#allocation3 + $0x170] sm:$0xff] %vm225_vm1, %v8953_v1 }
  0x28   : > { %3223 = vst.msk [vmem:[#allocation3 + $0x180] sm:$0xff] %vm225_vm1, %v8953_v1  ;;  %3224 = vst.msk [vmem:[#allocation3 + $0x188] sm:$0xff] %vm225_vm1, %v8953_v1 }
  0x29   : > { %3226 = vst.msk [vmem:[#allocation3 + $0x198] sm:$0xff] %vm225_vm1, %v8953_v1  ;;  %3227 = vst.msk [vmem:[#allocation3 + $0x1a0] sm:$0xff] %vm225_vm1, %v8953_v1 }
  0x2a   : > { %232 = vst.msk [vmem:[#allocation2 + $0x28] sm:$0x3] %vm228_vm2, %v8953_v1  ;;  %229 = vst.msk [vmem:[#allocation2 + $0x10] sm:$0x3] %vm228_vm2, %v8953_v1 }
  0x2b   : > { %235 = vst.msk [vmem:[#allocation2 + $0x40] sm:$0x3] %vm228_vm2, %v8953_v1  ;;  %238 = vst.msk [vmem:[#allocation2 + $0x58] sm:$0x3] %vm228_vm2, %v8953_v1 }
  0x2c   : > { %241 = vst.msk [vmem:[#allocation2 + $0x70] sm:$0x3] %vm228_vm2, %v8953_v1  ;;  %244 = vst.msk [vmem:[#allocation2 + $0x88] sm:$0x3] %vm228_vm2, %v8953_v1 }
  0x2d   : > { %247 = vst.msk [vmem:[#allocation2 + $0xa0] sm:$0x3] %vm228_vm2, %v8953_v1  ;;  %250 = vst.msk [vmem:[#allocation2 + $0xb8] sm:$0x3] %vm228_vm2, %v8953_v1 }
  0x2e   : > { %253 = vst.msk [vmem:[#allocation2 + $0xd0] sm:$0x3] %vm228_vm2, %v8953_v1  ;;  %256 = vst.msk [vmem:[#allocation2 + $0xe8] sm:$0x3] %vm228_vm2, %v8953_v1 }
  0x2f   : > { %259 = vst.msk [vmem:[#allocation2 + $0x100] sm:$0x3] %vm228_vm2, %v8953_v1  ;;  %262 = vst.msk [vmem:[#allocation2 + $0x118] sm:$0x3] %vm228_vm2, %v8953_v1 }
  0x30   : > { %265 = vst.msk [vmem:[#allocation2 + $0x130] sm:$0x3] %vm228_vm2, %v8953_v1  ;;  %268 = vst.msk [vmem:[#allocation2 + $0x148] sm:$0x3] %vm228_vm2, %v8953_v1 }
  0x31   : > { %271 = vst.msk [vmem:[#allocation2 + $0x160] sm:$0x3] %vm228_vm2, %v8953_v1  ;;  %274 = vst.msk [vmem:[#allocation2 + $0x178] sm:$0x3] %vm228_vm2, %v8953_v1  ;;  %v1284_v11 = vld [vmem:[#allocation2 + $0x9] sm:$0xff] }
  0x32   : > { %277 = vst.msk [vmem:[#allocation2 + $0x190] sm:$0x3] %vm228_vm2, %v8953_v1  ;;  %280 = vst.msk [vmem:[#allocation2 + $0x1a8] sm:$0x3] %vm228_vm2, %v8953_v1 }
  0x33   : > { %3177 = vst.msk [vmem:[#allocation3 + $0x10] sm:$0x3] %vm228_vm2, %v8953_v1  ;;  %3180 = vst.msk [vmem:[#allocation3 + $0x28] sm:$0x3] %vm228_vm2, %v8953_v1 }
  0x34   : > { %3183 = vst.msk [vmem:[#allocation3 + $0x40] sm:$0x3] %vm228_vm2, %v8953_v1  ;;  %3186 = vst.msk [vmem:[#allocation3 + $0x58] sm:$0x3] %vm228_vm2, %v8953_v1 }
  0x35   : > { %3189 = vst.msk [vmem:[#allocation3 + $0x70] sm:$0x3] %vm228_vm2, %v8953_v1  ;;  %3192 = vst.msk [vmem:[#allocation3 + $0x88] sm:$0x3] %vm228_vm2, %v8953_v1 }
  0x36   : > { %3195 = vst.msk [vmem:[#allocation3 + $0xa0] sm:$0x3] %vm228_vm2, %v8953_v1  ;;  %3198 = vst.msk [vmem:[#allocation3 + $0xb8] sm:$0x3] %vm228_vm2, %v8953_v1 }
  0x37   : > { %3201 = vst.msk [vmem:[#allocation3 + $0xd0] sm:$0x3] %vm228_vm2, %v8953_v1  ;;  %3204 = vst.msk [vmem:[#allocation3 + $0xe8] sm:$0x3] %vm228_vm2, %v8953_v1 }
  0x38   : > { %3207 = vst.msk [vmem:[#allocation3 + $0x100] sm:$0x3] %vm228_vm2, %v8953_v1  ;;  %3210 = vst.msk [vmem:[#allocation3 + $0x118] sm:$0x3] %vm228_vm2, %v8953_v1 }
  0x39   : > { %3213 = vst.msk [vmem:[#allocation3 + $0x130] sm:$0x3] %vm228_vm2, %v8953_v1  ;;  %3216 = vst.msk [vmem:[#allocation3 + $0x148] sm:$0x3] %vm228_vm2, %v8953_v1 }
  0x3a   : > { %3219 = vst.msk [vmem:[#allocation3 + $0x160] sm:$0x3] %vm228_vm2, %v8953_v1  ;;  %3222 = vst.msk [vmem:[#allocation3 + $0x178] sm:$0x3] %vm228_vm2, %v8953_v1 }
  0x3b   : > { %3225 = vst.msk [vmem:[#allocation3 + $0x190] sm:$0x3] %vm228_vm2, %v8953_v1  ;;  %3228 = vst.msk [vmem:[#allocation3 + $0x1a8] sm:$0x3] %vm228_vm2, %v8953_v1 }
  0x3c   : > { %314 = vst.msk [vmem:[#allocation2 + $0x19] sm:$0xff] %vm225_vm1, %v281_v3  ;;  %315 = vst.msk [vmem:[#allocation2 + $0x21] sm:$0xff] %vm225_vm1, %v282_v4  ;;  %v6352_v4 = vld [vmem:[%s11067_s1 + $0x4] sm:$0xf] }
  0x3d   : > { %316 = vst.msk [vmem:[#allocation2 + $0x31] sm:$0xff] %vm225_vm1, %v283_v5  ;;  %317 = vst.msk [vmem:[#allocation2 + $0x39] sm:$0xff] %vm225_vm1, %v284_v6 }
  0x3e   : > { %318 = vst.msk [vmem:[#allocation2 + $0x49] sm:$0xff] %vm225_vm1, %v285_v7  ;;  %319 = vst.msk [vmem:[#allocation2 + $0x51] sm:$0xff] %vm225_vm1, %v286_v8  ;;  %v6386_v7 = vld [vmem:[%s11067_s1 + $0x10] sm:$0xf]  ;;  %v387_v8 = vld [vmem:[#allocation2 + $0x198] sm:$0xff] }
  0x3f   : > { %320 = vst.msk [vmem:[#allocation2 + $0x61] sm:$0xff] %vm225_vm1, %v287_v12  ;;  %321 = vst.msk [vmem:[#allocation2 + $0x69] sm:$0xff] %vm225_vm1, %v288_v13  ;;  %v9578_v13 = vld [vmem:[%s11067_s1 + $0x1c] sm:$0xf] }
  0x40   : > { %322 = vst.msk [vmem:[#allocation2 + $0x79] sm:$0xff] %vm225_vm1, %v289_v14  ;;  %323 = vst.msk [vmem:[#allocation2 + $0x81] sm:$0xff] %vm225_vm1, %v290_v15 }
  0x41   : > { %324 = vst.msk [vmem:[#allocation2 + $0x91] sm:$0xff] %vm225_vm1, %v291_v16  ;;  %325 = vst.msk [vmem:[#allocation2 + $0x99] sm:$0xff] %vm225_vm1, %v292_v17 }
  0x42   : > { %326 = vst.msk [vmem:[#allocation2 + $0xa9] sm:$0xff] %vm225_vm1, %v293_v18  ;;  %327 = vst.msk [vmem:[#allocation2 + $0xb1] sm:$0xff] %vm225_vm1, %v294_v19 }
  0x43   : > { %328 = vst.msk [vmem:[#allocation2 + $0xc1] sm:$0xff] %vm225_vm1, %v295_v20  ;;  %329 = vst.msk [vmem:[#allocation2 + $0xc9] sm:$0xff] %vm225_vm1, %v296_v21  ;;  %v9296_v28 = vld [vmem:[#allocation2 + $0x18] sm:$0xff]  ;;  %v9298_v29 = vld [vmem:[#allocation2 + $0x20] sm:$0xff] }
  0x44   : > { %330 = vst.msk [vmem:[#allocation2 + $0xd9] sm:$0xff] %vm225_vm1, %v297_v22  ;;  %331 = vst.msk [vmem:[#allocation2 + $0xe1] sm:$0xff] %vm225_vm1, %v298_v23  ;;  %v9300_v30 = vld [vmem:[#allocation2 + $0x30] sm:$0xff]  ;;  %7465 = vmatprep.mubr.msk.f32.mxu0 %vm225_vm1, %v9296_v28  ;;  %v9313_v33 = vld [vmem:[#allocation2 + $0x38] sm:$0xff] }
  0x45   : > { %332 = vst.msk [vmem:[#allocation2 + $0xf1] sm:$0xff] %vm225_vm1, %v299_v24  ;;  %333 = vst.msk [vmem:[#allocation2 + $0xf9] sm:$0xff] %vm225_vm1, %v300_v25  ;;  %7466 = vmatmul.mubr.msk.f32.gmra.mrb[2].mxu0 %vm225_vm1, %v9298_v29  ;;  %v9317_v34 = vld [vmem:[#allocation2 + $0x48] sm:$0xff]  ;;  %v9323_v35 = vld [vmem:[#allocation2 + $0x50] sm:$0xff] }
  0x46   : > { %334 = vst.msk [vmem:[#allocation2 + $0x109] sm:$0xff] %vm225_vm1, %v301_v26  ;;  %335 = vst.msk [vmem:[#allocation2 + $0x111] sm:$0xff] %vm225_vm1, %v302_v27  ;;  %7468 = vmatprep.mubr.msk.f32.mxu0 %vm225_vm1, %v9300_v30  ;;  %v9325_v36 = vld [vmem:[#allocation2 + $0x60] sm:$0xff]  ;;  %v9344_v44 = vld [vmem:[#allocation2 + $0x68] sm:$0xff] }
  0x47   : > { %336 = vst.msk [vmem:[#allocation2 + $0x121] sm:$0xff] %vm225_vm1, %v303_v31  ;;  %337 = vst.msk [vmem:[#allocation2 + $0x129] sm:$0xff] %vm225_vm1, %v304_v32  ;;  %v9348_v46 = vld [vmem:[#allocation2 + $0x78] sm:$0xff]  ;;  %v9355_v47 = vld [vmem:[#allocation2 + $0x80] sm:$0xff] }
  0x48   : > { %338 = vst.msk [vmem:[#allocation2 + $0x139] sm:$0xff] %vm225_vm1, %v305_v37  ;;  %339 = vst.msk [vmem:[#allocation2 + $0x141] sm:$0xff] %vm225_vm1, %v306_v38  ;;  %v9357_v48 = vld [vmem:[#allocation2 + $0x90] sm:$0xff]  ;;  %v9363_v49 = vld [vmem:[#allocation2 + $0x98] sm:$0xff] }
  0x49   : > { %7469 = vmatmul.mubr.msk.f32.gmra.mrb[4].mxu0 %vm225_vm1, %v9313_v33  ;;  %340 = vst.msk [vmem:[#allocation2 + $0x151] sm:$0xff] %vm225_vm1, %v307_v39  ;;  %341 = vst.msk [vmem:[#allocation2 + $0x159] sm:$0xff] %vm225_vm1, %v308_v40  ;;  %v9365_v50 = vld [vmem:[#allocation2 + $0xa8] sm:$0xff]  ;;  %v9371_v51 = vld [vmem:[#allocation2 + $0xb0] sm:$0xff] }
  0x4a   : > { %7471 = vmatprep.mubr.msk.f32.mxu0 %vm225_vm1, %v9317_v34  ;;  %342 = vst.msk [vmem:[#allocation2 + $0x169] sm:$0xff] %vm225_vm1, %v309_v41  ;;  %343 = vst.msk [vmem:[#allocation2 + $0x171] sm:$0xff] %vm225_vm1, %v310_v42  ;;  %v9373_v52 = vld [vmem:[#allocation2 + $0xc0] sm:$0xff]  ;;  %v9379_v53 = vld [vmem:[#allocation2 + $0xc8] sm:$0xff] }
  0x4b   : > { %344 = vst.msk [vmem:[#allocation2 + $0x181] sm:$0xff] %vm225_vm1, %v311_v43  ;;  %345 = vst.msk [vmem:[#allocation2 + $0x189] sm:$0xff] %vm225_vm1, %v312_v45  ;;  %v9381_v54 = vld [vmem:[#allocation2 + $0xd8] sm:$0xff]  ;;  %v9387_v55 = vld [vmem:[#allocation2 + $0xe0] sm:$0xff] }
  0x4c   : > { %v9389_v56 = vld [vmem:[#allocation2 + $0xf0] sm:$0xff]  ;;  %v9395_v57 = vld [vmem:[#allocation2 + $0xf8] sm:$0xff]  ;;  %v1286_v14 = vld [vmem:[#allocation2 + $0x21] sm:$0xff] }
  0x4d   : > { %7472 = vmatmul.mubr.msk.f32.gmra.mrb[6].mxu0 %vm225_vm1, %v9323_v35  ;;  %v9397_v58 = vld [vmem:[#allocation2 + $0x108] sm:$0xff]  ;;  %v9403_v59 = vld [vmem:[#allocation2 + $0x110] sm:$0xff]  ;;  %v9573_v12 = vld [vmem:[#allocation2 + $0x19] sm:$0xff] }
  0x4e   : > { %7474 = vmatprep.mubr.msk.f32.mxu0 %vm225_vm1, %v9325_v36  ;;  %v9405_v60 = vld [vmem:[#allocation2 + $0x120] sm:$0xff]  ;;  %v9411_v61 = vld [vmem:[#allocation2 + $0x128] sm:$0xff]  ;;  %v9584_v15 = vld [vmem:[#allocation2 + $0x31] sm:$0xff] }
  0x4f   : > { %v9413_v62 = vld [vmem:[#allocation2 + $0x138] sm:$0xff]  ;;  %v9419_v63 = vld [vmem:[#allocation2 + $0x140] sm:$0xff]  ;;  %v9593_v17 = vld [vmem:[#allocation2 + $0x49] sm:$0xff] }
  0x50   : > { %v9421_v0 = vld [vmem:[#allocation2 + $0x150] sm:$0xff]  ;;  %v9427_v1 = vld [vmem:[#allocation2 + $0x158] sm:$0xff]  ;;  %v9601_v19 = vld [vmem:[#allocation2 + $0x61] sm:$0xff] }
  0x51   : > { %7475 = vmatmul.mubr.msk.f32.gmra.mrb[8].mxu0 %vm225_vm1, %v9344_v44  ;;  %v9429_v2 = vld [vmem:[#allocation2 + $0x168] sm:$0xff]  ;;  %v9435_v3 = vld [vmem:[#allocation2 + $0x170] sm:$0xff]  ;;  %v9591_v16 = vld [vmem:[#allocation2 + $0x39] sm:$0xff] }
  0x52   : > { %7477 = vmatprep.mubr.msk.f32.mxu0 %vm225_vm1, %v9348_v46  ;;  %v385_v5 = vld [vmem:[#allocation2 + $0x180] sm:$0xff]  ;;  %v386_v6 = vld [vmem:[#allocation2 + $0x188] sm:$0xff]  ;;  %v9599_v18 = vld [vmem:[#allocation2 + $0x51] sm:$0xff] }
  0x53   : > { %v9607_v20 = vld [vmem:[#allocation2 + $0x69] sm:$0xff]  ;;  %v9609_v21 = vld [vmem:[#allocation2 + $0x79] sm:$0xff]  ;;  %v9615_v22 = vld [vmem:[#allocation2 + $0x81] sm:$0xff] }
  0x54   : > { %v9617_v23 = vld [vmem:[#allocation2 + $0x91] sm:$0xff]  ;;  %v9623_v24 = vld [vmem:[#allocation2 + $0x99] sm:$0xff]  ;;  %v9625_v25 = vld [vmem:[#allocation2 + $0xa9] sm:$0xff] }
  0x55   : > { %7478 = vmatmul.mubr.msk.f32.gmra.mrb[10].mxu0 %vm225_vm1, %v9355_v47  ;;  %v9631_v26 = vld [vmem:[#allocation2 + $0xb1] sm:$0xff]  ;;  %v9633_v27 = vld [vmem:[#allocation2 + $0xc1] sm:$0xff]  ;;  %v9655_v32 = vld [vmem:[#allocation2 + $0xf9] sm:$0xff] }
  0x56   : > { %7480 = vmatprep.mubr.msk.f32.mxu0 %vm225_vm1, %v9357_v48  ;;  %v9649_v31 = vld [vmem:[#allocation2 + $0xf1] sm:$0xff]  ;;  %v9673_v37 = vld [vmem:[#allocation2 + $0x139] sm:$0xff]  ;;  %v9679_v38 = vld [vmem:[#allocation2 + $0x141] sm:$0xff] }
  0x57   : > { %v9681_v39 = vld [vmem:[#allocation2 + $0x151] sm:$0xff]  ;;  %v9687_v40 = vld [vmem:[#allocation2 + $0x159] sm:$0xff]  ;;  %v9689_v41 = vld [vmem:[#allocation2 + $0x169] sm:$0xff] }
  0x58   : > { %v9695_v42 = vld [vmem:[#allocation2 + $0x171] sm:$0xff]  ;;  %v6454_v43 = vld [vmem:[%s11067_s1 + $0x8] sm:$0xf] }
  0x59   : > { %7481 = vmatmul.mubr.msk.f32.gmra.mrb[12].mxu0 %vm225_vm1, %v9363_v49  ;;  %v1316_v45 = vld [vmem:[#allocation2 + $0x189] sm:$0xff] }
  0x5a   : > { %7483 = vmatprep.mubr.msk.f32.mxu0 %vm225_vm1, %v9365_v50 }
  0x5d   : > { %7484 = vmatmul.mubr.msk.f32.gmra.mrb[14].mxu0 %vm225_vm1, %v9371_v51 }
  0x5e   : > { %7486 = vmatprep.mubr.msk.f32.mxu0 %vm225_vm1, %v9373_v52 }
  0x61   : > { %7487 = vmatmul.mubr.msk.f32.gmra.mrb[16].mxu0 %vm225_vm1, %v9379_v53 }
  0x62   : > { %7489 = vmatprep.mubr.msk.f32.mxu0 %vm225_vm1, %v9381_v54 }
  0x65   : > { %7490 = vmatmul.mubr.msk.f32.gmra.mrb[18].mxu0 %vm225_vm1, %v9387_v55 }
  0x66   : > { %7492 = vmatprep.mubr.msk.f32.mxu0 %vm225_vm1, %v9389_v56 }
  0x69   : > { %7493 = vmatmul.mubr.msk.f32.gmra.mrb[20].mxu0 %vm225_vm1, %v9395_v57 }
  0x6a   : > { %7495 = vmatprep.mubr.msk.f32.mxu0 %vm225_vm1, %v9397_v58 }
  0x6d   : > { %7496 = vmatmul.mubr.msk.f32.gmra.mrb[22].mxu0 %vm225_vm1, %v9403_v59 }
  0x6e   : > { %7498 = vmatprep.mubr.msk.f32.mxu0 %vm225_vm1, %v9405_v60 }
  0x71   : > { %7499 = vmatmul.mubr.msk.f32.gmra.mrb[24].mxu0 %vm225_vm1, %v9411_v61 }
  0x72   : > { %7501 = vmatprep.mubr.msk.f32.mxu0 %vm225_vm1, %v9413_v62 }
  0x75   : > { %7502 = vmatmul.mubr.msk.f32.gmra.mrb[26].mxu0 %vm225_vm1, %v9419_v63 }
  0x76   : > { %7504 = vmatprep.mubr.msk.f32.mxu0 %vm225_vm1, %v9421_v0 }
  0x79   : > { %7505 = vmatmul.mubr.msk.f32.gmra.mrb[28].mxu0 %vm225_vm1, %v9427_v1 }
  0x7a   : > { %7507 = vmatprep.mubr.msk.f32.mxu0 %vm225_vm1, %v9429_v2 }
  0x7d   : > { %7508 = vmatmul.mubr.msk.f32.gmra.mrb[30].mxu0 %vm225_vm1, %v9435_v3 }
  0x7e   : > { %7512 = vmatprep.mubr.msk.f32.mxu0 %vm225_vm1, %v9296_v28  ;;  %v9639_v28 = vld [vmem:[#allocation2 + $0xc9] sm:$0xff] }
  0x81   : > { %7513 = vmatmul.mubr.msk.f32.vlgmr.msra.gmra.mrb[0].mxu0 %vm225_vm1, %v9298_v29  ;;  %v9641_v29 = vld [vmem:[#allocation2 + $0xd9] sm:$0xff] }
  0x82   : > { %7561 = vmatpush3.msk.msra.mxu0 %vm486_vm0, %v9256_v9  ;;  %7515 = vmatprep.mubr.msk.f32.mxu0 %vm225_vm1, %v9300_v30  ;;  %v388_v9 = vld [vmem:[#allocation2 + $0x1a0] sm:$0xff] }
  0x83   : > { %7610 = vmatprep.subr.msk.mxu0 %vm486_vm0, %v6352_v4 }
  0x85   : > { %7516 = vmatmul.mubr.msk.f32.gmra.mrb[2].mxu0 %vm225_vm1, %v9313_v33 }
  0x86   : > { %7518 = vmatprep.mubr.msk.f32.mxu0 %vm225_vm1, %v9317_v34 }
  0x89   : > { %7519 = vmatmul.mubr.msk.f32.gmra.mrb[4].mxu0 %vm225_vm1, %v9323_v35 }
  0x8a   : > { %7521 = vmatprep.mubr.msk.f32.mxu0 %vm225_vm1, %v9325_v36 }
  0x8d   : > { %7522 = vmatmul.mubr.msk.f32.gmra.mrb[6].mxu0 %vm225_vm1, %v9344_v44 }
  0x8e   : > { %7524 = vmatprep.mubr.msk.f32.mxu0 %vm225_vm1, %v9348_v46 }
  0x91   : > { %7525 = vmatmul.mubr.msk.f32.gmra.mrb[8].mxu0 %vm225_vm1, %v9355_v47 }
  0x92   : > { %7527 = vmatprep.mubr.msk.f32.mxu0 %vm225_vm1, %v9357_v48 }
  0x95   : > { %7528 = vmatmul.mubr.msk.f32.gmra.mrb[10].mxu0 %vm225_vm1, %v9363_v49 }
  0x96   : > { %7530 = vmatprep.mubr.msk.f32.mxu0 %vm225_vm1, %v9365_v50 }
  0x99   : > { %7531 = vmatmul.mubr.msk.f32.gmra.mrb[12].mxu0 %vm225_vm1, %v9371_v51 }
  0x9a   : > { %7533 = vmatprep.mubr.msk.f32.mxu0 %vm225_vm1, %v9373_v52 }
  0x9d   : > { %7534 = vmatmul.mubr.msk.f32.gmra.mrb[14].mxu0 %vm225_vm1, %v9379_v53 }
  0x9e   : > { %7536 = vmatprep.mubr.msk.f32.mxu0 %vm225_vm1, %v9381_v54 }
  0xa1   : > { %7537 = vmatmul.mubr.msk.f32.gmra.mrb[16].mxu0 %vm225_vm1, %v9387_v55 }
  0xa2   : > { %7539 = vmatprep.mubr.msk.f32.mxu0 %vm225_vm1, %v9389_v56 }
  0xa5   : > { %7540 = vmatmul.mubr.msk.f32.gmra.mrb[18].mxu0 %vm225_vm1, %v9395_v57 }
  0xa6   : > { %7542 = vmatprep.mubr.msk.f32.mxu0 %vm225_vm1, %v9397_v58 }
  0xa9   : > { %7543 = vmatmul.mubr.msk.f32.gmra.mrb[20].mxu0 %vm225_vm1, %v9403_v59 }
  0xaa   : > { %7545 = vmatprep.mubr.msk.f32.mxu0 %vm225_vm1, %v9405_v60 }
  0xad   : > { %7546 = vmatmul.mubr.msk.f32.gmra.mrb[22].mxu0 %vm225_vm1, %v9411_v61 }
  0xae   : > { %7548 = vmatprep.mubr.msk.f32.mxu0 %vm225_vm1, %v9413_v62 }
  0xb1   : > { %7549 = vmatmul.mubr.msk.f32.gmra.mrb[24].mxu0 %vm225_vm1, %v9419_v63 }
  0xb2   : > { %7551 = vmatprep.mubr.msk.f32.mxu0 %vm225_vm1, %v9421_v0 }
  0xb5   : > { %7552 = vmatmul.mubr.msk.f32.gmra.mrb[26].mxu0 %vm225_vm1, %v9427_v1 }
  0xb6   : > { %7554 = vmatprep.mubr.msk.f32.mxu0 %vm225_vm1, %v9429_v2 }
  0xb9   : > { %7555 = vmatmul.mubr.msk.f32.gmra.mrb[28].mxu0 %vm225_vm1, %v9435_v3 }
  0xba   : > { %7557 = vmatprep.mubr.msk.f32.mxu0 %vm225_vm1, %v385_v5 }
  0xbd   : > { %7558 = vmatmul.mubr.msk.f32.gmra.mrb[30].mxu0 %vm225_vm1, %v386_v6 }
  0xbe   : > { %7562 = vmatprep.mubr.msk.f32.mxu0 %vm225_vm1, %v9300_v30  ;;  %v9647_v30 = vld [vmem:[#allocation2 + $0xe1] sm:$0xff] }
  0xc1   : > { %7563 = vmatmul.mubr.msk.f32.vlgmr.msra.gmra.mrb[0].mxu0 %vm225_vm1, %v9313_v33  ;;  %v9657_v33 = vld [vmem:[#allocation2 + $0x109] sm:$0xff] }
  0xc2   : > { %7611 = vmatpush3.msk.msra.mxu0 %vm486_vm0, %v6352_v4  ;;  %7565 = vmatprep.mubr.msk.f32.mxu0 %vm225_vm1, %v9317_v34  ;;  %v9663_v34 = vld [vmem:[#allocation2 + $0x111] sm:$0xff]  ;;  %v9900_v4 = vld [vmem:[#allocation2 + $0xda] sm:$0xff] }
  0xc3   : > { %7660 = vmatprep.subr.msk.mxu0 %vm486_vm0, %v6386_v7 }
  0xc5   : > { %7566 = vmatmul.mubr.msk.f32.gmra.mrb[2].mxu0 %vm225_vm1, %v9323_v35  ;;  %v9665_v35 = vld [vmem:[#allocation2 + $0x121] sm:$0xff] }
  0xc6   : > { %7568 = vmatprep.mubr.msk.f32.mxu0 %vm225_vm1, %v9325_v36  ;;  %v9671_v36 = vld [vmem:[#allocation2 + $0x129] sm:$0xff] }
  0xc9   : > { %7569 = vmatmul.mubr.msk.f32.gmra.mrb[4].mxu0 %vm225_vm1, %v9344_v44  ;;  %v1315_v44 = vld [vmem:[#allocation2 + $0x181] sm:$0xff] }
  0xca   : > { %7571 = vmatprep.mubr.msk.f32.mxu0 %vm225_vm1, %v9348_v46  ;;  %v6488_v46 = vld [vmem:[%s11067_s1 + $0x14] sm:$0xf] }
  0xcd   : > { %7572 = vmatmul.mubr.msk.f32.gmra.mrb[6].mxu0 %vm225_vm1, %v9355_v47  ;;  %v1317_v47 = vld [vmem:[#allocation2 + $0x199] sm:$0xff] }
  0xce   : > { %7574 = vmatprep.mubr.msk.f32.mxu0 %vm225_vm1, %v9357_v48  ;;  %v1318_v48 = vld [vmem:[#allocation2 + $0x1a1] sm:$0xff] }
  0xd1   : > { %7575 = vmatmul.mubr.msk.f32.gmra.mrb[8].mxu0 %vm225_vm1, %v9363_v49  ;;  %v2213_v49 = vld [vmem:[#allocation2 + $0x2] sm:$0xff] }
  0xd2   : > { %7577 = vmatprep.mubr.msk.f32.mxu0 %vm225_vm1, %v9365_v50  ;;  %v2214_v50 = vld [vmem:[#allocation2 + $0xa] sm:$0xff] }
  0xd5   : > { %7578 = vmatmul.mubr.msk.f32.gmra.mrb[10].mxu0 %vm225_vm1, %v9371_v51  ;;  %v9832_v51 = vld [vmem:[#allocation2 + $0x1a] sm:$0xff] }
  0xd6   : > { %7580 = vmatprep.mubr.msk.f32.mxu0 %vm225_vm1, %v9373_v52  ;;  %v9837_v52 = vld [vmem:[%s11067_s1 + $0x20] sm:$0xf] }
  0xd9   : > { %7581 = vmatmul.mubr.msk.f32.gmra.mrb[12].mxu0 %vm225_vm1, %v9379_v53  ;;  %v2216_v53 = vld [vmem:[#allocation2 + $0x22] sm:$0xff] }
  0xda   : > { %7583 = vmatprep.mubr.msk.f32.mxu0 %vm225_vm1, %v9381_v54  ;;  %v9843_v54 = vld [vmem:[#allocation2 + $0x32] sm:$0xff] }
  0xdd   : > { %7584 = vmatmul.mubr.msk.f32.gmra.mrb[14].mxu0 %vm225_vm1, %v9387_v55  ;;  %v9850_v55 = vld [vmem:[#allocation2 + $0x3a] sm:$0xff] }
  0xde   : > { %7586 = vmatprep.mubr.msk.f32.mxu0 %vm225_vm1, %v9389_v56  ;;  %v9852_v56 = vld [vmem:[#allocation2 + $0x4a] sm:$0xff] }
  0xe1   : > { %7587 = vmatmul.mubr.msk.f32.gmra.mrb[16].mxu0 %vm225_vm1, %v9395_v57  ;;  %v9858_v57 = vld [vmem:[#allocation2 + $0x52] sm:$0xff] }
  0xe2   : > { %7589 = vmatprep.mubr.msk.f32.mxu0 %vm225_vm1, %v9397_v58  ;;  %v9860_v58 = vld [vmem:[#allocation2 + $0x62] sm:$0xff] }
  0xe5   : > { %7590 = vmatmul.mubr.msk.f32.gmra.mrb[18].mxu0 %vm225_vm1, %v9403_v59  ;;  %v9866_v59 = vld [vmem:[#allocation2 + $0x6a] sm:$0xff] }
  0xe6   : > { %7592 = vmatprep.mubr.msk.f32.mxu0 %vm225_vm1, %v9405_v60  ;;  %v9868_v60 = vld [vmem:[#allocation2 + $0x7a] sm:$0xff] }
  0xe9   : > { %7593 = vmatmul.mubr.msk.f32.gmra.mrb[20].mxu0 %vm225_vm1, %v9411_v61  ;;  %v9874_v61 = vld [vmem:[#allocation2 + $0x82] sm:$0xff] }
  0xea   : > { %7595 = vmatprep.mubr.msk.f32.mxu0 %vm225_vm1, %v9413_v62  ;;  %v9876_v62 = vld [vmem:[#allocation2 + $0x92] sm:$0xff] }
  0xed   : > { %7596 = vmatmul.mubr.msk.f32.gmra.mrb[22].mxu0 %vm225_vm1, %v9419_v63  ;;  %v9882_v63 = vld [vmem:[#allocation2 + $0x9a] sm:$0xff] }
  0xee   : > { %7598 = vmatprep.mubr.msk.f32.mxu0 %vm225_vm1, %v9421_v0  ;;  %v9884_v0 = vld [vmem:[#allocation2 + $0xaa] sm:$0xff] }
  0xf1   : > { %7599 = vmatmul.mubr.msk.f32.gmra.mrb[24].mxu0 %vm225_vm1, %v9427_v1  ;;  %v9890_v1 = vld [vmem:[#allocation2 + $0xb2] sm:$0xff] }
  0xf2   : > { %7601 = vmatprep.mubr.msk.f32.mxu0 %vm225_vm1, %v9429_v2  ;;  %v9892_v2 = vld [vmem:[#allocation2 + $0xc2] sm:$0xff] }
  0xf5   : > { %7602 = vmatmul.mubr.msk.f32.gmra.mrb[26].mxu0 %vm225_vm1, %v9435_v3  ;;  %v9898_v3 = vld [vmem:[#allocation2 + $0xca] sm:$0xff] }
  0xf6   : > { %7604 = vmatprep.mubr.msk.f32.mxu0 %vm225_vm1, %v385_v5  ;;  %v9906_v5 = vld [vmem:[#allocation2 + $0xe2] sm:$0xff] }
  0xf9   : > { %7605 = vmatmul.mubr.msk.f32.gmra.mrb[28].mxu0 %vm225_vm1, %v386_v6  ;;  %v9908_v6 = vld [vmem:[#allocation2 + $0xf2] sm:$0xff] }
  0xfa   : > { %7607 = vmatprep.mubr.msk.f32.mxu0 %vm225_vm1, %v387_v8  ;;  %v9916_v8 = vld [vmem:[#allocation2 + $0x10a] sm:$0xff] }
  0xfd   : > { %7608 = vmatmul.mubr.msk.f32.gmra.mrb[30].mxu0 %vm225_vm1, %v388_v9  ;;  %v9922_v9 = vld [vmem:[#allocation2 + $0x112] sm:$0xff] }
  0xfe   : > { %7612 = vmatprep.mubr.msk.f32.mxu0 %vm225_vm1, %v1283_v10  ;;  %v9924_v10 = vld [vmem:[#allocation2 + $0x122] sm:$0xff] }
 0x101   : > { %7613 = vmatmul.mubr.msk.f32.vlgmr.msra.gmra.mrb[0].mxu0 %vm225_vm1, %v1284_v11  ;;  %v9930_v11 = vld [vmem:[#allocation2 + $0x12a] sm:$0xff] }
 0x102   : > { %7661 = vmatpush3.msk.msra.mxu0 %vm486_vm0, %v6386_v7  ;;  %7615 = vmatprep.mubr.msk.f32.mxu0 %vm225_vm1, %v9573_v12  ;;  %v9914_v7 = vld [vmem:[#allocation2 + $0xfa] sm:$0xff] }
 0x103   : > { %7710 = vmatprep.subr.msk.mxu0 %vm486_vm0, %v9578_v13 }
 0x105   : > { %7616 = vmatmul.mubr.msk.f32.gmra.mrb[2].mxu0 %vm225_vm1, %v1286_v14 }
 0x106   : > { %7618 = vmatprep.mubr.msk.f32.mxu0 %vm225_vm1, %v9584_v15 }
 0x109   : > { %7619 = vmatmul.mubr.msk.f32.gmra.mrb[4].mxu0 %vm225_vm1, %v9591_v16 }
 0x10a   : > { %7621 = vmatprep.mubr.msk.f32.mxu0 %vm225_vm1, %v9593_v17 }
 0x10d   : > { %7622 = vmatmul.mubr.msk.f32.gmra.mrb[6].mxu0 %vm225_vm1, %v9599_v18 }
 0x10e   : > { %7624 = vmatprep.mubr.msk.f32.mxu0 %vm225_vm1, %v9601_v19 }
 0x111   : > { %7625 = vmatmul.mubr.msk.f32.gmra.mrb[8].mxu0 %vm225_vm1, %v9607_v20 }
 0x112   : > { %7627 = vmatprep.mubr.msk.f32.mxu0 %vm225_vm1, %v9609_v21 }
 0x115   : > { %7628 = vmatmul.mubr.msk.f32.gmra.mrb[10].mxu0 %vm225_vm1, %v9615_v22 }
 0x116   : > { %7630 = vmatprep.mubr.msk.f32.mxu0 %vm225_vm1, %v9617_v23 }
 0x119   : > { %7631 = vmatmul.mubr.msk.f32.gmra.mrb[12].mxu0 %vm225_vm1, %v9623_v24 }
 0x11a   : > { %7633 = vmatprep.mubr.msk.f32.mxu0 %vm225_vm1, %v9625_v25 }
 0x11d   : > { %7634 = vmatmul.mubr.msk.f32.gmra.mrb[14].mxu0 %vm225_vm1, %v9631_v26 }
 0x11e   : > { %7636 = vmatprep.mubr.msk.f32.mxu0 %vm225_vm1, %v9633_v27 }
 0x121   : > { %7637 = vmatmul.mubr.msk.f32.gmra.mrb[16].mxu0 %vm225_vm1, %v9639_v28 }
 0x122   : > { %7639 = vmatprep.mubr.msk.f32.mxu0 %vm225_vm1, %v9641_v29 }
 0x125   : > { %7640 = vmatmul.mubr.msk.f32.gmra.mrb[18].mxu0 %vm225_vm1, %v9647_v30 }
 0x126   : > { %7642 = vmatprep.mubr.msk.f32.mxu0 %vm225_vm1, %v9649_v31 }
 0x129   : > { %7643 = vmatmul.mubr.msk.f32.gmra.mrb[20].mxu0 %vm225_vm1, %v9655_v32 }
 0x12a   : > { %7645 = vmatprep.mubr.msk.f32.mxu0 %vm225_vm1, %v9657_v33 }
 0x12d   : > { %7646 = vmatmul.mubr.msk.f32.gmra.mrb[22].mxu0 %vm225_vm1, %v9663_v34 }
 0x12e   : > { %7648 = vmatprep.mubr.msk.f32.mxu0 %vm225_vm1, %v9665_v35 }
 0x131   : > { %7649 = vmatmul.mubr.msk.f32.gmra.mrb[24].mxu0 %vm225_vm1, %v9671_v36 }
 0x132   : > { %7651 = vmatprep.mubr.msk.f32.mxu0 %vm225_vm1, %v9673_v37 }
 0x135   : > { %7652 = vmatmul.mubr.msk.f32.gmra.mrb[26].mxu0 %vm225_vm1, %v9679_v38 }
 0x136   : > { %7654 = vmatprep.mubr.msk.f32.mxu0 %vm225_vm1, %v9681_v39 }
 0x139   : > { %7655 = vmatmul.mubr.msk.f32.gmra.mrb[28].mxu0 %vm225_vm1, %v9687_v40 }
 0x13a   : > { %7657 = vmatprep.mubr.msk.f32.mxu0 %vm225_vm1, %v9689_v41 }
 0x13d   : > { %7658 = vmatmul.mubr.msk.f32.gmra.mrb[30].mxu0 %vm225_vm1, %v9695_v42 }
 0x13e   : > { %7662 = vmatprep.mubr.msk.f32.mxu0 %vm225_vm1, %v9573_v12  ;;  %v9932_v12 = vld [vmem:[#allocation2 + $0x13a] sm:$0xff] }
 0x141   : > { %7663 = vmatmul.mubr.msk.f32.vlgmr.msra.gmra.mrb[0].mxu0 %vm225_vm1, %v1286_v14  ;;  %v9940_v14 = vld [vmem:[#allocation2 + $0x152] sm:$0xff] }
 0x142   : > { %7711 = vmatpush3.msk.msra.mxu0 %vm486_vm0, %v9578_v13  ;;  %7665 = vmatprep.mubr.msk.f32.mxu0 %vm225_vm1, %v9584_v15  ;;  %v9938_v13 = vld [vmem:[#allocation2 + $0x142] sm:$0xff] }
 0x143   : > { %7760 = vmatprep.subr.msk.mxu0 %vm486_vm0, %v6454_v43 }
 0x145   : > { %7666 = vmatmul.mubr.msk.f32.gmra.mrb[2].mxu0 %vm225_vm1, %v9591_v16 }
 0x146   : > { %7668 = vmatprep.mubr.msk.f32.mxu0 %vm225_vm1, %v9593_v17 }
 0x149   : > { %7669 = vmatmul.mubr.msk.f32.gmra.mrb[4].mxu0 %vm225_vm1, %v9599_v18 }
 0x14a   : > { %7671 = vmatprep.mubr.msk.f32.mxu0 %vm225_vm1, %v9601_v19 }
 0x14d   : > { %7672 = vmatmul.mubr.msk.f32.gmra.mrb[6].mxu0 %vm225_vm1, %v9607_v20 }
 0x14e   : > { %7674 = vmatprep.mubr.msk.f32.mxu0 %vm225_vm1, %v9609_v21 }
 0x151   : > { %7675 = vmatmul.mubr.msk.f32.gmra.mrb[8].mxu0 %vm225_vm1, %v9615_v22 }
 0x152   : > { %7677 = vmatprep.mubr.msk.f32.mxu0 %vm225_vm1, %v9617_v23 }
 0x155   : > { %7678 = vmatmul.mubr.msk.f32.gmra.mrb[10].mxu0 %vm225_vm1, %v9623_v24 }
 0x156   : > { %7680 = vmatprep.mubr.msk.f32.mxu0 %vm225_vm1, %v9625_v25 }
 0x159   : > { %7681 = vmatmul.mubr.msk.f32.gmra.mrb[12].mxu0 %vm225_vm1, %v9631_v26 }
 0x15a   : > { %7683 = vmatprep.mubr.msk.f32.mxu0 %vm225_vm1, %v9633_v27 }
 0x15d   : > { %7684 = vmatmul.mubr.msk.f32.gmra.mrb[14].mxu0 %vm225_vm1, %v9639_v28 }
 0x15e   : > { %7686 = vmatprep.mubr.msk.f32.mxu0 %vm225_vm1, %v9641_v29 }
 0x161   : > { %7687 = vmatmul.mubr.msk.f32.gmra.mrb[16].mxu0 %vm225_vm1, %v9647_v30 }
 0x162   : > { %7689 = vmatprep.mubr.msk.f32.mxu0 %vm225_vm1, %v9649_v31 }
 0x165   : > { %7690 = vmatmul.mubr.msk.f32.gmra.mrb[18].mxu0 %vm225_vm1, %v9655_v32 }
 0x166   : > { %7692 = vmatprep.mubr.msk.f32.mxu0 %vm225_vm1, %v9657_v33 }
 0x169   : > { %7693 = vmatmul.mubr.msk.f32.gmra.mrb[20].mxu0 %vm225_vm1, %v9663_v34 }
 0x16a   : > { %7695 = vmatprep.mubr.msk.f32.mxu0 %vm225_vm1, %v9665_v35 }
 0x16d   : > { %7696 = vmatmul.mubr.msk.f32.gmra.mrb[22].mxu0 %vm225_vm1, %v9671_v36 }
 0x16e   : > { %7698 = vmatprep.mubr.msk.f32.mxu0 %vm225_vm1, %v9673_v37 }
 0x171   : > { %7699 = vmatmul.mubr.msk.f32.gmra.mrb[24].mxu0 %vm225_vm1, %v9679_v38 }
 0x172   : > { %7701 = vmatprep.mubr.msk.f32.mxu0 %vm225_vm1, %v9681_v39 }
 0x175   : > { %7702 = vmatmul.mubr.msk.f32.gmra.mrb[26].mxu0 %vm225_vm1, %v9687_v40 }
 0x176   : > { %7704 = vmatprep.mubr.msk.f32.mxu0 %vm225_vm1, %v9689_v41 }
 0x179   : > { %7705 = vmatmul.mubr.msk.f32.gmra.mrb[28].mxu0 %vm225_vm1, %v9695_v42 }
 0x17a   : > { %7707 = vmatprep.mubr.msk.f32.mxu0 %vm225_vm1, %v1315_v44 }
 0x17d   : > { %7708 = vmatmul.mubr.msk.f32.gmra.mrb[30].mxu0 %vm225_vm1, %v1316_v45 }
 0x17e   : > { %7712 = vmatprep.mubr.msk.f32.mxu0 %vm225_vm1, %v9584_v15  ;;  %v9946_v15 = vld [vmem:[#allocation2 + $0x15a] sm:$0xff] }
 0x181   : > { %7713 = vmatmul.mubr.msk.f32.vlgmr.msra.gmra.mrb[0].mxu0 %vm225_vm1, %v9591_v16  ;;  %v9948_v16 = vld [vmem:[#allocation2 + $0x16a] sm:$0xff] }
 0x182   : > { %7761 = vmatpush3.msk.msra.mxu0 %vm486_vm0, %v6454_v43  ;;  %7715 = vmatprep.mubr.msk.f32.mxu0 %vm225_vm1, %v9593_v17  ;;  %v9954_v17 = vld [vmem:[#allocation2 + $0x172] sm:$0xff] }
 0x183   : > { %7810 = vmatprep.subr.msk.mxu0 %vm486_vm0, %v6488_v46 }
 0x185   : > { %7716 = vmatmul.mubr.msk.f32.gmra.mrb[2].mxu0 %vm225_vm1, %v9599_v18  ;;  %v2245_v18 = vld [vmem:[#allocation2 + $0x182] sm:$0xff] }
 0x186   : > { %7718 = vmatprep.mubr.msk.f32.mxu0 %vm225_vm1, %v9601_v19  ;;  %v2246_v19 = vld [vmem:[#allocation2 + $0x18a] sm:$0xff] }
 0x189   : > { %7719 = vmatmul.mubr.msk.f32.gmra.mrb[4].mxu0 %vm225_vm1, %v9607_v20  ;;  %v2247_v20 = vld [vmem:[#allocation2 + $0x19a] sm:$0xff] }
 0x18a   : > { %7721 = vmatprep.mubr.msk.f32.mxu0 %vm225_vm1, %v9609_v21  ;;  %v2248_v21 = vld [vmem:[#allocation2 + $0x1a2] sm:$0xff] }
 0x18d   : > { %7722 = vmatmul.mubr.msk.f32.gmra.mrb[6].mxu0 %vm225_vm1, %v9615_v22  ;;  %v3305_v22 = vld [vmem:[%s11069_s3] sm:$0xf] }
 0x18e   : > { %7724 = vmatprep.mubr.msk.f32.mxu0 %vm225_vm1, %v9617_v23  ;;  %7910 = vmatprep.subr.msk.mxu1 %vm486_vm0, %v3305_v22  ;;  %v3269_v23 = vld [vmem:[#allocation3] sm:$0xff] }
 0x18f   : > { %7911 = vmatpush3.msk.msra.mxu1 %vm486_vm0, %v3305_v22  ;;  %7912 = vmatprep.mubr.msk.f32.mxu1 %vm225_vm1, %v3269_v23 }
 0x191   : > { %7725 = vmatmul.mubr.msk.f32.gmra.mrb[8].mxu0 %vm225_vm1, %v9623_v24  ;;  %v3270_v24 = vld [vmem:[#allocation3 + $0x8] sm:$0xff] }
 0x192   : > { %7727 = vmatprep.mubr.msk.f32.mxu0 %vm225_vm1, %v9625_v25  ;;  %7913 = vmatmul.mubr.msk.f32.vlgmr.msra.gmra.mrb[0].mxu1 %vm225_vm1, %v3270_v24  ;;  %v6590_v25 = vld [vmem:[%s11069_s3 + $0xc] sm:$0xf] }
 0x193   : > { %7960 = vmatprep.subr.msk.mxu1 %vm486_vm0, %v6590_v25 }
 0x194   : > { %7961 = vmatpush3.msk.msra.mxu1 %vm486_vm0, %v6590_v25 }
 0x195   : > { %7728 = vmatmul.mubr.msk.f32.gmra.mrb[10].mxu0 %vm225_vm1, %v9631_v26  ;;  %v10096_v26 = vld [vmem:[%s11069_s3 + $0x18] sm:$0xf] }
 0x196   : > { %7730 = vmatprep.mubr.msk.f32.mxu0 %vm225_vm1, %v9633_v27  ;;  %8010 = vmatprep.subr.msk.mxu1 %vm486_vm0, %v10096_v26  ;;  %v10103_v27 = vld [vmem:[%s11068_s2] ss:$0 sm:$0xff] }
 0x199   : > { %7731 = vmatmul.mubr.msk.f32.gmra.mrb[12].mxu0 %vm225_vm1, %v9639_v28 }
 0x19a   : > { %7733 = vmatprep.mubr.msk.f32.mxu0 %vm225_vm1, %v9641_v29 }
 0x19d   : > { %7734 = vmatmul.mubr.msk.f32.gmra.mrb[14].mxu0 %vm225_vm1, %v9647_v30 }
 0x19e   : > { %7736 = vmatprep.mubr.msk.f32.mxu0 %vm225_vm1, %v9649_v31 }
 0x1a1   : > { %7737 = vmatmul.mubr.msk.f32.gmra.mrb[16].mxu0 %vm225_vm1, %v9655_v32 }
 0x1a2   : > { %7739 = vmatprep.mubr.msk.f32.mxu0 %vm225_vm1, %v9657_v33 }
 0x1a5   : > { %7740 = vmatmul.mubr.msk.f32.gmra.mrb[18].mxu0 %vm225_vm1, %v9663_v34 }
 0x1a6   : > { %7742 = vmatprep.mubr.msk.f32.mxu0 %vm225_vm1, %v9665_v35 }
 0x1a9   : > { %7743 = vmatmul.mubr.msk.f32.gmra.mrb[20].mxu0 %vm225_vm1, %v9671_v36 }
 0x1aa   : > { %7745 = vmatprep.mubr.msk.f32.mxu0 %vm225_vm1, %v9673_v37 }
 0x1ad   : > { %7746 = vmatmul.mubr.msk.f32.gmra.mrb[22].mxu0 %vm225_vm1, %v9679_v38 }
 0x1ae   : > { %7748 = vmatprep.mubr.msk.f32.mxu0 %vm225_vm1, %v9681_v39 }
 0x1b1   : > { %7749 = vmatmul.mubr.msk.f32.gmra.mrb[24].mxu0 %vm225_vm1, %v9687_v40 }
 0x1b2   : > { %7751 = vmatprep.mubr.msk.f32.mxu0 %vm225_vm1, %v9689_v41 }
 0x1b5   : > { %7752 = vmatmul.mubr.msk.f32.gmra.mrb[26].mxu0 %vm225_vm1, %v9695_v42 }
 0x1b6   : > { %7754 = vmatprep.mubr.msk.f32.mxu0 %vm225_vm1, %v1315_v44 }
 0x1b9   : > { %7755 = vmatmul.mubr.msk.f32.gmra.mrb[28].mxu0 %vm225_vm1, %v1316_v45 }
 0x1ba   : > { %7757 = vmatprep.mubr.msk.f32.mxu0 %vm225_vm1, %v1317_v47 }
 0x1bd   : > { %7758 = vmatmul.mubr.msk.f32.gmra.mrb[30].mxu0 %vm225_vm1, %v1318_v48 }
 0x1be   : > { %7762 = vmatprep.mubr.msk.f32.mxu0 %vm225_vm1, %v2213_v49 }
 0x1c1   : > { %7763 = vmatmul.mubr.msk.f32.vlgmr.msra.gmra.mrb[0].mxu0 %vm225_vm1, %v2214_v50 }
 0x1c2   : > { %7811 = vmatpush3.msk.msra.mxu0 %vm486_vm0, %v6488_v46  ;;  %7765 = vmatprep.mubr.msk.f32.mxu0 %vm225_vm1, %v9832_v51 }
 0x1c3   : > { %7860 = vmatprep.subr.msk.mxu0 %vm486_vm0, %v9837_v52 }
 0x1c5   : > { %7766 = vmatmul.mubr.msk.f32.gmra.mrb[2].mxu0 %vm225_vm1, %v2216_v53 }
 0x1c6   : > { %7768 = vmatprep.mubr.msk.f32.mxu0 %vm225_vm1, %v9843_v54 }
 0x1c9   : > { %7769 = vmatmul.mubr.msk.f32.gmra.mrb[4].mxu0 %vm225_vm1, %v9850_v55 }
 0x1ca   : > { %7771 = vmatprep.mubr.msk.f32.mxu0 %vm225_vm1, %v9852_v56 }
 0x1cd   : > { %7772 = vmatmul.mubr.msk.f32.gmra.mrb[6].mxu0 %vm225_vm1, %v9858_v57 }
 0x1ce   : > { %7774 = vmatprep.mubr.msk.f32.mxu0 %vm225_vm1, %v9860_v58 }
 0x1d1   : > { %7775 = vmatmul.mubr.msk.f32.gmra.mrb[8].mxu0 %vm225_vm1, %v9866_v59 }
 0x1d2   : > { %7777 = vmatprep.mubr.msk.f32.mxu0 %vm225_vm1, %v9868_v60 }
 0x1d5   : > { %7778 = vmatmul.mubr.msk.f32.gmra.mrb[10].mxu0 %vm225_vm1, %v9874_v61 }
 0x1d6   : > { %7780 = vmatprep.mubr.msk.f32.mxu0 %vm225_vm1, %v9876_v62 }
 0x1d9   : > { %7781 = vmatmul.mubr.msk.f32.gmra.mrb[12].mxu0 %vm225_vm1, %v9882_v63 }
 0x1da   : > { %7783 = vmatprep.mubr.msk.f32.mxu0 %vm225_vm1, %v9884_v0 }
 0x1dd   : > { %7784 = vmatmul.mubr.msk.f32.gmra.mrb[14].mxu0 %vm225_vm1, %v9890_v1 }
 0x1de   : > { %7786 = vmatprep.mubr.msk.f32.mxu0 %vm225_vm1, %v9892_v2 }
 0x1e1   : > { %7787 = vmatmul.mubr.msk.f32.gmra.mrb[16].mxu0 %vm225_vm1, %v9898_v3 }
 0x1e2   : > { %7789 = vmatprep.mubr.msk.f32.mxu0 %vm225_vm1, %v9900_v4 }
 0x1e5   : > { %7790 = vmatmul.mubr.msk.f32.gmra.mrb[18].mxu0 %vm225_vm1, %v9906_v5 }
 0x1e6   : > { %7792 = vmatprep.mubr.msk.f32.mxu0 %vm225_vm1, %v9908_v6 }
 0x1e9   : > { %7793 = vmatmul.mubr.msk.f32.gmra.mrb[20].mxu0 %vm225_vm1, %v9914_v7 }
 0x1ea   : > { %7795 = vmatprep.mubr.msk.f32.mxu0 %vm225_vm1, %v9916_v8 }
 0x1ed   : > { %7796 = vmatmul.mubr.msk.f32.gmra.mrb[22].mxu0 %vm225_vm1, %v9922_v9 }
 0x1ee   : > { %7798 = vmatprep.mubr.msk.f32.mxu0 %vm225_vm1, %v9924_v10 }
 0x1f1   : > { %7799 = vmatmul.mubr.msk.f32.gmra.mrb[24].mxu0 %vm225_vm1, %v9930_v11 }
 0x1f2   : > { %7801 = vmatprep.mubr.msk.f32.mxu0 %vm225_vm1, %v9932_v12 }
 0x1f5   : > { %7802 = vmatmul.mubr.msk.f32.gmra.mrb[26].mxu0 %vm225_vm1, %v9938_v13 }
 0x1f6   : > { %7804 = vmatprep.mubr.msk.f32.mxu0 %vm225_vm1, %v9940_v14 }
 0x1f9   : > { %7805 = vmatmul.mubr.msk.f32.gmra.mrb[28].mxu0 %vm225_vm1, %v9946_v15 }
 0x1fa   : > { %7807 = vmatprep.mubr.msk.f32.mxu0 %vm225_vm1, %v9948_v16 }
 0x1fd   : > { %7808 = vmatmul.mubr.msk.f32.gmra.mrb[30].mxu0 %vm225_vm1, %v9954_v17 }
 0x1fe   : > { %7812 = vmatprep.mubr.msk.f32.mxu0 %vm225_vm1, %v9832_v51 }
 0x201   : > { %7813 = vmatmul.mubr.msk.f32.vlgmr.msra.gmra.mrb[0].mxu0 %vm225_vm1, %v2216_v53 }
 0x202   : > { %7861 = vmatpush3.msk.msra.mxu0 %vm486_vm0, %v9837_v52  ;;  %7815 = vmatprep.mubr.msk.f32.mxu0 %vm225_vm1, %v9843_v54 }
 0x205   : > { %7816 = vmatmul.mubr.msk.f32.gmra.mrb[2].mxu0 %vm225_vm1, %v9850_v55 }
 0x206   : > { %7818 = vmatprep.mubr.msk.f32.mxu0 %vm225_vm1, %v9852_v56 }
 0x209   : > { %7819 = vmatmul.mubr.msk.f32.gmra.mrb[4].mxu0 %vm225_vm1, %v9858_v57 }
 0x20a   : > { %7821 = vmatprep.mubr.msk.f32.mxu0 %vm225_vm1, %v9860_v58 }
 0x20d   : > { %7822 = vmatmul.mubr.msk.f32.gmra.mrb[6].mxu0 %vm225_vm1, %v9866_v59 }
 0x20e   : > { %7824 = vmatprep.mubr.msk.f32.mxu0 %vm225_vm1, %v9868_v60 }
 0x211   : > { %7825 = vmatmul.mubr.msk.f32.gmra.mrb[8].mxu0 %vm225_vm1, %v9874_v61 }
 0x212   : > { %7827 = vmatprep.mubr.msk.f32.mxu0 %vm225_vm1, %v9876_v62 }
 0x215   : > { %7828 = vmatmul.mubr.msk.f32.gmra.mrb[10].mxu0 %vm225_vm1, %v9882_v63 }
 0x216   : > { %7830 = vmatprep.mubr.msk.f32.mxu0 %vm225_vm1, %v9884_v0 }
 0x219   : > { %7831 = vmatmul.mubr.msk.f32.gmra.mrb[12].mxu0 %vm225_vm1, %v9890_v1 }
 0x21a   : > { %7833 = vmatprep.mubr.msk.f32.mxu0 %vm225_vm1, %v9892_v2 }
 0x21d   : > { %7834 = vmatmul.mubr.msk.f32.gmra.mrb[14].mxu0 %vm225_vm1, %v9898_v3 }
 0x21e   : > { %7836 = vmatprep.mubr.msk.f32.mxu0 %vm225_vm1, %v9900_v4 }
 0x221   : > { %7837 = vmatmul.mubr.msk.f32.gmra.mrb[16].mxu0 %vm225_vm1, %v9906_v5 }
 0x222   : > { %7839 = vmatprep.mubr.msk.f32.mxu0 %vm225_vm1, %v9908_v6 }
 0x225   : > { %7840 = vmatmul.mubr.msk.f32.gmra.mrb[18].mxu0 %vm225_vm1, %v9914_v7 }
 0x226   : > { %7842 = vmatprep.mubr.msk.f32.mxu0 %vm225_vm1, %v9916_v8 }
 0x229   : > { %7843 = vmatmul.mubr.msk.f32.gmra.mrb[20].mxu0 %vm225_vm1, %v9922_v9 }
 0x22a   : > { %7845 = vmatprep.mubr.msk.f32.mxu0 %vm225_vm1, %v9924_v10 }
 0x22d   : > { %7846 = vmatmul.mubr.msk.f32.gmra.mrb[22].mxu0 %vm225_vm1, %v9930_v11 }
 0x22e   : > { %7848 = vmatprep.mubr.msk.f32.mxu0 %vm225_vm1, %v9932_v12 }
 0x231   : > { %7849 = vmatmul.mubr.msk.f32.gmra.mrb[24].mxu0 %vm225_vm1, %v9938_v13 }
 0x232   : > { %7851 = vmatprep.mubr.msk.f32.mxu0 %vm225_vm1, %v9940_v14 }
 0x235   : > { %7852 = vmatmul.mubr.msk.f32.gmra.mrb[26].mxu0 %vm225_vm1, %v9946_v15 }
 0x236   : > { %7854 = vmatprep.mubr.msk.f32.mxu0 %vm225_vm1, %v9948_v16 }
 0x239   : > { %7855 = vmatmul.mubr.msk.f32.gmra.mrb[28].mxu0 %vm225_vm1, %v9954_v17 }
 0x23a   : > { %7857 = vmatprep.mubr.msk.f32.mxu0 %vm225_vm1, %v2245_v18 }
 0x23d   : > { %7858 = vmatmul.mubr.msk.f32.gmra.mrb[30].mxu0 %vm225_vm1, %v2246_v19 }
 0x23e   : > { %7862 = vmatprep.mubr.msk.f32.mxu0 %vm225_vm1, %v9843_v54 }
 0x241   : > { %7863 = vmatmul.mubr.msk.f32.vlgmr.msra.gmra.mrb[0].mxu0 %vm225_vm1, %v9850_v55 }
 0x242   : > { %7865 = vmatprep.mubr.msk.f32.mxu0 %vm225_vm1, %v9852_v56 }
 0x245   : > { %7866 = vmatmul.mubr.msk.f32.gmra.mrb[2].mxu0 %vm225_vm1, %v9858_v57 }
 0x246   : > { %7868 = vmatprep.mubr.msk.f32.mxu0 %vm225_vm1, %v9860_v58 }
 0x249   : > { %7869 = vmatmul.mubr.msk.f32.gmra.mrb[4].mxu0 %vm225_vm1, %v9866_v59 }
 0x24a   : > { %7871 = vmatprep.mubr.msk.f32.mxu0 %vm225_vm1, %v9868_v60 }
 0x24d   : > { %7872 = vmatmul.mubr.msk.f32.gmra.mrb[6].mxu0 %vm225_vm1, %v9874_v61 }
 0x24e   : > { %7874 = vmatprep.mubr.msk.f32.mxu0 %vm225_vm1, %v9876_v62 }
 0x251   : > { %7875 = vmatmul.mubr.msk.f32.gmra.mrb[8].mxu0 %vm225_vm1, %v9882_v63 }
 0x252   : > { %7877 = vmatprep.mubr.msk.f32.mxu0 %vm225_vm1, %v9884_v0 }
 0x255   : > { %7878 = vmatmul.mubr.msk.f32.gmra.mrb[10].mxu0 %vm225_vm1, %v9890_v1 }
 0x256   : > { %7880 = vmatprep.mubr.msk.f32.mxu0 %vm225_vm1, %v9892_v2 }
 0x259   : > { %7881 = vmatmul.mubr.msk.f32.gmra.mrb[12].mxu0 %vm225_vm1, %v9898_v3 }
 0x25a   : > { %7883 = vmatprep.mubr.msk.f32.mxu0 %vm225_vm1, %v9900_v4 }
 0x25d   : > { %7884 = vmatmul.mubr.msk.f32.gmra.mrb[14].mxu0 %vm225_vm1, %v9906_v5 }
 0x25e   : > { %7886 = vmatprep.mubr.msk.f32.mxu0 %vm225_vm1, %v9908_v6 }
 0x261   : > { %7887 = vmatmul.mubr.msk.f32.gmra.mrb[16].mxu0 %vm225_vm1, %v9914_v7 }
 0x262   : > { %7889 = vmatprep.mubr.msk.f32.mxu0 %vm225_vm1, %v9916_v8 }
 0x265   : > { %7890 = vmatmul.mubr.msk.f32.gmra.mrb[18].mxu0 %vm225_vm1, %v9922_v9 }
 0x266   : > { %7892 = vmatprep.mubr.msk.f32.mxu0 %vm225_vm1, %v9924_v10 }
 0x269   : > { %7893 = vmatmul.mubr.msk.f32.gmra.mrb[20].mxu0 %vm225_vm1, %v9930_v11 }
 0x26a   : > { %7895 = vmatprep.mubr.msk.f32.mxu0 %vm225_vm1, %v9932_v12 }
 0x26d   : > { %7896 = vmatmul.mubr.msk.f32.gmra.mrb[22].mxu0 %vm225_vm1, %v9938_v13 }
 0x26e   : > { %7898 = vmatprep.mubr.msk.f32.mxu0 %vm225_vm1, %v9940_v14 }
 0x271   : > { %7899 = vmatmul.mubr.msk.f32.gmra.mrb[24].mxu0 %vm225_vm1, %v9946_v15 }
 0x272   : > { %7901 = vmatprep.mubr.msk.f32.mxu0 %vm225_vm1, %v9948_v16 }
 0x275   : > { %7902 = vmatmul.mubr.msk.f32.gmra.mrb[26].mxu0 %vm225_vm1, %v9954_v17 }
 0x276   : > { %7904 = vmatprep.mubr.msk.f32.mxu0 %vm225_vm1, %v2245_v18 }
 0x279   : > { %7905 = vmatmul.mubr.msk.f32.gmra.mrb[28].mxu0 %vm225_vm1, %v2246_v19 }
 0x27a   : > { %7907 = vmatprep.mubr.msk.f32.mxu0 %vm225_vm1, %v2247_v20 }
 0x27d   : > { %7908 = vmatmul.mubr.msk.f32.gmra.mrb[30].mxu0 %vm225_vm1, %v2248_v21 }
 0x314   : > { %v7864_v28 = vpop.f32.mrb[0].mxu0 }
 0x315   : > { %v8360_v29 = vadd.f32 %v7864_v28, %v10103_v27  ;;  %v2952_v30 = vpop.f32.mrb[1].mxu0 }
 0x316   : > { %v8361_v31 = vadd.f32 %v10103_v27, %v2952_v30 }
 0x317   : > { %v3144_v32 = vmax.f32 %v8360_v29, 0.0 }
 0x318   : > { %v3143_v33 = vmax.f32 %v8361_v31, 0.0  ;;  %v7867_v34 = vpop.f32.mrb[2].mxu0 }
 0x319   : > { %3231 = vst.msk [vmem:[#allocation3 + $0x21] sm:$0xff] %vm225_vm1, %v3144_v32  ;;  %v8362_v35 = vadd.f32 %v7867_v34, %v10103_v27  ;;  %v2962_v36 = vpop.f32.mrb[3].mxu0 }
 0x31a   : > { %3230 = vst.msk [vmem:[#allocation3 + $0x19] sm:$0xff] %vm225_vm1, %v3143_v33  ;;  %v8363_v37 = vadd.f32 %v10103_v27, %v2962_v36 }
 0x31b   : > { %v3146_v38 = vmax.f32 %v8362_v35, 0.0 }
 0x31c   : > { %v3145_v39 = vmax.f32 %v8363_v37, 0.0  ;;  %v7870_v40 = vpop.f32.mrb[4].mxu0 }
 0x31d   : > { %3233 = vst.msk [vmem:[#allocation3 + $0x39] sm:$0xff] %vm225_vm1, %v3146_v38  ;;  %v8364_v41 = vadd.f32 %v7870_v40, %v10103_v27  ;;  %v2972_v42 = vpop.f32.mrb[5].mxu0 }
 0x31e   : > { %3232 = vst.msk [vmem:[#allocation3 + $0x31] sm:$0xff] %vm225_vm1, %v3145_v39  ;;  %v8365_v43 = vadd.f32 %v10103_v27, %v2972_v42 }
 0x31f   : > { %v3148_v44 = vmax.f32 %v8364_v41, 0.0 }
 0x320   : > { %v3147_v45 = vmax.f32 %v8365_v43, 0.0  ;;  %v7873_v46 = vpop.f32.mrb[6].mxu0 }
 0x321   : > { %3235 = vst.msk [vmem:[#allocation3 + $0x51] sm:$0xff] %vm225_vm1, %v3148_v44  ;;  %v8366_v47 = vadd.f32 %v7873_v46, %v10103_v27  ;;  %v2982_v48 = vpop.f32.mrb[7].mxu0  ;;  %v10117_v49 = vld [vmem:[#allocation3 + $0x18] sm:$0xff]  ;;  %v10119_v50 = vld [vmem:[#allocation3 + $0x20] sm:$0xff] }
 0x322   : > { %3234 = vst.msk [vmem:[#allocation3 + $0x49] sm:$0xff] %vm225_vm1, %v3147_v45  ;;  %v8367_v51 = vadd.f32 %v10103_v27, %v2982_v48  ;;  %7915 = vmatprep.mubr.msk.f32.mxu1 %vm225_vm1, %v10117_v49 }
 0x323   : > { %v3150_v52 = vmax.f32 %v8366_v47, 0.0  ;;  %7916 = vmatmul.mubr.msk.f32.gmra.mrb[2].mxu1 %vm225_vm1, %v10119_v50 }
 0x324   : > { %v3149_v53 = vmax.f32 %v8367_v51, 0.0  ;;  %v7876_v54 = vpop.f32.mrb[8].mxu0 }
 0x325   : > { %3237 = vst.msk [vmem:[#allocation3 + $0x69] sm:$0xff] %vm225_vm1, %v3150_v52  ;;  %v8368_v55 = vadd.f32 %v7876_v54, %v10103_v27  ;;  %v2992_v56 = vpop.f32.mrb[9].mxu0  ;;  %v10129_v57 = vld [vmem:[#allocation3 + $0x30] sm:$0xff]  ;;  %v10131_v58 = vld [vmem:[#allocation3 + $0x38] sm:$0xff] }
 0x326   : > { %3236 = vst.msk [vmem:[#allocation3 + $0x61] sm:$0xff] %vm225_vm1, %v3149_v53  ;;  %v8369_v59 = vadd.f32 %v10103_v27, %v2992_v56  ;;  %7918 = vmatprep.mubr.msk.f32.mxu1 %vm225_vm1, %v10129_v57 }
 0x327   : > { %v3152_v60 = vmax.f32 %v8368_v55, 0.0  ;;  %7919 = vmatmul.mubr.msk.f32.gmra.mrb[4].mxu1 %vm225_vm1, %v10131_v58 }
 0x328   : > { %v3151_v61 = vmax.f32 %v8369_v59, 0.0  ;;  %v7879_v62 = vpop.f32.mrb[10].mxu0 }
 0x329   : > { %3239 = vst.msk [vmem:[#allocation3 + $0x81] sm:$0xff] %vm225_vm1, %v3152_v60  ;;  %v8370_v63 = vadd.f32 %v7879_v62, %v10103_v27  ;;  %v3002_v0 = vpop.f32.mrb[11].mxu0  ;;  %v10141_v1 = vld [vmem:[#allocation3 + $0x48] sm:$0xff]  ;;  %v10143_v2 = vld [vmem:[#allocation3 + $0x50] sm:$0xff] }
 0x32a   : > { %3238 = vst.msk [vmem:[#allocation3 + $0x79] sm:$0xff] %vm225_vm1, %v3151_v61  ;;  %v8371_v3 = vadd.f32 %v10103_v27, %v3002_v0  ;;  %7921 = vmatprep.mubr.msk.f32.mxu1 %vm225_vm1, %v10141_v1 }
 0x32b   : > { %v3154_v4 = vmax.f32 %v8370_v63, 0.0  ;;  %7922 = vmatmul.mubr.msk.f32.gmra.mrb[6].mxu1 %vm225_vm1, %v10143_v2 }
 0x32c   : > { %v3153_v5 = vmax.f32 %v8371_v3, 0.0  ;;  %v7882_v6 = vpop.f32.mrb[12].mxu0 }
 0x32d   : > { %3241 = vst.msk [vmem:[#allocation3 + $0x99] sm:$0xff] %vm225_vm1, %v3154_v4  ;;  %v8372_v7 = vadd.f32 %v7882_v6, %v10103_v27  ;;  %v3012_v8 = vpop.f32.mrb[13].mxu0  ;;  %v10153_v9 = vld [vmem:[#allocation3 + $0x60] sm:$0xff]  ;;  %v10155_v10 = vld [vmem:[#allocation3 + $0x68] sm:$0xff] }
 0x32e   : > { %3240 = vst.msk [vmem:[#allocation3 + $0x91] sm:$0xff] %vm225_vm1, %v3153_v5  ;;  %v8373_v11 = vadd.f32 %v10103_v27, %v3012_v8  ;;  %7924 = vmatprep.mubr.msk.f32.mxu1 %vm225_vm1, %v10153_v9 }
 0x32f   : > { %v3156_v12 = vmax.f32 %v8372_v7, 0.0  ;;  %7925 = vmatmul.mubr.msk.f32.gmra.mrb[8].mxu1 %vm225_vm1, %v10155_v10 }
 0x330   : > { %v3155_v13 = vmax.f32 %v8373_v11, 0.0  ;;  %v7885_v14 = vpop.f32.mrb[14].mxu0 }
 0x331   : > { %3243 = vst.msk [vmem:[#allocation3 + $0xb1] sm:$0xff] %vm225_vm1, %v3156_v12  ;;  %v8374_v15 = vadd.f32 %v7885_v14, %v10103_v27  ;;  %v3022_v16 = vpop.f32.mrb[15].mxu0  ;;  %v10165_v17 = vld [vmem:[#allocation3 + $0x78] sm:$0xff]  ;;  %v10167_v18 = vld [vmem:[#allocation3 + $0x80] sm:$0xff] }
 0x332   : > { %3242 = vst.msk [vmem:[#allocation3 + $0xa9] sm:$0xff] %vm225_vm1, %v3155_v13  ;;  %v8375_v19 = vadd.f32 %v10103_v27, %v3022_v16  ;;  %7927 = vmatprep.mubr.msk.f32.mxu1 %vm225_vm1, %v10165_v17 }
 0x333   : > { %v3158_v20 = vmax.f32 %v8374_v15, 0.0  ;;  %7928 = vmatmul.mubr.msk.f32.gmra.mrb[10].mxu1 %vm225_vm1, %v10167_v18 }
 0x334   : > { %v3157_v21 = vmax.f32 %v8375_v19, 0.0  ;;  %v7888_v22 = vpop.f32.mrb[16].mxu0 }
 0x335   : > { %3245 = vst.msk [vmem:[#allocation3 + $0xc9] sm:$0xff] %vm225_vm1, %v3158_v20  ;;  %v8376_v23 = vadd.f32 %v7888_v22, %v10103_v27  ;;  %v3032_v24 = vpop.f32.mrb[17].mxu0  ;;  %v10177_v25 = vld [vmem:[#allocation3 + $0x90] sm:$0xff]  ;;  %v10179_v28 = vld [vmem:[#allocation3 + $0x98] sm:$0xff] }
 0x336   : > { %3244 = vst.msk [vmem:[#allocation3 + $0xc1] sm:$0xff] %vm225_vm1, %v3157_v21  ;;  %v8377_v29 = vadd.f32 %v10103_v27, %v3032_v24  ;;  %7930 = vmatprep.mubr.msk.f32.mxu1 %vm225_vm1, %v10177_v25 }
 0x337   : > { %v3160_v30 = vmax.f32 %v8376_v23, 0.0  ;;  %7931 = vmatmul.mubr.msk.f32.gmra.mrb[12].mxu1 %vm225_vm1, %v10179_v28 }
 0x338   : > { %v3159_v31 = vmax.f32 %v8377_v29, 0.0  ;;  %v7891_v32 = vpop.f32.mrb[18].mxu0 }
 0x339   : > { %3247 = vst.msk [vmem:[#allocation3 + $0xe1] sm:$0xff] %vm225_vm1, %v3160_v30  ;;  %v8378_v33 = vadd.f32 %v7891_v32, %v10103_v27  ;;  %v3042_v34 = vpop.f32.mrb[19].mxu0  ;;  %v10189_v35 = vld [vmem:[#allocation3 + $0xa8] sm:$0xff]  ;;  %v10191_v36 = vld [vmem:[#allocation3 + $0xb0] sm:$0xff] }
 0x33a   : > { %3246 = vst.msk [vmem:[#allocation3 + $0xd9] sm:$0xff] %vm225_vm1, %v3159_v31  ;;  %v8379_v37 = vadd.f32 %v10103_v27, %v3042_v34  ;;  %7933 = vmatprep.mubr.msk.f32.mxu1 %vm225_vm1, %v10189_v35 }
 0x33b   : > { %v3162_v38 = vmax.f32 %v8378_v33, 0.0  ;;  %7934 = vmatmul.mubr.msk.f32.gmra.mrb[14].mxu1 %vm225_vm1, %v10191_v36 }
 0x33c   : > { %v3161_v39 = vmax.f32 %v8379_v37, 0.0  ;;  %v7894_v40 = vpop.f32.mrb[20].mxu0 }
 0x33d   : > { %3249 = vst.msk [vmem:[#allocation3 + $0xf9] sm:$0xff] %vm225_vm1, %v3162_v38  ;;  %v8380_v41 = vadd.f32 %v7894_v40, %v10103_v27  ;;  %v3052_v42 = vpop.f32.mrb[21].mxu0  ;;  %v10201_v43 = vld [vmem:[#allocation3 + $0xc0] sm:$0xff]  ;;  %v10203_v44 = vld [vmem:[#allocation3 + $0xc8] sm:$0xff] }
 0x33e   : > { %3248 = vst.msk [vmem:[#allocation3 + $0xf1] sm:$0xff] %vm225_vm1, %v3161_v39  ;;  %v8381_v45 = vadd.f32 %v10103_v27, %v3052_v42  ;;  %7936 = vmatprep.mubr.msk.f32.mxu1 %vm225_vm1, %v10201_v43 }
 0x33f   : > { %v3164_v46 = vmax.f32 %v8380_v41, 0.0  ;;  %7937 = vmatmul.mubr.msk.f32.gmra.mrb[16].mxu1 %vm225_vm1, %v10203_v44 }
 0x340   : > { %v3163_v47 = vmax.f32 %v8381_v45, 0.0  ;;  %v7897_v48 = vpop.f32.mrb[22].mxu0  ;;  %v6658_v45 = vld [vmem:[%s11069_s3 + $0x4] sm:$0xf] }
 0x341   : > { %3251 = vst.msk [vmem:[#allocation3 + $0x111] sm:$0xff] %vm225_vm1, %v3164_v46  ;;  %v8382_v51 = vadd.f32 %v7897_v48, %v10103_v27  ;;  %v3062_v52 = vpop.f32.mrb[23].mxu0  ;;  %v10213_v53 = vld [vmem:[#allocation3 + $0xd8] sm:$0xff]  ;;  %v10215_v54 = vld [vmem:[#allocation3 + $0xe0] sm:$0xff] }
 0x342   : > { %3250 = vst.msk [vmem:[#allocation3 + $0x109] sm:$0xff] %vm225_vm1, %v3163_v47  ;;  %v8383_v55 = vadd.f32 %v10103_v27, %v3062_v52  ;;  %7939 = vmatprep.mubr.msk.f32.mxu1 %vm225_vm1, %v10213_v53  ;;  %v10462_v46 = vld [vmem:[#allocation3 + $0x81] sm:$0xff]  ;;  %v10466_v47 = vld [vmem:[#allocation3 + $0x91] sm:$0xff]  ;;  %v10470_v48 = vld [vmem:[#allocation3 + $0x99] sm:$0xff] }
 0x343   : > { %v3166_v56 = vmax.f32 %v8382_v51, 0.0  ;;  %7940 = vmatmul.mubr.msk.f32.gmra.mrb[18].mxu1 %vm225_vm1, %v10215_v54  ;;  %v10474_v51 = vld [vmem:[#allocation3 + $0xa9] sm:$0xff]  ;;  %v10478_v52 = vld [vmem:[#allocation3 + $0xb1] sm:$0xff] }
 0x344   : > { %v3165_v59 = vmax.f32 %v8383_v55, 0.0  ;;  %v7900_v60 = vpop.f32.mrb[24].mxu0  ;;  %v10490_v55 = vld [vmem:[#allocation3 + $0xd9] sm:$0xff] }
 0x345   : > { %3253 = vst.msk [vmem:[#allocation3 + $0x129] sm:$0xff] %vm225_vm1, %v3166_v56  ;;  %v8384_v61 = vadd.f32 %v7900_v60, %v10103_v27  ;;  %v3072_v62 = vpop.f32.mrb[25].mxu0  ;;  %v10225_v63 = vld [vmem:[#allocation3 + $0xf0] sm:$0xff]  ;;  %v10227_v0 = vld [vmem:[#allocation3 + $0xf8] sm:$0xff]  ;;  %v10494_v56 = vld [vmem:[#allocation3 + $0xe1] sm:$0xff] }
 0x346   : > { %3252 = vst.msk [vmem:[#allocation3 + $0x121] sm:$0xff] %vm225_vm1, %v3165_v59  ;;  %v8385_v3 = vadd.f32 %v10103_v27, %v3072_v62  ;;  %7942 = vmatprep.mubr.msk.f32.mxu1 %vm225_vm1, %v10225_v63  ;;  %v10498_v59 = vld [vmem:[#allocation3 + $0xf1] sm:$0xff]  ;;  %v10502_v60 = vld [vmem:[#allocation3 + $0xf9] sm:$0xff] }
 0x347   : > { %v3168_v4 = vmax.f32 %v8384_v61, 0.0  ;;  %7943 = vmatmul.mubr.msk.f32.gmra.mrb[20].mxu1 %vm225_vm1, %v10227_v0 }
 0x348   : > { %v3167_v5 = vmax.f32 %v8385_v3, 0.0  ;;  %v7903_v6 = vpop.f32.mrb[26].mxu0  ;;  %v10510_v62 = vld [vmem:[#allocation3 + $0x111] sm:$0xff] }
 0x349   : > { %3255 = vst.msk [vmem:[#allocation3 + $0x141] sm:$0xff] %vm225_vm1, %v3168_v4  ;;  %v8386_v7 = vadd.f32 %v7903_v6, %v10103_v27  ;;  %v3082_v8 = vpop.f32.mrb[27].mxu0  ;;  %v10237_v11 = vld [vmem:[#allocation3 + $0x108] sm:$0xff]  ;;  %v10239_v12 = vld [vmem:[#allocation3 + $0x110] sm:$0xff] }
 0x34a   : > { %3254 = vst.msk [vmem:[#allocation3 + $0x139] sm:$0xff] %vm225_vm1, %v3167_v5  ;;  %v8387_v13 = vadd.f32 %v10103_v27, %v3082_v8  ;;  %7945 = vmatprep.mubr.msk.f32.mxu1 %vm225_vm1, %v10237_v11  ;;  %v10506_v61 = vld [vmem:[#allocation3 + $0x109] sm:$0xff] }
 0x34b   : > { %v3170_v14 = vmax.f32 %v8386_v7, 0.0  ;;  %7946 = vmatmul.mubr.msk.f32.gmra.mrb[22].mxu1 %vm225_vm1, %v10239_v12 }
 0x34c   : > { %v3169_v15 = vmax.f32 %v8387_v13, 0.0  ;;  %v7906_v16 = vpop.f32.mrb[28].mxu0 }
 0x34d   : > { %3257 = vst.msk [vmem:[#allocation3 + $0x159] sm:$0xff] %vm225_vm1, %v3170_v14  ;;  %v8388_v19 = vadd.f32 %v7906_v16, %v10103_v27  ;;  %v3092_v20 = vpop.f32.mrb[29].mxu0  ;;  %v10249_v21 = vld [vmem:[#allocation3 + $0x120] sm:$0xff]  ;;  %v10251_v22 = vld [vmem:[#allocation3 + $0x128] sm:$0xff] }
 0x34e   : > { %3256 = vst.msk [vmem:[#allocation3 + $0x151] sm:$0xff] %vm225_vm1, %v3169_v15  ;;  %v8389_v23 = vadd.f32 %v10103_v27, %v3092_v20  ;;  %7948 = vmatprep.mubr.msk.f32.mxu1 %vm225_vm1, %v10249_v21  ;;  %v6794_v14 = vld [vmem:[%s11069_s3 + $0x14] sm:$0xf]  ;;  %v4232_v15 = vld [vmem:[#allocation3 + $0x199] sm:$0xff]  ;;  %v5129_v20 = vld [vmem:[#allocation3 + $0xa] sm:$0xff] }
 0x34f   : > { %v3172_v24 = vmax.f32 %v8388_v19, 0.0  ;;  %7949 = vmatmul.mubr.msk.f32.gmra.mrb[24].mxu1 %vm225_vm1, %v10251_v22  ;;  %v4233_v16 = vld [vmem:[#allocation3 + $0x1a1] sm:$0xff] }
 0x350   : > { %v3171_v29 = vmax.f32 %v8389_v23, 0.0  ;;  %v7909_v30 = vpop.f32.mrb[30].mxu0  ;;  %v10526_v4 = vld [vmem:[#allocation3 + $0x141] sm:$0xff] }
 0x351   : > { %3259 = vst.msk [vmem:[#allocation3 + $0x171] sm:$0xff] %vm225_vm1, %v3172_v24  ;;  %v8390_v31 = vadd.f32 %v7909_v30, %v10103_v27  ;;  %v3102_v32 = vpop.f32.mrb[31].mxu0  ;;  %v10261_v33 = vld [vmem:[#allocation3 + $0x138] sm:$0xff]  ;;  %v10263_v34 = vld [vmem:[#allocation3 + $0x140] sm:$0xff]  ;;  %v10697_v30 = vld [vmem:[#allocation3 + $0x4a] sm:$0xff] }
 0x352   : > { %3258 = vst.msk [vmem:[#allocation3 + $0x169] sm:$0xff] %vm225_vm1, %v3171_v29  ;;  %v8391_v37 = vadd.f32 %v10103_v27, %v3102_v32  ;;  %7951 = vmatprep.mubr.msk.f32.mxu1 %vm225_vm1, %v10261_v33  ;;  %v10522_v3 = vld [vmem:[#allocation3 + $0x139] sm:$0xff]  ;;  %v5128_v19 = vld [vmem:[#allocation3 + $0x2] sm:$0xff] }
 0x353   : > { %v3174_v38 = vmax.f32 %v8390_v31, 0.0  ;;  %7952 = vmatmul.mubr.msk.f32.gmra.mrb[26].mxu1 %vm225_vm1, %v10263_v34  ;;  %v5131_v23 = vld [vmem:[#allocation3 + $0x22] sm:$0xff]  ;;  %v10689_v24 = vld [vmem:[#allocation3 + $0x32] sm:$0xff]  ;;  %v10693_v29 = vld [vmem:[#allocation3 + $0x3a] sm:$0xff] }
 0x354   : > { %v3173_v39 = vmax.f32 %v8391_v37, 0.0  ;;  %v10534_v6 = vld [vmem:[#allocation3 + $0x159] sm:$0xff]  ;;  %v10705_v32 = vld [vmem:[#allocation3 + $0x62] sm:$0xff] }
 0x355   : > { %3261 = vst.msk [vmem:[#allocation3 + $0x189] sm:$0xff] %vm225_vm1, %v3174_v38  ;;  %v10272_v40 = vld [vmem:[#allocation3 + $0x150] sm:$0xff]  ;;  %v10274_v41 = vld [vmem:[#allocation3 + $0x158] sm:$0xff]  ;;  %v10717_v37 = vld [vmem:[#allocation3 + $0x82] sm:$0xff] }
 0x356   : > { %3260 = vst.msk [vmem:[#allocation3 + $0x181] sm:$0xff] %vm225_vm1, %v3173_v39  ;;  %7954 = vmatprep.mubr.msk.f32.mxu1 %vm225_vm1, %v10272_v40  ;;  %v10530_v5 = vld [vmem:[#allocation3 + $0x151] sm:$0xff]  ;;  %v10725_v39 = vld [vmem:[#allocation3 + $0x9a] sm:$0xff] }
 0x357   : > { %7955 = vmatmul.mubr.msk.f32.gmra.mrb[28].mxu1 %vm225_vm1, %v10274_v41  ;;  %v10701_v31 = vld [vmem:[#allocation3 + $0x52] sm:$0xff] }
 0x358   : > { %v10542_v8 = vld [vmem:[#allocation3 + $0x171] sm:$0xff] }
 0x359   : > { %v10281_v27 = vld [vmem:[#allocation3 + $0x168] sm:$0xff]  ;;  %v10283_v42 = vld [vmem:[#allocation3 + $0x170] sm:$0xff] }
 0x35a   : > { %7957 = vmatprep.mubr.msk.f32.mxu1 %vm225_vm1, %v10281_v27  ;;  %v10538_v7 = vld [vmem:[#allocation3 + $0x169] sm:$0xff]  ;;  %v10721_v38 = vld [vmem:[#allocation3 + $0x92] sm:$0xff] }
 0x35b   : > { %7958 = vmatmul.mubr.msk.f32.gmra.mrb[30].mxu1 %vm225_vm1, %v10283_v42 }
 0x35c   : > { %7962 = vmatprep.mubr.msk.f32.mxu1 %vm225_vm1, %v10117_v49  ;;  %v4231_v13 = vld [vmem:[#allocation3 + $0x189] sm:$0xff] }
 0x35d   : > { %v3302_v49 = vld [vmem:[#allocation3 + $0x188] sm:$0xff] }
 0x35f   : > { %7963 = vmatmul.mubr.msk.f32.vlgmr.msra.gmra.mrb[0].mxu1 %vm225_vm1, %v10119_v50  ;;  %v6692_v50 = vld [vmem:[%s11069_s3 + $0x10] sm:$0xf] }
 0x360   : > { %8011 = vmatpush3.msk.msra.mxu1 %vm486_vm0, %v10096_v26  ;;  %7965 = vmatprep.mubr.msk.f32.mxu1 %vm225_vm1, %v10129_v57  ;;  %v3301_v26 = vld [vmem:[#allocation3 + $0x180] sm:$0xff] }
 0x361   : > { %8060 = vmatprep.subr.msk.mxu1 %vm486_vm0, %v6658_v45 }
 0x363   : > { %7966 = vmatmul.mubr.msk.f32.gmra.mrb[2].mxu1 %vm225_vm1, %v10131_v58 }
 0x364   : > { %7968 = vmatprep.mubr.msk.f32.mxu1 %vm225_vm1, %v10141_v1 }
 0x367   : > { %7969 = vmatmul.mubr.msk.f32.gmra.mrb[4].mxu1 %vm225_vm1, %v10143_v2 }
 0x368   : > { %7971 = vmatprep.mubr.msk.f32.mxu1 %vm225_vm1, %v10153_v9 }
 0x36b   : > { %7972 = vmatmul.mubr.msk.f32.gmra.mrb[6].mxu1 %vm225_vm1, %v10155_v10 }
 0x36c   : > { %7974 = vmatprep.mubr.msk.f32.mxu1 %vm225_vm1, %v10165_v17 }
 0x36f   : > { %7975 = vmatmul.mubr.msk.f32.gmra.mrb[8].mxu1 %vm225_vm1, %v10167_v18 }
 0x370   : > { %7977 = vmatprep.mubr.msk.f32.mxu1 %vm225_vm1, %v10177_v25 }
 0x373   : > { %7978 = vmatmul.mubr.msk.f32.gmra.mrb[10].mxu1 %vm225_vm1, %v10179_v28 }
 0x374   : > { %7980 = vmatprep.mubr.msk.f32.mxu1 %vm225_vm1, %v10189_v35 }
 0x377   : > { %7981 = vmatmul.mubr.msk.f32.gmra.mrb[12].mxu1 %vm225_vm1, %v10191_v36 }
 0x378   : > { %7983 = vmatprep.mubr.msk.f32.mxu1 %vm225_vm1, %v10201_v43 }
 0x37b   : > { %7984 = vmatmul.mubr.msk.f32.gmra.mrb[14].mxu1 %vm225_vm1, %v10203_v44 }
 0x37c   : > { %7986 = vmatprep.mubr.msk.f32.mxu1 %vm225_vm1, %v10213_v53 }
 0x37f   : > { %7987 = vmatmul.mubr.msk.f32.gmra.mrb[16].mxu1 %vm225_vm1, %v10215_v54 }
 0x380   : > { %7989 = vmatprep.mubr.msk.f32.mxu1 %vm225_vm1, %v10225_v63 }
 0x383   : > { %7990 = vmatmul.mubr.msk.f32.gmra.mrb[18].mxu1 %vm225_vm1, %v10227_v0 }
 0x384   : > { %7992 = vmatprep.mubr.msk.f32.mxu1 %vm225_vm1, %v10237_v11 }
 0x387   : > { %7993 = vmatmul.mubr.msk.f32.gmra.mrb[20].mxu1 %vm225_vm1, %v10239_v12 }
 0x388   : > { %7995 = vmatprep.mubr.msk.f32.mxu1 %vm225_vm1, %v10249_v21 }
 0x38b   : > { %7996 = vmatmul.mubr.msk.f32.gmra.mrb[22].mxu1 %vm225_vm1, %v10251_v22 }
 0x38c   : > { %7998 = vmatprep.mubr.msk.f32.mxu1 %vm225_vm1, %v10261_v33 }
 0x38f   : > { %7999 = vmatmul.mubr.msk.f32.gmra.mrb[24].mxu1 %vm225_vm1, %v10263_v34 }
 0x390   : > { %8001 = vmatprep.mubr.msk.f32.mxu1 %vm225_vm1, %v10272_v40 }
 0x393   : > { %8002 = vmatmul.mubr.msk.f32.gmra.mrb[26].mxu1 %vm225_vm1, %v10274_v41 }
 0x394   : > { %8004 = vmatprep.mubr.msk.f32.mxu1 %vm225_vm1, %v10281_v27 }
 0x397   : > { %8005 = vmatmul.mubr.msk.f32.gmra.mrb[28].mxu1 %vm225_vm1, %v10283_v42 }
 0x398   : > { %8007 = vmatprep.mubr.msk.f32.mxu1 %vm225_vm1, %v3301_v26 }
 0x39b   : > { %8008 = vmatmul.mubr.msk.f32.gmra.mrb[30].mxu1 %vm225_vm1, %v3302_v49 }
 0x39c   : > { %8012 = vmatprep.mubr.msk.f32.mxu1 %vm225_vm1, %v10129_v57  ;;  %v3303_v57 = vld [vmem:[#allocation3 + $0x198] sm:$0xff] }
 0x39f   : > { %8013 = vmatmul.mubr.msk.f32.vlgmr.msra.gmra.mrb[0].mxu1 %vm225_vm1, %v10131_v58  ;;  %v3304_v58 = vld [vmem:[#allocation3 + $0x1a0] sm:$0xff] }
 0x3a0   : > { %8061 = vmatpush3.msk.msra.mxu1 %vm486_vm0, %v6658_v45  ;;  %8015 = vmatprep.mubr.msk.f32.mxu1 %vm225_vm1, %v10141_v1  ;;  %v4198_v1 = vld [vmem:[#allocation3 + $0x1] sm:$0xff] }
 0x3a1   : > { %8110 = vmatprep.subr.msk.mxu1 %vm486_vm0, %v6692_v50  ;;  %v10745_v45 = vld [vmem:[#allocation3 + $0xda] sm:$0xff] }
 0x3a3   : > { %8016 = vmatmul.mubr.msk.f32.gmra.mrb[2].mxu1 %vm225_vm1, %v10143_v2  ;;  %v4199_v2 = vld [vmem:[#allocation3 + $0x9] sm:$0xff] }
 0x3a4   : > { %8018 = vmatprep.mubr.msk.f32.mxu1 %vm225_vm1, %v10153_v9  ;;  %v10426_v9 = vld [vmem:[%s11069_s3 + $0x1c] sm:$0xf] }
 0x3a7   : > { %8019 = vmatmul.mubr.msk.f32.gmra.mrb[4].mxu1 %vm225_vm1, %v10155_v10  ;;  %v4200_v10 = vld [vmem:[#allocation3 + $0x19] sm:$0xff] }
 0x3a8   : > { %8021 = vmatprep.mubr.msk.f32.mxu1 %vm225_vm1, %v10165_v17  ;;  %v4201_v17 = vld [vmem:[#allocation3 + $0x21] sm:$0xff] }
 0x3ab   : > { %8022 = vmatmul.mubr.msk.f32.gmra.mrb[6].mxu1 %vm225_vm1, %v10167_v18  ;;  %v10434_v18 = vld [vmem:[#allocation3 + $0x31] sm:$0xff] }
 0x3ac   : > { %8024 = vmatprep.mubr.msk.f32.mxu1 %vm225_vm1, %v10177_v25  ;;  %v10438_v25 = vld [vmem:[#allocation3 + $0x39] sm:$0xff] }
 0x3af   : > { %8025 = vmatmul.mubr.msk.f32.gmra.mrb[8].mxu1 %vm225_vm1, %v10179_v28  ;;  %v10442_v28 = vld [vmem:[#allocation3 + $0x49] sm:$0xff] }
 0x3b0   : > { %8027 = vmatprep.mubr.msk.f32.mxu1 %vm225_vm1, %v10189_v35  ;;  %v10446_v35 = vld [vmem:[#allocation3 + $0x51] sm:$0xff] }
 0x3b3   : > { %8028 = vmatmul.mubr.msk.f32.gmra.mrb[10].mxu1 %vm225_vm1, %v10191_v36  ;;  %v10450_v36 = vld [vmem:[#allocation3 + $0x61] sm:$0xff] }
 0x3b4   : > { %8030 = vmatprep.mubr.msk.f32.mxu1 %vm225_vm1, %v10201_v43  ;;  %v10454_v43 = vld [vmem:[#allocation3 + $0x69] sm:$0xff] }
 0x3b7   : > { %8031 = vmatmul.mubr.msk.f32.gmra.mrb[12].mxu1 %vm225_vm1, %v10203_v44  ;;  %v10458_v44 = vld [vmem:[#allocation3 + $0x79] sm:$0xff] }
 0x3b8   : > { %8033 = vmatprep.mubr.msk.f32.mxu1 %vm225_vm1, %v10213_v53  ;;  %v10482_v53 = vld [vmem:[#allocation3 + $0xc1] sm:$0xff] }
 0x3bb   : > { %8034 = vmatmul.mubr.msk.f32.gmra.mrb[14].mxu1 %vm225_vm1, %v10215_v54  ;;  %v10486_v54 = vld [vmem:[#allocation3 + $0xc9] sm:$0xff] }
 0x3bc   : > { %8036 = vmatprep.mubr.msk.f32.mxu1 %vm225_vm1, %v10225_v63  ;;  %v10514_v63 = vld [vmem:[#allocation3 + $0x121] sm:$0xff] }
 0x3bf   : > { %8037 = vmatmul.mubr.msk.f32.gmra.mrb[16].mxu1 %vm225_vm1, %v10227_v0  ;;  %v10518_v0 = vld [vmem:[#allocation3 + $0x129] sm:$0xff] }
 0x3c0   : > { %8039 = vmatprep.mubr.msk.f32.mxu1 %vm225_vm1, %v10237_v11  ;;  %v6760_v11 = vld [vmem:[%s11069_s3 + $0x8] sm:$0xf] }
 0x3c3   : > { %8040 = vmatmul.mubr.msk.f32.gmra.mrb[18].mxu1 %vm225_vm1, %v10239_v12  ;;  %v4230_v12 = vld [vmem:[#allocation3 + $0x181] sm:$0xff] }
 0x3c4   : > { %8042 = vmatprep.mubr.msk.f32.mxu1 %vm225_vm1, %v10249_v21  ;;  %v10681_v21 = vld [vmem:[%s11069_s3 + $0x20] sm:$0xf] }
 0x3c7   : > { %8043 = vmatmul.mubr.msk.f32.gmra.mrb[20].mxu1 %vm225_vm1, %v10251_v22  ;;  %v5130_v22 = vld [vmem:[#allocation3 + $0x1a] sm:$0xff] }
 0x3c8   : > { %8045 = vmatprep.mubr.msk.f32.mxu1 %vm225_vm1, %v10261_v33  ;;  %v10709_v33 = vld [vmem:[#allocation3 + $0x6a] sm:$0xff] }
 0x3cb   : > { %8046 = vmatmul.mubr.msk.f32.gmra.mrb[22].mxu1 %vm225_vm1, %v10263_v34  ;;  %v10713_v34 = vld [vmem:[#allocation3 + $0x7a] sm:$0xff] }
 0x3cc   : > { %8048 = vmatprep.mubr.msk.f32.mxu1 %vm225_vm1, %v10272_v40  ;;  %v10729_v40 = vld [vmem:[#allocation3 + $0xaa] sm:$0xff] }
 0x3cf   : > { %8049 = vmatmul.mubr.msk.f32.gmra.mrb[24].mxu1 %vm225_vm1, %v10274_v41  ;;  %v10733_v41 = vld [vmem:[#allocation3 + $0xb2] sm:$0xff] }
 0x3d0   : > { %8051 = vmatprep.mubr.msk.f32.mxu1 %vm225_vm1, %v10281_v27  ;;  %v10737_v27 = vld [vmem:[#allocation3 + $0xc2] sm:$0xff] }
 0x3d3   : > { %8052 = vmatmul.mubr.msk.f32.gmra.mrb[26].mxu1 %vm225_vm1, %v10283_v42  ;;  %v10741_v42 = vld [vmem:[#allocation3 + $0xca] sm:$0xff] }
 0x3d4   : > { %8054 = vmatprep.mubr.msk.f32.mxu1 %vm225_vm1, %v3301_v26  ;;  %v10749_v26 = vld [vmem:[#allocation3 + $0xe2] sm:$0xff] }
 0x3d7   : > { %8055 = vmatmul.mubr.msk.f32.gmra.mrb[28].mxu1 %vm225_vm1, %v3302_v49  ;;  %v10753_v49 = vld [vmem:[#allocation3 + $0xf2] sm:$0xff] }
 0x3d8   : > { %8057 = vmatprep.mubr.msk.f32.mxu1 %vm225_vm1, %v3303_v57  ;;  %v10761_v57 = vld [vmem:[#allocation3 + $0x10a] sm:$0xff] }
 0x3db   : > { %8058 = vmatmul.mubr.msk.f32.gmra.mrb[30].mxu1 %vm225_vm1, %v3304_v58  ;;  %v10765_v58 = vld [vmem:[#allocation3 + $0x112] sm:$0xff] }
 0x3dc   : > { %8062 = vmatprep.mubr.msk.f32.mxu1 %vm225_vm1, %v4198_v1  ;;  %v10769_v1 = vld [vmem:[#allocation3 + $0x122] sm:$0xff] }
 0x3df   : > { %8063 = vmatmul.mubr.msk.f32.vlgmr.msra.gmra.mrb[0].mxu1 %vm225_vm1, %v4199_v2  ;;  %v10773_v2 = vld [vmem:[#allocation3 + $0x12a] sm:$0xff] }
 0x3e0   : > { %8111 = vmatpush3.msk.msra.mxu1 %vm486_vm0, %v6692_v50  ;;  %8065 = vmatprep.mubr.msk.f32.mxu1 %vm225_vm1, %v4200_v10  ;;  %v10757_v50 = vld [vmem:[#allocation3 + $0xfa] sm:$0xff] }
 0x3e1   : > { %8160 = vmatprep.subr.msk.mxu1 %vm486_vm0, %v10426_v9 }
 0x3e3   : > { %8066 = vmatmul.mubr.msk.f32.gmra.mrb[2].mxu1 %vm225_vm1, %v4201_v17 }
 0x3e4   : > { %8068 = vmatprep.mubr.msk.f32.mxu1 %vm225_vm1, %v10434_v18 }
 0x3e7   : > { %8069 = vmatmul.mubr.msk.f32.gmra.mrb[4].mxu1 %vm225_vm1, %v10438_v25 }
 0x3e8   : > { %8071 = vmatprep.mubr.msk.f32.mxu1 %vm225_vm1, %v10442_v28 }
 0x3eb   : > { %8072 = vmatmul.mubr.msk.f32.gmra.mrb[6].mxu1 %vm225_vm1, %v10446_v35 }
 0x3ec   : > { %8074 = vmatprep.mubr.msk.f32.mxu1 %vm225_vm1, %v10450_v36 }
 0x3ef   : > { %8075 = vmatmul.mubr.msk.f32.gmra.mrb[8].mxu1 %vm225_vm1, %v10454_v43 }
 0x3f0   : > { %8077 = vmatprep.mubr.msk.f32.mxu1 %vm225_vm1, %v10458_v44 }
 0x3f3   : > { %8078 = vmatmul.mubr.msk.f32.gmra.mrb[10].mxu1 %vm225_vm1, %v10462_v46 }
 0x3f4   : > { %8080 = vmatprep.mubr.msk.f32.mxu1 %vm225_vm1, %v10466_v47 }
 0x3f7   : > { %8081 = vmatmul.mubr.msk.f32.gmra.mrb[12].mxu1 %vm225_vm1, %v10470_v48 }
 0x3f8   : > { %8083 = vmatprep.mubr.msk.f32.mxu1 %vm225_vm1, %v10474_v51 }
 0x3fb   : > { %8084 = vmatmul.mubr.msk.f32.gmra.mrb[14].mxu1 %vm225_vm1, %v10478_v52 }
 0x3fc   : > { %8086 = vmatprep.mubr.msk.f32.mxu1 %vm225_vm1, %v10482_v53 }
 0x3ff   : > { %8087 = vmatmul.mubr.msk.f32.gmra.mrb[16].mxu1 %vm225_vm1, %v10486_v54 }
 0x400   : > { %8089 = vmatprep.mubr.msk.f32.mxu1 %vm225_vm1, %v10490_v55 }
 0x403   : > { %8090 = vmatmul.mubr.msk.f32.gmra.mrb[18].mxu1 %vm225_vm1, %v10494_v56 }
 0x404   : > { %8092 = vmatprep.mubr.msk.f32.mxu1 %vm225_vm1, %v10498_v59 }
 0x407   : > { %8093 = vmatmul.mubr.msk.f32.gmra.mrb[20].mxu1 %vm225_vm1, %v10502_v60 }
 0x408   : > { %8095 = vmatprep.mubr.msk.f32.mxu1 %vm225_vm1, %v10506_v61 }
 0x40b   : > { %8096 = vmatmul.mubr.msk.f32.gmra.mrb[22].mxu1 %vm225_vm1, %v10510_v62 }
 0x40c   : > { %8098 = vmatprep.mubr.msk.f32.mxu1 %vm225_vm1, %v10514_v63 }
 0x40f   : > { %8099 = vmatmul.mubr.msk.f32.gmra.mrb[24].mxu1 %vm225_vm1, %v10518_v0 }
 0x410   : > { %8101 = vmatprep.mubr.msk.f32.mxu1 %vm225_vm1, %v10522_v3 }
 0x413   : > { %8102 = vmatmul.mubr.msk.f32.gmra.mrb[26].mxu1 %vm225_vm1, %v10526_v4 }
 0x414   : > { %8104 = vmatprep.mubr.msk.f32.mxu1 %vm225_vm1, %v10530_v5 }
 0x417   : > { %8105 = vmatmul.mubr.msk.f32.gmra.mrb[28].mxu1 %vm225_vm1, %v10534_v6 }
 0x418   : > { %8107 = vmatprep.mubr.msk.f32.mxu1 %vm225_vm1, %v10538_v7 }
 0x41b   : > { %8108 = vmatmul.mubr.msk.f32.gmra.mrb[30].mxu1 %vm225_vm1, %v10542_v8 }
 0x41c   : > { %8112 = vmatprep.mubr.msk.f32.mxu1 %vm225_vm1, %v4200_v10  ;;  %v10781_v10 = vld [vmem:[#allocation3 + $0x142] sm:$0xff] }
 0x41f   : > { %8113 = vmatmul.mubr.msk.f32.vlgmr.msra.gmra.mrb[0].mxu1 %vm225_vm1, %v4201_v17  ;;  %v10785_v17 = vld [vmem:[#allocation3 + $0x152] sm:$0xff] }
 0x420   : > { %8161 = vmatpush3.msk.msra.mxu1 %vm486_vm0, %v10426_v9  ;;  %8115 = vmatprep.mubr.msk.f32.mxu1 %vm225_vm1, %v10434_v18  ;;  %v10777_v9 = vld [vmem:[#allocation3 + $0x13a] sm:$0xff] }
 0x421   : > { %8210 = vmatprep.subr.msk.mxu1 %vm486_vm0, %v6760_v11 }
 0x423   : > { %8116 = vmatmul.mubr.msk.f32.gmra.mrb[2].mxu1 %vm225_vm1, %v10438_v25 }
 0x424   : > { %8118 = vmatprep.mubr.msk.f32.mxu1 %vm225_vm1, %v10442_v28 }
 0x427   : > { %8119 = vmatmul.mubr.msk.f32.gmra.mrb[4].mxu1 %vm225_vm1, %v10446_v35 }
 0x428   : > { %8121 = vmatprep.mubr.msk.f32.mxu1 %vm225_vm1, %v10450_v36 }
 0x42b   : > { %8122 = vmatmul.mubr.msk.f32.gmra.mrb[6].mxu1 %vm225_vm1, %v10454_v43 }
 0x42c   : > { %8124 = vmatprep.mubr.msk.f32.mxu1 %vm225_vm1, %v10458_v44 }
 0x42f   : > { %8125 = vmatmul.mubr.msk.f32.gmra.mrb[8].mxu1 %vm225_vm1, %v10462_v46 }
 0x430   : > { %8127 = vmatprep.mubr.msk.f32.mxu1 %vm225_vm1, %v10466_v47 }
 0x433   : > { %8128 = vmatmul.mubr.msk.f32.gmra.mrb[10].mxu1 %vm225_vm1, %v10470_v48 }
 0x434   : > { %8130 = vmatprep.mubr.msk.f32.mxu1 %vm225_vm1, %v10474_v51 }
 0x437   : > { %8131 = vmatmul.mubr.msk.f32.gmra.mrb[12].mxu1 %vm225_vm1, %v10478_v52 }
 0x438   : > { %8133 = vmatprep.mubr.msk.f32.mxu1 %vm225_vm1, %v10482_v53 }
 0x43b   : > { %8134 = vmatmul.mubr.msk.f32.gmra.mrb[14].mxu1 %vm225_vm1, %v10486_v54 }
 0x43c   : > { %8136 = vmatprep.mubr.msk.f32.mxu1 %vm225_vm1, %v10490_v55 }
 0x43f   : > { %8137 = vmatmul.mubr.msk.f32.gmra.mrb[16].mxu1 %vm225_vm1, %v10494_v56 }
 0x440   : > { %8139 = vmatprep.mubr.msk.f32.mxu1 %vm225_vm1, %v10498_v59 }
 0x443   : > { %8140 = vmatmul.mubr.msk.f32.gmra.mrb[18].mxu1 %vm225_vm1, %v10502_v60 }
 0x444   : > { %8142 = vmatprep.mubr.msk.f32.mxu1 %vm225_vm1, %v10506_v61 }
 0x447   : > { %8143 = vmatmul.mubr.msk.f32.gmra.mrb[20].mxu1 %vm225_vm1, %v10510_v62 }
 0x448   : > { %8145 = vmatprep.mubr.msk.f32.mxu1 %vm225_vm1, %v10514_v63 }
 0x44b   : > { %8146 = vmatmul.mubr.msk.f32.gmra.mrb[22].mxu1 %vm225_vm1, %v10518_v0 }
 0x44c   : > { %8148 = vmatprep.mubr.msk.f32.mxu1 %vm225_vm1, %v10522_v3 }
 0x44f   : > { %8149 = vmatmul.mubr.msk.f32.gmra.mrb[24].mxu1 %vm225_vm1, %v10526_v4 }
 0x450   : > { %8151 = vmatprep.mubr.msk.f32.mxu1 %vm225_vm1, %v10530_v5 }
 0x453   : > { %8152 = vmatmul.mubr.msk.f32.gmra.mrb[26].mxu1 %vm225_vm1, %v10534_v6 }
 0x454   : > { %8154 = vmatprep.mubr.msk.f32.mxu1 %vm225_vm1, %v10538_v7 }
 0x457   : > { %8155 = vmatmul.mubr.msk.f32.gmra.mrb[28].mxu1 %vm225_vm1, %v10542_v8 }
 0x458   : > { %8157 = vmatprep.mubr.msk.f32.mxu1 %vm225_vm1, %v4230_v12 }
 0x45b   : > { %8158 = vmatmul.mubr.msk.f32.gmra.mrb[30].mxu1 %vm225_vm1, %v4231_v13 }
 0x45c   : > { %8162 = vmatprep.mubr.msk.f32.mxu1 %vm225_vm1, %v10434_v18  ;;  %v10789_v18 = vld [vmem:[#allocation3 + $0x15a] sm:$0xff] }
 0x45f   : > { %8163 = vmatmul.mubr.msk.f32.vlgmr.msra.gmra.mrb[0].mxu1 %vm225_vm1, %v10438_v25  ;;  %v10793_v25 = vld [vmem:[#allocation3 + $0x16a] sm:$0xff] }
 0x460   : > { %8211 = vmatpush3.msk.msra.mxu1 %vm486_vm0, %v6760_v11  ;;  %8165 = vmatprep.mubr.msk.f32.mxu1 %vm225_vm1, %v10442_v28  ;;  %v10797_v28 = vld [vmem:[#allocation3 + $0x172] sm:$0xff] }
 0x461   : > { %8260 = vmatprep.subr.msk.mxu1 %vm486_vm0, %v6794_v14 }
 0x463   : > { %8166 = vmatmul.mubr.msk.f32.gmra.mrb[2].mxu1 %vm225_vm1, %v10446_v35  ;;  %v5160_v35 = vld [vmem:[#allocation3 + $0x182] sm:$0xff] }
 0x464   : > { %8168 = vmatprep.mubr.msk.f32.mxu1 %vm225_vm1, %v10450_v36  ;;  %v5161_v36 = vld [vmem:[#allocation3 + $0x18a] sm:$0xff] }
 0x467   : > { %8169 = vmatmul.mubr.msk.f32.gmra.mrb[4].mxu1 %vm225_vm1, %v10454_v43  ;;  %v5162_v43 = vld [vmem:[#allocation3 + $0x19a] sm:$0xff] }
 0x468   : > { %8171 = vmatprep.mubr.msk.f32.mxu1 %vm225_vm1, %v10458_v44  ;;  %v5163_v44 = vld [vmem:[#allocation3 + $0x1a2] sm:$0xff] }
 0x46b   : > { %8172 = vmatmul.mubr.msk.f32.gmra.mrb[6].mxu1 %vm225_vm1, %v10462_v46  ;;  %v10926_v46 = vld [vmem:[%s11070_s4] ss:$0 sm:$0xff] }
 0x46c   : > { %8174 = vmatprep.mubr.msk.f32.mxu1 %vm225_vm1, %v10466_v47 }
 0x46f   : > { %8175 = vmatmul.mubr.msk.f32.gmra.mrb[8].mxu1 %vm225_vm1, %v10470_v48  ;;  %v6059_v48 = vld [vmem:[%s9242_s28 + $0x8] sm:$0xff] }
 0x470   : > { %8177 = vmatprep.mubr.msk.f32.mxu1 %vm225_vm1, %v10474_v51 }
 0x473   : > { %8178 = vmatmul.mubr.msk.f32.gmra.mrb[10].mxu1 %vm225_vm1, %v10478_v52 }
 0x474   : > { %8180 = vmatprep.mubr.msk.f32.mxu1 %vm225_vm1, %v10482_v53  ;;  %v6058_v53 = vld [vmem:[%s9242_s28] sm:$0xff] }
 0x477   : > { %8181 = vmatmul.mubr.msk.f32.gmra.mrb[12].mxu1 %vm225_vm1, %v10486_v54 }
 0x478   : > { %8183 = vmatprep.mubr.msk.f32.mxu1 %vm225_vm1, %v10490_v55 }
 0x47b   : > { %8184 = vmatmul.mubr.msk.f32.gmra.mrb[14].mxu1 %vm225_vm1, %v10494_v56 }
 0x47c   : > { %8186 = vmatprep.mubr.msk.f32.mxu1 %vm225_vm1, %v10498_v59 }
 0x47f   : > { %8187 = vmatmul.mubr.msk.f32.gmra.mrb[16].mxu1 %vm225_vm1, %v10502_v60  ;;  %v6061_v60 = vld [vmem:[%s9242_s28 + $0x18] sm:$0xff] }
 0x480   : > { %8189 = vmatprep.mubr.msk.f32.mxu1 %vm225_vm1, %v10506_v61 }
 0x483   : > { %8190 = vmatmul.mubr.msk.f32.gmra.mrb[18].mxu1 %vm225_vm1, %v10510_v62 }
 0x484   : > { %8192 = vmatprep.mubr.msk.f32.mxu1 %vm225_vm1, %v10514_v63 }
 0x487   : > { %8193 = vmatmul.mubr.msk.f32.gmra.mrb[20].mxu1 %vm225_vm1, %v10518_v0  ;;  %v6060_v0 = vld [vmem:[%s9242_s28 + $0x10] sm:$0xff] }
 0x488   : > { %8195 = vmatprep.mubr.msk.f32.mxu1 %vm225_vm1, %v10522_v3 }
 0x48b   : > { %8196 = vmatmul.mubr.msk.f32.gmra.mrb[22].mxu1 %vm225_vm1, %v10526_v4 }
 0x48c   : > { %8198 = vmatprep.mubr.msk.f32.mxu1 %vm225_vm1, %v10530_v5 }
 0x48f   : > { %8199 = vmatmul.mubr.msk.f32.gmra.mrb[24].mxu1 %vm225_vm1, %v10534_v6 }
 0x490   : > { %8201 = vmatprep.mubr.msk.f32.mxu1 %vm225_vm1, %v10538_v7 }
 0x493   : > { %8202 = vmatmul.mubr.msk.f32.gmra.mrb[26].mxu1 %vm225_vm1, %v10542_v8  ;;  %v6063_v8 = vld [vmem:[%s9242_s28 + $0x28] sm:$0xff] }
 0x494   : > { %8204 = vmatprep.mubr.msk.f32.mxu1 %vm225_vm1, %v4230_v12 }
 0x497   : > { %8205 = vmatmul.mubr.msk.f32.gmra.mrb[28].mxu1 %vm225_vm1, %v4231_v13 }
 0x498   : > { %8207 = vmatprep.mubr.msk.f32.mxu1 %vm225_vm1, %v4232_v15 }
 0x49b   : > { %8208 = vmatmul.mubr.msk.f32.gmra.mrb[30].mxu1 %vm225_vm1, %v4233_v16 }
 0x49c   : > { %8212 = vmatprep.mubr.msk.f32.mxu1 %vm225_vm1, %v5128_v19 }
 0x49f   : > { %8213 = vmatmul.mubr.msk.f32.vlgmr.msra.gmra.mrb[0].mxu1 %vm225_vm1, %v5129_v20 }
 0x4a0   : > { %8261 = vmatpush3.msk.msra.mxu1 %vm486_vm0, %v6794_v14  ;;  %8215 = vmatprep.mubr.msk.f32.mxu1 %vm225_vm1, %v5130_v22  ;;  %v6062_v14 = vld [vmem:[%s9242_s28 + $0x20] sm:$0xff] }
 0x4a1   : > { %8310 = vmatprep.subr.msk.mxu1 %vm486_vm0, %v10681_v21 }
 0x4a3   : > { %8216 = vmatmul.mubr.msk.f32.gmra.mrb[2].mxu1 %vm225_vm1, %v5131_v23 }
 0x4a4   : > { %8218 = vmatprep.mubr.msk.f32.mxu1 %vm225_vm1, %v10689_v24 }
 0x4a7   : > { %8219 = vmatmul.mubr.msk.f32.gmra.mrb[4].mxu1 %vm225_vm1, %v10693_v29 }
 0x4a8   : > { %8221 = vmatprep.mubr.msk.f32.mxu1 %vm225_vm1, %v10697_v30 }
 0x4ab   : > { %8222 = vmatmul.mubr.msk.f32.gmra.mrb[6].mxu1 %vm225_vm1, %v10701_v31 }
 0x4ac   : > { %8224 = vmatprep.mubr.msk.f32.mxu1 %vm225_vm1, %v10705_v32 }
 0x4af   : > { %8225 = vmatmul.mubr.msk.f32.gmra.mrb[8].mxu1 %vm225_vm1, %v10709_v33 }
 0x4b0   : > { %8227 = vmatprep.mubr.msk.f32.mxu1 %vm225_vm1, %v10713_v34 }
 0x4b3   : > { %8228 = vmatmul.mubr.msk.f32.gmra.mrb[10].mxu1 %vm225_vm1, %v10717_v37 }
 0x4b4   : > { %8230 = vmatprep.mubr.msk.f32.mxu1 %vm225_vm1, %v10721_v38 }
 0x4b7   : > { %8231 = vmatmul.mubr.msk.f32.gmra.mrb[12].mxu1 %vm225_vm1, %v10725_v39 }
 0x4b8   : > { %8233 = vmatprep.mubr.msk.f32.mxu1 %vm225_vm1, %v10729_v40 }
 0x4bb   : > { %8234 = vmatmul.mubr.msk.f32.gmra.mrb[14].mxu1 %vm225_vm1, %v10733_v41 }
 0x4bc   : > { %8236 = vmatprep.mubr.msk.f32.mxu1 %vm225_vm1, %v10737_v27 }
 0x4bf   : > { %8237 = vmatmul.mubr.msk.f32.gmra.mrb[16].mxu1 %vm225_vm1, %v10741_v42 }
 0x4c0   : > { %8239 = vmatprep.mubr.msk.f32.mxu1 %vm225_vm1, %v10745_v45 }
 0x4c3   : > { %8240 = vmatmul.mubr.msk.f32.gmra.mrb[18].mxu1 %vm225_vm1, %v10749_v26 }
 0x4c4   : > { %8242 = vmatprep.mubr.msk.f32.mxu1 %vm225_vm1, %v10753_v49 }
 0x4c7   : > { %8243 = vmatmul.mubr.msk.f32.gmra.mrb[20].mxu1 %vm225_vm1, %v10757_v50 }
 0x4c8   : > { %8245 = vmatprep.mubr.msk.f32.mxu1 %vm225_vm1, %v10761_v57 }
 0x4cb   : > { %8246 = vmatmul.mubr.msk.f32.gmra.mrb[22].mxu1 %vm225_vm1, %v10765_v58 }
 0x4cc   : > { %8248 = vmatprep.mubr.msk.f32.mxu1 %vm225_vm1, %v10769_v1 }
 0x4cf   : > { %8249 = vmatmul.mubr.msk.f32.gmra.mrb[24].mxu1 %vm225_vm1, %v10773_v2 }
 0x4d0   : > { %8251 = vmatprep.mubr.msk.f32.mxu1 %vm225_vm1, %v10777_v9 }
 0x4d3   : > { %8252 = vmatmul.mubr.msk.f32.gmra.mrb[26].mxu1 %vm225_vm1, %v10781_v10 }
 0x4d4   : > { %8254 = vmatprep.mubr.msk.f32.mxu1 %vm225_vm1, %v10785_v17 }
 0x4d7   : > { %8255 = vmatmul.mubr.msk.f32.gmra.mrb[28].mxu1 %vm225_vm1, %v10789_v18 }
 0x4d8   : > { %8257 = vmatprep.mubr.msk.f32.mxu1 %vm225_vm1, %v10793_v25 }
 0x4db   : > { %8258 = vmatmul.mubr.msk.f32.gmra.mrb[30].mxu1 %vm225_vm1, %v10797_v28 }
 0x4dc   : > { %8262 = vmatprep.mubr.msk.f32.mxu1 %vm225_vm1, %v5130_v22  ;;  %v6065_v22 = vld [vmem:[%s9242_s28 + $0x38] sm:$0xff] }
 0x4df   : > { %8263 = vmatmul.mubr.msk.f32.vlgmr.msra.gmra.mrb[0].mxu1 %vm225_vm1, %v5131_v23 }
 0x4e0   : > { %8311 = vmatpush3.msk.msra.mxu1 %vm486_vm0, %v10681_v21  ;;  %8265 = vmatprep.mubr.msk.f32.mxu1 %vm225_vm1, %v10689_v24 }
 0x4e3   : > { %8266 = vmatmul.mubr.msk.f32.gmra.mrb[2].mxu1 %vm225_vm1, %v10693_v29 }
 0x4e4   : > { %8268 = vmatprep.mubr.msk.f32.mxu1 %vm225_vm1, %v10697_v30 }
 0x4e7   : > { %8269 = vmatmul.mubr.msk.f32.gmra.mrb[4].mxu1 %vm225_vm1, %v10701_v31 }
 0x4e8   : > { %8271 = vmatprep.mubr.msk.f32.mxu1 %vm225_vm1, %v10705_v32 }
 0x4eb   : > { %8272 = vmatmul.mubr.msk.f32.gmra.mrb[6].mxu1 %vm225_vm1, %v10709_v33 }
 0x4ec   : > { %8274 = vmatprep.mubr.msk.f32.mxu1 %vm225_vm1, %v10713_v34 }
 0x4ef   : > { %8275 = vmatmul.mubr.msk.f32.gmra.mrb[8].mxu1 %vm225_vm1, %v10717_v37 }
 0x4f0   : > { %8277 = vmatprep.mubr.msk.f32.mxu1 %vm225_vm1, %v10721_v38 }
 0x4f3   : > { %8278 = vmatmul.mubr.msk.f32.gmra.mrb[10].mxu1 %vm225_vm1, %v10725_v39 }
 0x4f4   : > { %8280 = vmatprep.mubr.msk.f32.mxu1 %vm225_vm1, %v10729_v40 }
 0x4f7   : > { %8281 = vmatmul.mubr.msk.f32.gmra.mrb[12].mxu1 %vm225_vm1, %v10733_v41 }
 0x4f8   : > { %8283 = vmatprep.mubr.msk.f32.mxu1 %vm225_vm1, %v10737_v27 }
 0x4fb   : > { %8284 = vmatmul.mubr.msk.f32.gmra.mrb[14].mxu1 %vm225_vm1, %v10741_v42 }
 0x4fc   : > { %8286 = vmatprep.mubr.msk.f32.mxu1 %vm225_vm1, %v10745_v45 }
 0x4ff   : > { %8287 = vmatmul.mubr.msk.f32.gmra.mrb[16].mxu1 %vm225_vm1, %v10749_v26 }
 0x500   : > { %8289 = vmatprep.mubr.msk.f32.mxu1 %vm225_vm1, %v10753_v49 }
 0x503   : > { %8290 = vmatmul.mubr.msk.f32.gmra.mrb[18].mxu1 %vm225_vm1, %v10757_v50 }
 0x504   : > { %8292 = vmatprep.mubr.msk.f32.mxu1 %vm225_vm1, %v10761_v57 }
 0x507   : > { %8293 = vmatmul.mubr.msk.f32.gmra.mrb[20].mxu1 %vm225_vm1, %v10765_v58 }
 0x508   : > { %8295 = vmatprep.mubr.msk.f32.mxu1 %vm225_vm1, %v10769_v1 }
 0x50b   : > { %8296 = vmatmul.mubr.msk.f32.gmra.mrb[22].mxu1 %vm225_vm1, %v10773_v2 }
 0x50c   : > { %8298 = vmatprep.mubr.msk.f32.mxu1 %vm225_vm1, %v10777_v9 }
 0x50f   : > { %8299 = vmatmul.mubr.msk.f32.gmra.mrb[24].mxu1 %vm225_vm1, %v10781_v10 }
 0x510   : > { %8301 = vmatprep.mubr.msk.f32.mxu1 %vm225_vm1, %v10785_v17 }
 0x513   : > { %8302 = vmatmul.mubr.msk.f32.gmra.mrb[26].mxu1 %vm225_vm1, %v10789_v18 }
 0x514   : > { %8304 = vmatprep.mubr.msk.f32.mxu1 %vm225_vm1, %v10793_v25 }
 0x517   : > { %8305 = vmatmul.mubr.msk.f32.gmra.mrb[28].mxu1 %vm225_vm1, %v10797_v28 }
 0x518   : > { %8307 = vmatprep.mubr.msk.f32.mxu1 %vm225_vm1, %v5160_v35 }
 0x51b   : > { %8308 = vmatmul.mubr.msk.f32.gmra.mrb[30].mxu1 %vm225_vm1, %v5161_v36 }
 0x51c   : > { %8312 = vmatprep.mubr.msk.f32.mxu1 %vm225_vm1, %v10689_v24 }
 0x51f   : > { %8313 = vmatmul.mubr.msk.f32.vlgmr.msra.gmra.mrb[0].mxu1 %vm225_vm1, %v10693_v29 }
 0x520   : > { %8315 = vmatprep.mubr.msk.f32.mxu1 %vm225_vm1, %v10697_v30  ;;  %v6064_v30 = vld [vmem:[%s9242_s28 + $0x30] sm:$0xff] }
 0x523   : > { %8316 = vmatmul.mubr.msk.f32.gmra.mrb[2].mxu1 %vm225_vm1, %v10701_v31 }
 0x524   : > { %8318 = vmatprep.mubr.msk.f32.mxu1 %vm225_vm1, %v10705_v32 }
 0x527   : > { %8319 = vmatmul.mubr.msk.f32.gmra.mrb[4].mxu1 %vm225_vm1, %v10709_v33 }
 0x528   : > { %8321 = vmatprep.mubr.msk.f32.mxu1 %vm225_vm1, %v10713_v34 }
 0x52b   : > { %8322 = vmatmul.mubr.msk.f32.gmra.mrb[6].mxu1 %vm225_vm1, %v10717_v37 }
 0x52c   : > { %8324 = vmatprep.mubr.msk.f32.mxu1 %vm225_vm1, %v10721_v38  ;;  %v6067_v38 = vld [vmem:[%s9242_s28 + $0x48] sm:$0xff] }
 0x52f   : > { %8325 = vmatmul.mubr.msk.f32.gmra.mrb[8].mxu1 %vm225_vm1, %v10725_v39 }
 0x530   : > { %8327 = vmatprep.mubr.msk.f32.mxu1 %vm225_vm1, %v10729_v40 }
 0x533   : > { %8328 = vmatmul.mubr.msk.f32.gmra.mrb[10].mxu1 %vm225_vm1, %v10733_v41 }
 0x534   : > { %8330 = vmatprep.mubr.msk.f32.mxu1 %vm225_vm1, %v10737_v27  ;;  %v6066_v27 = vld [vmem:[%s9242_s28 + $0x40] sm:$0xff] }
 0x537   : > { %8331 = vmatmul.mubr.msk.f32.gmra.mrb[12].mxu1 %vm225_vm1, %v10741_v42 }
 0x538   : > { %8333 = vmatprep.mubr.msk.f32.mxu1 %vm225_vm1, %v10745_v45 }
 0x53b   : > { %8334 = vmatmul.mubr.msk.f32.gmra.mrb[14].mxu1 %vm225_vm1, %v10749_v26 }
 0x53c   : > { %8336 = vmatprep.mubr.msk.f32.mxu1 %vm225_vm1, %v10753_v49 }
 0x53f   : > { %8337 = vmatmul.mubr.msk.f32.gmra.mrb[16].mxu1 %vm225_vm1, %v10757_v50 }
 0x540   : > { %8339 = vmatprep.mubr.msk.f32.mxu1 %vm225_vm1, %v10761_v57  ;;  %v6069_v57 = vld [vmem:[%s9242_s28 + $0x58] sm:$0xff] }
 0x543   : > { %8340 = vmatmul.mubr.msk.f32.gmra.mrb[18].mxu1 %vm225_vm1, %v10765_v58 }
 0x544   : > { %8342 = vmatprep.mubr.msk.f32.mxu1 %vm225_vm1, %v10769_v1 }
 0x547   : > { %8343 = vmatmul.mubr.msk.f32.gmra.mrb[20].mxu1 %vm225_vm1, %v10773_v2 }
 0x548   : > { %8345 = vmatprep.mubr.msk.f32.mxu1 %vm225_vm1, %v10777_v9  ;;  %v6068_v9 = vld [vmem:[%s9242_s28 + $0x50] sm:$0xff] }
 0x54b   : > { %8346 = vmatmul.mubr.msk.f32.gmra.mrb[22].mxu1 %vm225_vm1, %v10781_v10 }
 0x54c   : > { %8348 = vmatprep.mubr.msk.f32.mxu1 %vm225_vm1, %v10785_v17 }
 0x54f   : > { %8349 = vmatmul.mubr.msk.f32.gmra.mrb[24].mxu1 %vm225_vm1, %v10789_v18 }
 0x550   : > { %8351 = vmatprep.mubr.msk.f32.mxu1 %vm225_vm1, %v10793_v25 }
 0x553   : > { %8352 = vmatmul.mubr.msk.f32.gmra.mrb[26].mxu1 %vm225_vm1, %v10797_v28 }
 0x554   : > { %8354 = vmatprep.mubr.msk.f32.mxu1 %vm225_vm1, %v5160_v35  ;;  %v6071_v35 = vld [vmem:[%s9242_s28 + $0x68] sm:$0xff] }
 0x557   : > { %8355 = vmatmul.mubr.msk.f32.gmra.mrb[28].mxu1 %vm225_vm1, %v5161_v36 }
 0x558   : > { %8357 = vmatprep.mubr.msk.f32.mxu1 %vm225_vm1, %v5162_v43 }
 0x55b   : > { %8358 = vmatmul.mubr.msk.f32.gmra.mrb[30].mxu1 %vm225_vm1, %v5163_v44 }
 0x5f2   : > { %v8314_v47 = vpop.f32.mrb[0].mxu1 }
 0x5f3   : > { %v8392_v51 = vadd.f32 %v8314_v47, %v10926_v46  ;;  %v5867_v52 = vpop.f32.mrb[1].mxu1  ;;  %v6070_v47 = vld [vmem:[%s9242_s28 + $0x60] sm:$0xff] }
 0x5f4   : > { %v8393_v54 = vadd.f32 %v10926_v46, %v5867_v52 }
 0x5f5   : > { %v6091_v55 = vadd.f32 %v8392_v51, %v6059_v48 }
 0x5f6   : > { %v6090_v56 = vadd.f32 %v8393_v54, %v6058_v53  ;;  %v8317_v59 = vpop.f32.mrb[2].mxu1 }
 0x5f7   : > { %v6123_v61 = vmax.f32 %v6091_v55, 0.0  ;;  %v8394_v62 = vadd.f32 %v8317_v59, %v10926_v46  ;;  %v5877_v63 = vpop.f32.mrb[3].mxu1  ;;  %v6073_v55 = vld [vmem:[%s9242_s28 + $0x78] sm:$0xff] }
 0x5f8   : > { %v6122_v3 = vmax.f32 %v6090_v56, 0.0  ;;  %v8395_v4 = vadd.f32 %v10926_v46, %v5877_v63 }
 0x5f9   : > { %6155 = vst.msk [vmem:[%s10937_s23 + $0x8] sm:$0xff] %vm225_vm1, %v6123_v61  ;;  %v6093_v5 = vadd.f32 %v8394_v62, %v6061_v60  ;;  %v6072_v61 = vld [vmem:[%s9242_s28 + $0x70] sm:$0xff] }
 0x5fa   : > { %6154 = vst.msk [vmem:[%s10937_s23] sm:$0xff] %vm225_vm1, %v6122_v3  ;;  %v6092_v6 = vadd.f32 %v8395_v4, %v6060_v0  ;;  %v8320_v7 = vpop.f32.mrb[4].mxu1 }
 0x5fb   : > { %v6125_v11 = vmax.f32 %v6093_v5, 0.0  ;;  %v8396_v12 = vadd.f32 %v8320_v7, %v10926_v46  ;;  %v5887_v13 = vpop.f32.mrb[5].mxu1  ;;  %v6075_v5 = vld [vmem:[%s9242_s28 + $0x88] sm:$0xff] }
 0x5fc   : > { %v6124_v15 = vmax.f32 %v6092_v6, 0.0  ;;  %v8397_v16 = vadd.f32 %v10926_v46, %v5887_v13 }
 0x5fd   : > { %6157 = vst.msk [vmem:[%s10937_s23 + $0x18] sm:$0xff] %vm225_vm1, %v6125_v11  ;;  %v6095_v19 = vadd.f32 %v8396_v12, %v6063_v8  ;;  %v6074_v11 = vld [vmem:[%s9242_s28 + $0x80] sm:$0xff] }
 0x5fe   : > { %6156 = vst.msk [vmem:[%s10937_s23 + $0x10] sm:$0xff] %vm225_vm1, %v6124_v15  ;;  %v6094_v20 = vadd.f32 %v8397_v16, %v6062_v14  ;;  %v8323_v21 = vpop.f32.mrb[6].mxu1 }
 0x5ff   : > { %v6127_v23 = vmax.f32 %v6095_v19, 0.0  ;;  %v8398_v24 = vadd.f32 %v8323_v21, %v10926_v46  ;;  %v5897_v29 = vpop.f32.mrb[7].mxu1  ;;  %v6077_v19 = vld [vmem:[%s9242_s28 + $0x98] sm:$0xff] }
 0x600   : > { %v6126_v31 = vmax.f32 %v6094_v20, 0.0  ;;  %v8399_v32 = vadd.f32 %v10926_v46, %v5897_v29 }
 0x601   : > { %6159 = vst.msk [vmem:[%s10937_s23 + $0x28] sm:$0xff] %vm225_vm1, %v6127_v23  ;;  %v6097_v33 = vadd.f32 %v8398_v24, %v6065_v22  ;;  %v6076_v23 = vld [vmem:[%s9242_s28 + $0x90] sm:$0xff] }
 0x602   : > { %6158 = vst.msk [vmem:[%s10937_s23 + $0x20] sm:$0xff] %vm225_vm1, %v6126_v31  ;;  %v6096_v34 = vadd.f32 %v8399_v32, %v6064_v30  ;;  %v8326_v37 = vpop.f32.mrb[8].mxu1 }
 0x603   : > { %v6129_v39 = vmax.f32 %v6097_v33, 0.0  ;;  %v8400_v40 = vadd.f32 %v8326_v37, %v10926_v46  ;;  %v5907_v41 = vpop.f32.mrb[9].mxu1  ;;  %v6079_v33 = vld [vmem:[%s9242_s28 + $0xa8] sm:$0xff] }
 0x604   : > { %v6128_v42 = vmax.f32 %v6096_v34, 0.0  ;;  %v8401_v45 = vadd.f32 %v10926_v46, %v5907_v41 }
 0x605   : > { %6161 = vst.msk [vmem:[%s10937_s23 + $0x38] sm:$0xff] %vm225_vm1, %v6129_v39  ;;  %v6099_v26 = vadd.f32 %v8400_v40, %v6067_v38  ;;  %v6078_v39 = vld [vmem:[%s9242_s28 + $0xa0] sm:$0xff] }
 0x606   : > { %6160 = vst.msk [vmem:[%s10937_s23 + $0x30] sm:$0xff] %vm225_vm1, %v6128_v42  ;;  %v6098_v49 = vadd.f32 %v8401_v45, %v6066_v27  ;;  %v8329_v50 = vpop.f32.mrb[10].mxu1 }
 0x607   : > { %v6131_v58 = vmax.f32 %v6099_v26, 0.0  ;;  %v8402_v1 = vadd.f32 %v8329_v50, %v10926_v46  ;;  %v5917_v2 = vpop.f32.mrb[11].mxu1  ;;  %v6081_v26 = vld [vmem:[%s9242_s28 + $0xb8] sm:$0xff] }
 0x608   : > { %v6130_v10 = vmax.f32 %v6098_v49, 0.0  ;;  %v8403_v17 = vadd.f32 %v10926_v46, %v5917_v2 }
 0x609   : > { %6163 = vst.msk [vmem:[%s10937_s23 + $0x48] sm:$0xff] %vm225_vm1, %v6131_v58  ;;  %v6101_v18 = vadd.f32 %v8402_v1, %v6069_v57  ;;  %v6080_v58 = vld [vmem:[%s9242_s28 + $0xb0] sm:$0xff] }
 0x60a   : > { %6162 = vst.msk [vmem:[%s10937_s23 + $0x40] sm:$0xff] %vm225_vm1, %v6130_v10  ;;  %v6100_v25 = vadd.f32 %v8403_v17, %v6068_v9  ;;  %v8332_v28 = vpop.f32.mrb[12].mxu1 }
 0x60b   : > { %v6133_v36 = vmax.f32 %v6101_v18, 0.0  ;;  %v8404_v43 = vadd.f32 %v8332_v28, %v10926_v46  ;;  %v5927_v44 = vpop.f32.mrb[13].mxu1  ;;  %v6083_v18 = vld [vmem:[%s9242_s28 + $0xc8] sm:$0xff] }
 0x60c   : > { %v6132_v48 = vmax.f32 %v6100_v25, 0.0  ;;  %v8405_v51 = vadd.f32 %v10926_v46, %v5927_v44 }
 0x60d   : > { %6165 = vst.msk [vmem:[%s10937_s23 + $0x58] sm:$0xff] %vm225_vm1, %v6133_v36  ;;  %v6103_v52 = vadd.f32 %v8404_v43, %v6071_v35  ;;  %v6082_v36 = vld [vmem:[%s9242_s28 + $0xc0] sm:$0xff] }
 0x60e   : > { %6164 = vst.msk [vmem:[%s10937_s23 + $0x50] sm:$0xff] %vm225_vm1, %v6132_v48  ;;  %v6102_v53 = vadd.f32 %v8405_v51, %v6070_v47  ;;  %v8335_v54 = vpop.f32.mrb[14].mxu1 }
 0x60f   : > { %v6135_v56 = vmax.f32 %v6103_v52, 0.0  ;;  %v8406_v59 = vadd.f32 %v8335_v54, %v10926_v46  ;;  %v5937_v60 = vpop.f32.mrb[15].mxu1  ;;  %v6085_v52 = vld [vmem:[%s9242_s28 + $0xd8] sm:$0xff] }
 0x610   : > { %v6134_v62 = vmax.f32 %v6102_v53, 0.0  ;;  %v8407_v63 = vadd.f32 %v10926_v46, %v5937_v60 }
 0x611   : > { %6167 = vst.msk [vmem:[%s10937_s23 + $0x68] sm:$0xff] %vm225_vm1, %v6135_v56  ;;  %v6105_v0 = vadd.f32 %v8406_v59, %v6073_v55  ;;  %v6084_v56 = vld [vmem:[%s9242_s28 + $0xd0] sm:$0xff] }
 0x612   : > { %6166 = vst.msk [vmem:[%s10937_s23 + $0x60] sm:$0xff] %vm225_vm1, %v6134_v62  ;;  %v6104_v3 = vadd.f32 %v8407_v63, %v6072_v61  ;;  %v8338_v4 = vpop.f32.mrb[16].mxu1 }
 0x613   : > { %v6137_v6 = vmax.f32 %v6105_v0, 0.0  ;;  %v8408_v7 = vadd.f32 %v8338_v4, %v10926_v46  ;;  %v5947_v8 = vpop.f32.mrb[17].mxu1  ;;  %v6087_v0 = vld [vmem:[%s9242_s28 + $0xe8] sm:$0xff] }
 0x614   : > { %v6136_v12 = vmax.f32 %v6104_v3, 0.0  ;;  %v8409_v13 = vadd.f32 %v10926_v46, %v5947_v8 }
 0x615   : > { %6169 = vst.msk [vmem:[%s10937_s23 + $0x78] sm:$0xff] %vm225_vm1, %v6137_v6  ;;  %v6107_v14 = vadd.f32 %v8408_v7, %v6075_v5  ;;  %v6086_v6 = vld [vmem:[%s9242_s28 + $0xe0] sm:$0xff] }
 0x616   : > { %6168 = vst.msk [vmem:[%s10937_s23 + $0x70] sm:$0xff] %vm225_vm1, %v6136_v12  ;;  %v6106_v15 = vadd.f32 %v8409_v13, %v6074_v11  ;;  %v8341_v16 = vpop.f32.mrb[18].mxu1 }
 0x617   : > { %v6139_v20 = vmax.f32 %v6107_v14, 0.0  ;;  %v8410_v21 = vadd.f32 %v8341_v16, %v10926_v46  ;;  %v5957_v22 = vpop.f32.mrb[19].mxu1  ;;  %v6089_v14 = vld [vmem:[%s9242_s28 + $0xf8] sm:$0xff] }
 0x618   : > { %v6138_v24 = vmax.f32 %v6106_v15, 0.0  ;;  %v8411_v29 = vadd.f32 %v10926_v46, %v5957_v22 }
 0x619   : > { %6171 = vst.msk [vmem:[%s10937_s23 + $0x88] sm:$0xff] %vm225_vm1, %v6139_v20  ;;  %v6109_v30 = vadd.f32 %v8410_v21, %v6077_v19  ;;  %v6088_v20 = vld [vmem:[%s9242_s28 + $0xf0] sm:$0xff] }
 0x61a   : > { %6170 = vst.msk [vmem:[%s10937_s23 + $0x80] sm:$0xff] %vm225_vm1, %v6138_v24  ;;  %v6108_v31 = vadd.f32 %v8411_v29, %v6076_v23  ;;  %v8344_v32 = vpop.f32.mrb[20].mxu1 }
 0x61b   : > { %v6141_v34 = vmax.f32 %v6109_v30, 0.0  ;;  %v8412_v37 = vadd.f32 %v8344_v32, %v10926_v46  ;;  %v5967_v38 = vpop.f32.mrb[21].mxu1 }
 0x61c   : > { %v6140_v40 = vmax.f32 %v6108_v31, 0.0  ;;  %v8413_v41 = vadd.f32 %v10926_v46, %v5967_v38 }
 0x61d   : > { %6173 = vst.msk [vmem:[%s10937_s23 + $0x98] sm:$0xff] %vm225_vm1, %v6141_v34  ;;  %v6111_v27 = vadd.f32 %v8412_v37, %v6079_v33 }
 0x61e   : > { %6172 = vst.msk [vmem:[%s10937_s23 + $0x90] sm:$0xff] %vm225_vm1, %v6140_v40  ;;  %v6110_v42 = vadd.f32 %v8413_v41, %v6078_v39  ;;  %v8347_v45 = vpop.f32.mrb[22].mxu1 }
 0x61f   : > { %v6143_v49 = vmax.f32 %v6111_v27, 0.0  ;;  %v8414_v50 = vadd.f32 %v8347_v45, %v10926_v46  ;;  %v5977_v57 = vpop.f32.mrb[23].mxu1 }
 0x620   : > { %v6142_v1 = vmax.f32 %v6110_v42, 0.0  ;;  %v8415_v2 = vadd.f32 %v10926_v46, %v5977_v57 }
 0x621   : > { %6175 = vst.msk [vmem:[%s10937_s23 + $0xa8] sm:$0xff] %vm225_vm1, %v6143_v49  ;;  %v6113_v9 = vadd.f32 %v8414_v50, %v6081_v26 }
 0x622   : > { %6174 = vst.msk [vmem:[%s10937_s23 + $0xa0] sm:$0xff] %vm225_vm1, %v6142_v1  ;;  %v6112_v10 = vadd.f32 %v8415_v2, %v6080_v58  ;;  %v8350_v17 = vpop.f32.mrb[24].mxu1 }
 0x623   : > { %v6145_v25 = vmax.f32 %v6113_v9, 0.0  ;;  %v8416_v28 = vadd.f32 %v8350_v17, %v10926_v46  ;;  %v5987_v35 = vpop.f32.mrb[25].mxu1 }
 0x624   : > { %v6144_v43 = vmax.f32 %v6112_v10, 0.0  ;;  %v8417_v44 = vadd.f32 %v10926_v46, %v5987_v35 }
 0x625   : > { %6177 = vst.msk [vmem:[%s10937_s23 + $0xb8] sm:$0xff] %vm225_vm1, %v6145_v25  ;;  %v6115_v47 = vadd.f32 %v8416_v28, %v6083_v18 }
 0x626   : > { %6176 = vst.msk [vmem:[%s10937_s23 + $0xb0] sm:$0xff] %vm225_vm1, %v6144_v43  ;;  %v6114_v48 = vadd.f32 %v8417_v44, %v6082_v36  ;;  %v8353_v51 = vpop.f32.mrb[26].mxu1 }
 0x627   : > { %v6147_v53 = vmax.f32 %v6115_v47, 0.0  ;;  %v8418_v54 = vadd.f32 %v8353_v51, %v10926_v46  ;;  %v5997_v55 = vpop.f32.mrb[27].mxu1 }
 0x628   : > { %v6146_v59 = vmax.f32 %v6114_v48, 0.0  ;;  %v8419_v60 = vadd.f32 %v10926_v46, %v5997_v55 }
 0x629   : > { %6179 = vst.msk [vmem:[%s10937_s23 + $0xc8] sm:$0xff] %vm225_vm1, %v6147_v53  ;;  %v6117_v61 = vadd.f32 %v8418_v54, %v6085_v52 }
 0x62a   : > { %6178 = vst.msk [vmem:[%s10937_s23 + $0xc0] sm:$0xff] %vm225_vm1, %v6146_v59  ;;  %v6116_v62 = vadd.f32 %v8419_v60, %v6084_v56  ;;  %v8356_v63 = vpop.f32.mrb[28].mxu1 }
 0x62b   : > { %v6149_v3 = vmax.f32 %v6117_v61, 0.0  ;;  %v8420_v4 = vadd.f32 %v8356_v63, %v10926_v46  ;;  %v6007_v5 = vpop.f32.mrb[29].mxu1 }
 0x62c   : > { %v6148_v7 = vmax.f32 %v6116_v62, 0.0  ;;  %v8421_v8 = vadd.f32 %v10926_v46, %v6007_v5 }
 0x62d   : > { %6181 = vst.msk [vmem:[%s10937_s23 + $0xd8] sm:$0xff] %vm225_vm1, %v6149_v3  ;;  %v6119_v11 = vadd.f32 %v8420_v4, %v6087_v0 }
 0x62e   : > { %6180 = vst.msk [vmem:[%s10937_s23 + $0xd0] sm:$0xff] %vm225_vm1, %v6148_v7  ;;  %v6118_v12 = vadd.f32 %v8421_v8, %v6086_v6  ;;  %v8359_v13 = vpop.f32.mrb[30].mxu1 }
 0x62f   : > { %v6151_v15 = vmax.f32 %v6119_v11, 0.0  ;;  %v8422_v16 = vadd.f32 %v8359_v13, %v10926_v46  ;;  %v6017_v19 = vpop.f32.mrb[31].mxu1 }
 0x630   : > { %v6150_v21 = vmax.f32 %v6118_v12, 0.0  ;;  %v8423_v22 = vadd.f32 %v10926_v46, %v6017_v19 }
 0x631   : > { %6183 = vst.msk [vmem:[%s10937_s23 + $0xe8] sm:$0xff] %vm225_vm1, %v6151_v15  ;;  %v6121_v23 = vadd.f32 %v8422_v16, %v6089_v14 }
 0x632   : > { %6182 = vst.msk [vmem:[%s10937_s23 + $0xe0] sm:$0xff] %vm225_vm1, %v6150_v21  ;;  %v6120_v24 = vadd.f32 %v8423_v22, %v6088_v20 }
 0x633   : > { %v6153_v29 = vmax.f32 %v6121_v23, 0.0 }
 0x634   : > { %v6152_v30 = vmax.f32 %v6120_v24, 0.0 }
 0x635   : > { %6185 = vst.msk [vmem:[%s10937_s23 + $0xf8] sm:$0xff] %vm225_vm1, %v6153_v29 }
 0x636   : > { %6184 = vst.msk [vmem:[%s10937_s23 + $0xf0] sm:$0xff] %vm225_vm1, %v6152_v30 }
 0x637 PF: > { %s15_s18 = sadd.s32 1, %s8951_s18  }
 0x638   : > { %p12_p4 = scmp.ge.s32.totalorder %s15_s18, 4  }
 0x63a   :  { %14 = sbr.rel (!%p12_p4) target bundleno = 1 (0x1), region = 88 }

</bundles_post_ra>
